<compile_context>
chip_gen: v7x
topology: tpu7x:2x2x1
jax: 0.10.0
libtpu: 0.0.40
codegen_flags: <defaults>
</compile_context>

<pallas_src>
import functools

import jax
import jax.numpy as jnp
from jax.experimental import pallas as pl
from jax.experimental.pallas import tpu as pltpu

EPS = 1e-5  # PyTorch nn.LayerNorm default eps


def _layernorm(x, g, b):
    m = jnp.mean(x, axis=-1, keepdims=True)
    v = jnp.mean((x - m) ** 2, axis=-1, keepdims=True)
    return (x - m) * jax.lax.rsqrt(v + EPS) * g + b


def _gelu_exact(x):
    # nn.GELU() default = exact erf formulation
    return 0.5 * x * (1.0 + jax.lax.erf(x * (2.0 ** -0.5)))


# ----------------------------------------------------------------------------
# Fused kernel: one grid step == one batch element, full forward pass
# ----------------------------------------------------------------------------
def fused_vit_encoder_kernel(
    patches_ref, pos_ref,
    ln_in_g_ref, ln_in_b_ref, w_proj_ref, b_proj_ref, ln_pr_g_ref, ln_pr_b_ref,
    a_ln_g_ref, a_ln_b_ref, wq_ref, wk_ref, wv_ref, wo_ref, bo_ref,
    f_ln_g_ref, f_ln_b_ref, w1_ref, b1_ref, w2_ref, b2_ref,
    fin_g_ref, fin_b_ref,
    o_ref, *, depth, heads, dim_head):

    p = patches_ref[0].astype(jnp.float32)                      # (N, P)

    # --- patch embedding: LN(P) -> Linear(P, D) -> LN(D) ; then + pos ---
    xn = _layernorm(p, ln_in_g_ref[...], ln_in_b_ref[...])
    x = jnp.dot(xn, w_proj_ref[...],
                preferred_element_type=jnp.float32) + b_proj_ref[...]
    x = _layernorm(x, ln_pr_g_ref[...], ln_pr_b_ref[...])
    x = x + pos_ref[0]                                          # (N, D)

    scale = dim_head ** -0.5

    # Static unroll over depth (depth is small; weights indexed statically, so
    # no per-iteration re-broadcast / re-cast work is introduced).
    for l in range(depth):
        # ------------------- attention + residual -------------------
        xn = _layernorm(x, a_ln_g_ref[l], a_ln_b_ref[l])        # (N, D)
        xh = jnp.broadcast_to(xn, (heads,) + xn.shape)          # (h, N, D)

        q = jnp.einsum('hnd,hde->hne', xh, wq_ref[l],
                       preferred_element_type=jnp.float32)      # (h, N, dh)
        k = jnp.einsum('hnd,hde->hne', xh, wk_ref[l],
                       preferred_element_type=jnp.float32)
        v = jnp.einsum('hnd,hde->hne', xh, wv_ref[l],
                       preferred_element_type=jnp.float32)

        dots = jnp.einsum('hne,hme->hnm', q, k,
                          preferred_element_type=jnp.float32) * scale
        dots = dots - jnp.max(dots, axis=-1, keepdims=True)
        pexp = jnp.exp(dots)
        inv = pl.reciprocal(jnp.sum(pexp, axis=-1, keepdims=True), approx=True)
        attn = pexp * inv                                       # (h, N, N)

        oh = jnp.einsum('hnm,hme->hne', attn, v,
                        preferred_element_type=jnp.float32)     # (h, N, dh)
        proj = jnp.sum(jnp.einsum('hne,hef->hnf', oh, wo_ref[l],
                                  preferred_element_type=jnp.float32),
                       axis=0)                                  # (N, D)
        x = proj + bo_ref[l] + x

        # ------------------- feedforward + residual -------------------
        xn = _layernorm(x, f_ln_g_ref[l], f_ln_b_ref[l])
        h1 = jnp.dot(xn, w1_ref[l],
                     preferred_element_type=jnp.float32) + b1_ref[l]
        h1 = _gelu_exact(h1)
        x = jnp.dot(h1, w2_ref[l],
                    preferred_element_type=jnp.float32) + b2_ref[l] + x

    # ------------------- final LayerNorm -------------------
    o_ref[0] = _layernorm(x, fin_g_ref[...], fin_b_ref[...]).astype(o_ref.dtype)


# ----------------------------------------------------------------------------
# Wrapper: patchify + weight re-layout + single pallas_call
# ----------------------------------------------------------------------------
def _full_spec(shape):
    nd = len(shape)
    return pl.BlockSpec(shape, lambda b, _nd=nd: (0,) * _nd)


def basic_vit_encoder(x_img, params, *, patch_size, depth, heads, dim_head):
    B, C, H, W = x_img.shape
    ph = pw = patch_size
    nh, nw = H // ph, W // pw
    N = nh * nw
    P = C * ph * pw
    D = params["w_proj"].shape[1]
    mlp = params["layers"][0]["ff"]["w1"].shape[-1]

    # Patch extraction: 'n c (h ph) (w pw) -> n (h w) (ph pw c)'.
    # Pure layout plumbing -> done wrapper-side, not in the kernel.
    patches = x_img.reshape(B, C, nh, ph, nw, pw)
    patches = patches.transpose(0, 2, 4, 3, 5, 1).reshape(B, N, P)

    # Depth-stacked + per-head weight layout (done once, outside the kernel).
    def stack(path):
        return jnp.stack([lp[path[0]][path[1]] for lp in params["layers"]])

    wq_l, wk_l, wv_l = [], [], []
    for lp in params["layers"]:
        q, k, v = jnp.split(lp["attn"]["w_qkv"], 3, axis=-1)    # each (D, inner)
        to_heads = lambda w: w.reshape(D, heads, dim_head).transpose(1, 0, 2)
        wq_l.append(to_heads(q))
        wk_l.append(to_heads(k))
        wv_l.append(to_heads(v))
    wq = jnp.stack(wq_l)                                        # (depth, h, D, dh)
    wk = jnp.stack(wk_l)
    wv = jnp.stack(wv_l)
    wo = jnp.stack([lp["attn"]["w_out"].reshape(heads, dim_head, D)
                    for lp in params["layers"]])                # (depth, h, dh, D)

    a_ln_g = stack(("attn", "ln_g")); a_ln_b = stack(("attn", "ln_b"))
    bo     = stack(("attn", "b_out"))
    f_ln_g = stack(("ff", "ln_g"));   f_ln_b = stack(("ff", "ln_b"))
    w1 = stack(("ff", "w1")); b1 = stack(("ff", "b1"))
    w2 = stack(("ff", "w2")); b2 = stack(("ff", "b2"))

    kernel = functools.partial(fused_vit_encoder_kernel,
                               depth=depth, heads=heads, dim_head=dim_head)

    return pl.pallas_call(
        kernel,
        out_shape=jax.ShapeDtypeStruct((B, N, D), x_img.dtype),
        grid=(B,),
        in_specs=[
            pl.BlockSpec((1, N, P), lambda b: (b, 0, 0)),       # patches
            _full_spec((1, N, D)),                              # pos embedding
            _full_spec((1, P)), _full_spec((1, P)),             # ln_in g/b
            _full_spec((P, D)), _full_spec((1, D)),             # w_proj, b_proj
            _full_spec((1, D)), _full_spec((1, D)),             # ln_pr g/b
            _full_spec((depth, 1, D)), _full_spec((depth, 1, D)),        # attn LN
            _full_spec((depth, heads, D, dim_head)),                     # wq
            _full_spec((depth, heads, D, dim_head)),                     # wk
            _full_spec((depth, heads, D, dim_head)),                     # wv
            _full_spec((depth, heads, dim_head, D)),                     # wo
            _full_spec((depth, 1, D)),                                   # b_out
            _full_spec((depth, 1, D)), _full_spec((depth, 1, D)),        # ff LN
            _full_spec((depth, D, mlp)), _full_spec((depth, 1, mlp)),    # w1, b1
            _full_spec((depth, mlp, D)), _full_spec((depth, 1, D)),      # w2, b2
            _full_spec((1, D)), _full_spec((1, D)),                      # final LN
        ],
        out_specs=pl.BlockSpec((1, N, D), lambda b: (b, 0, 0)),
        compiler_params=pltpu.CompilerParams(
            dimension_semantics=("parallel",)),   # batch -> both TCs on v7x
    )(patches, params["pos"],
      params["ln_in_g"], params["ln_in_b"], params["w_proj"], params["b_proj"],
      params["ln_pr_g"], params["ln_pr_b"],
      a_ln_g, a_ln_b, wq, wk, wv, wo, bo,
      f_ln_g, f_ln_b, w1, b1, w2, b2,
      params["fin_g"], params["fin_b"])


# ----------------------------------------------------------------------------
# Deterministic parameter init (shapes match the PyTorch module __init__)
# ----------------------------------------------------------------------------
def init_params(key, *, C, image_size, patch_size, D, depth, heads, dim_head,
                mlp_dim):
    P = C * patch_size * patch_size
    N = (image_size // patch_size) ** 2
    inner = heads * dim_head
    key, kpos, kproj = jax.random.split(key, 3)
    params = dict(
        pos=jax.random.normal(kpos, (1, N, D), jnp.float32),
        ln_in_g=jnp.ones((1, P), jnp.float32),
        ln_in_b=jnp.zeros((1, P), jnp.float32),
        w_proj=jax.random.normal(kproj, (P, D), jnp.float32) * P ** -0.5,
        b_proj=jnp.zeros((1, D), jnp.float32),
        ln_pr_g=jnp.ones((1, D), jnp.float32),
        ln_pr_b=jnp.zeros((1, D), jnp.float32),
        fin_g=jnp.ones((1, D), jnp.float32),
        fin_b=jnp.zeros((1, D), jnp.float32),
        layers=[],
    )
    for _ in range(depth):
        key, k0, k1, k2, k3 = jax.random.split(key, 5)
        attn = dict(
            ln_g=jnp.ones((1, D), jnp.float32),
            ln_b=jnp.zeros((1, D), jnp.float32),
            w_qkv=jax.random.normal(k0, (D, 3 * inner), jnp.float32) * D ** -0.5,
            w_out=jax.random.normal(k1, (inner, D), jnp.float32) * inner ** -0.5,
            b_out=jnp.zeros((1, D), jnp.float32),
        )
        ff = dict(
            ln_g=jnp.ones((1, D), jnp.float32),
            ln_b=jnp.zeros((1, D), jnp.float32),
            w1=jax.random.normal(k2, (D, mlp_dim), jnp.float32) * D ** -0.5,
            b1=jnp.zeros((1, mlp_dim), jnp.float32),
            w2=jax.random.normal(k3, (mlp_dim, D), jnp.float32) * mlp_dim ** -0.5,
            b2=jnp.zeros((1, D), jnp.float32),
        )
        params["layers"].append(dict(attn=attn, ff=ff))
    return params


# ----------------------------------------------------------------------------
# Pure-JAX reference (mirrors the PyTorch forward) for the sanity check
# ----------------------------------------------------------------------------
def _ref_forward(x_img, params, *, patch_size, heads, dim_head):
    B, C, H, W = x_img.shape
    ph = pw = patch_size
    nh, nw = H // ph, W // pw
    patches = x_img.reshape(B, C, nh, ph, nw, pw)
    patches = patches.transpose(0, 2, 4, 3, 5, 1).reshape(B, nh * nw, C * ph * pw)

    x = _layernorm(patches, params["ln_in_g"], params["ln_in_b"])
    x = x @ params["w_proj"] + params["b_proj"]
    x = _layernorm(x, params["ln_pr_g"], params["ln_pr_b"])
    x = x + params["pos"]

    inner = heads * dim_head
    for lp in params["layers"]:
        ap, fp = lp["attn"], lp["ff"]
        xn = _layernorm(x, ap["ln_g"], ap["ln_b"])
        qkv = xn @ ap["w_qkv"]
        q, k, v = jnp.split(qkv, 3, axis=-1)

        def split_heads(t):  # b n (h d) -> b h n d
            b_, n_, _ = t.shape
            return t.reshape(b_, n_, heads, dim_head).transpose(0, 2, 1, 3)

        q, k, v = map(split_heads, (q, k, v))
        dots = jnp.einsum("bhnd,bhmd->bhnm", q, k) * dim_head ** -0.5
        attn = jax.nn.softmax(dots, axis=-1)
        out = jnp.einsum("bhnm,bhmd->bhnd", attn, v)
        out = out.transpose(0, 2, 1, 3).reshape(x.shape[0], x.shape[1], inner)
        x = out @ ap["w_out"] + ap["b_out"] + x

        xn = _layernorm(x, fp["ln_g"], fp["ln_b"])
        h = _gelu_exact(xn @ fp["w1"] + fp["b1"])
        x = h @ fp["w2"] + fp["b2"] + x
    return _layernorm(x, params["fin_g"], params["fin_b"])


if __name__ == "__main__":
    # BasicViTEncoder(input_channels=4, image_size=16, patch_size=4,
    #                 latent_size=32, depth=2, heads=8, ff_dim=64)
    # Note: TransEncoder passes dim_head = heads to CustomTransformer.
    B, C, IMG, PATCH = 2, 4, 16, 4
    D, depth, heads, ff_dim = 32, 2, 8, 64
    dim_head = heads

    key = jax.random.PRNGKey(0)
    key, xkey = jax.random.split(key)
    x = jax.random.normal(xkey, (B, C, IMG, IMG), jnp.float32)

    params = init_params(key, C=C, image_size=IMG, patch_size=PATCH, D=D,
                         depth=depth, heads=heads, dim_head=dim_head,
                         mlp_dim=ff_dim)

    out = basic_vit_encoder(x, params, patch_size=PATCH, depth=depth,
                            heads=heads, dim_head=dim_head)
    out = jax.block_until_ready(out)

    N = (IMG // PATCH) ** 2
    assert out.shape == (B, N, D)

    ref = _ref_forward(x, params, patch_size=PATCH, heads=heads,
                       dim_head=dim_head)
    # Tolerance accounts for the approx (EUP) reciprocal in the softmax denom.
    assert jnp.allclose(out, ref, atol=1e-2, rtol=1e-2), \
        "mismatch vs pure-JAX reference"

    print("KERNEL_OK")
</pallas_src>

<mosaic_0001>
module attributes {stable_mosaic.version = 11 : i64} {
  func.func @fused_vit_encoder_kernel(%arg0: i32, %arg1: memref<1x16x64xf32, #tpu.memory_space<vmem>>, %arg2: memref<1x16x32xf32, #tpu.memory_space<vmem>>, %arg3: memref<1x64xf32, #tpu.memory_space<vmem>>, %arg4: memref<1x64xf32, #tpu.memory_space<vmem>>, %arg5: memref<64x32xf32, #tpu.memory_space<vmem>>, %arg6: memref<1x32xf32, #tpu.memory_space<vmem>>, %arg7: memref<1x32xf32, #tpu.memory_space<vmem>>, %arg8: memref<1x32xf32, #tpu.memory_space<vmem>>, %arg9: memref<2x1x32xf32, #tpu.memory_space<vmem>>, %arg10: memref<2x1x32xf32, #tpu.memory_space<vmem>>, %arg11: memref<2x8x32x8xf32, #tpu.memory_space<vmem>>, %arg12: memref<2x8x32x8xf32, #tpu.memory_space<vmem>>, %arg13: memref<2x8x32x8xf32, #tpu.memory_space<vmem>>, %arg14: memref<2x8x8x32xf32, #tpu.memory_space<vmem>>, %arg15: memref<2x1x32xf32, #tpu.memory_space<vmem>>, %arg16: memref<2x1x32xf32, #tpu.memory_space<vmem>>, %arg17: memref<2x1x32xf32, #tpu.memory_space<vmem>>, %arg18: memref<2x32x64xf32, #tpu.memory_space<vmem>>, %arg19: memref<2x1x64xf32, #tpu.memory_space<vmem>>, %arg20: memref<2x64x32xf32, #tpu.memory_space<vmem>>, %arg21: memref<2x1x32xf32, #tpu.memory_space<vmem>>, %arg22: memref<1x32xf32, #tpu.memory_space<vmem>>, %arg23: memref<1x32xf32, #tpu.memory_space<vmem>>, %arg24: memref<1x16x32xf32, #tpu.memory_space<vmem>>) attributes {dimension_semantics = [#tpu.dimension_semantics<parallel>], iteration_bounds = array<i64: 2>, scalar_prefetch = 0 : i64, scratch_operands = 0 : i64, tpu.core_type = #tpu.core_type<tc>, window_params = [{transform_indices = @transform_0, window_bounds = array<i64: 1, 16, 64>}, {pipeline_mode = #tpu.pipeline_mode<synchronous>, transform_indices = @transform_1, window_bounds = array<i64: 1, 16, 32>}, {pipeline_mode = #tpu.pipeline_mode<synchronous>, transform_indices = @transform_2, window_bounds = array<i64: 1, 64>}, {pipeline_mode = #tpu.pipeline_mode<synchronous>, transform_indices = @transform_3, window_bounds = array<i64: 1, 64>}, {pipeline_mode = #tpu.pipeline_mode<synchronous>, transform_indices = @transform_4, window_bounds = array<i64: 64, 32>}, {pipeline_mode = #tpu.pipeline_mode<synchronous>, transform_indices = @transform_5, window_bounds = array<i64: 1, 32>}, {pipeline_mode = #tpu.pipeline_mode<synchronous>, transform_indices = @transform_6, window_bounds = array<i64: 1, 32>}, {pipeline_mode = #tpu.pipeline_mode<synchronous>, transform_indices = @transform_7, window_bounds = array<i64: 1, 32>}, {pipeline_mode = #tpu.pipeline_mode<synchronous>, transform_indices = @transform_8, window_bounds = array<i64: 2, 1, 32>}, {pipeline_mode = #tpu.pipeline_mode<synchronous>, transform_indices = @transform_9, window_bounds = array<i64: 2, 1, 32>}, {pipeline_mode = #tpu.pipeline_mode<synchronous>, transform_indices = @transform_10, window_bounds = array<i64: 2, 8, 32, 8>}, {pipeline_mode = #tpu.pipeline_mode<synchronous>, transform_indices = @transform_11, window_bounds = array<i64: 2, 8, 32, 8>}, {pipeline_mode = #tpu.pipeline_mode<synchronous>, transform_indices = @transform_12, window_bounds = array<i64: 2, 8, 32, 8>}, {pipeline_mode = #tpu.pipeline_mode<synchronous>, transform_indices = @transform_13, window_bounds = array<i64: 2, 8, 8, 32>}, {pipeline_mode = #tpu.pipeline_mode<synchronous>, transform_indices = @transform_14, window_bounds = array<i64: 2, 1, 32>}, {pipeline_mode = #tpu.pipeline_mode<synchronous>, transform_indices = @transform_15, window_bounds = array<i64: 2, 1, 32>}, {pipeline_mode = #tpu.pipeline_mode<synchronous>, transform_indices = @transform_16, window_bounds = array<i64: 2, 1, 32>}, {pipeline_mode = #tpu.pipeline_mode<synchronous>, transform_indices = @transform_17, window_bounds = array<i64: 2, 32, 64>}, {pipeline_mode = #tpu.pipeline_mode<synchronous>, transform_indices = @transform_18, window_bounds = array<i64: 2, 1, 64>}, {pipeline_mode = #tpu.pipeline_mode<synchronous>, transform_indices = @transform_19, window_bounds = array<i64: 2, 64, 32>}, {pipeline_mode = #tpu.pipeline_mode<synchronous>, transform_indices = @transform_20, window_bounds = array<i64: 2, 1, 32>}, {pipeline_mode = #tpu.pipeline_mode<synchronous>, transform_indices = @transform_21, window_bounds = array<i64: 1, 32>}, {pipeline_mode = #tpu.pipeline_mode<synchronous>, transform_indices = @transform_22, window_bounds = array<i64: 1, 32>}, {transform_indices = @transform_23, window_bounds = array<i64: 1, 16, 32>}]} {
    %c0 = arith.constant 0 : index
    %c0_0 = arith.constant 0 : index
    %c0_1 = arith.constant 0 : index
    %0 = vector.load %arg1[%c0, %c0_0, %c0_1] : memref<1x16x64xf32, #tpu.memory_space<vmem>>, vector<1x16x64xf32>
    %1 = vector.shape_cast %0 : vector<1x16x64xf32> to vector<16x64xf32>
    %c0_2 = arith.constant 0 : index
    %c0_3 = arith.constant 0 : index
    %2 = vector.load %arg3[%c0_2, %c0_3] : memref<1x64xf32, #tpu.memory_space<vmem>>, vector<1x64xf32>
    %c0_4 = arith.constant 0 : index
    %c0_5 = arith.constant 0 : index
    %3 = vector.load %arg4[%c0_4, %c0_5] : memref<1x64xf32, #tpu.memory_space<vmem>>, vector<1x64xf32>
    %cst = arith.constant dense<0.000000e+00> : vector<16xf32>
    %4 = vector.multi_reduction <add>, %1, %cst [1] : vector<16x64xf32> to vector<16xf32>
    %5 = vector.shape_cast %4 : vector<16xf32> to vector<16x1xf32>
    %cst_6 = arith.constant 6.400000e+01 : f32
    %6 = vector.broadcast %cst_6 : f32 to vector<16x1xf32>
    %7 = arith.divf %5, %6 : vector<16x1xf32>
    %8 = vector.broadcast %7 : vector<16x1xf32> to vector<16x64xf32>
    %9 = arith.subf %1, %8 : vector<16x64xf32>
    %10 = arith.mulf %9, %9 : vector<16x64xf32>
    %cst_7 = arith.constant dense<0.000000e+00> : vector<16xf32>
    %11 = vector.multi_reduction <add>, %10, %cst_7 [1] : vector<16x64xf32> to vector<16xf32>
    %12 = vector.shape_cast %11 : vector<16xf32> to vector<16x1xf32>
    %cst_8 = arith.constant 6.400000e+01 : f32
    %13 = vector.broadcast %cst_8 : f32 to vector<16x1xf32>
    %14 = arith.divf %12, %13 : vector<16x1xf32>
    %15 = vector.broadcast %7 : vector<16x1xf32> to vector<16x64xf32>
    %16 = arith.subf %1, %15 : vector<16x64xf32>
    %cst_9 = arith.constant 9.99999974E-6 : f32
    %17 = vector.broadcast %cst_9 : f32 to vector<16x1xf32>
    %18 = arith.addf %14, %17 : vector<16x1xf32>
    %19 = math.rsqrt %18 : vector<16x1xf32>
    %20 = vector.broadcast %19 : vector<16x1xf32> to vector<16x64xf32>
    %21 = arith.mulf %16, %20 : vector<16x64xf32>
    %22 = vector.broadcast %2 : vector<1x64xf32> to vector<16x64xf32>
    %23 = arith.mulf %21, %22 : vector<16x64xf32>
    %24 = vector.broadcast %3 : vector<1x64xf32> to vector<16x64xf32>
    %25 = arith.addf %23, %24 : vector<16x64xf32>
    %c0_10 = arith.constant 0 : index
    %c0_11 = arith.constant 0 : index
    %26 = vector.load %arg5[%c0_10, %c0_11] : memref<64x32xf32, #tpu.memory_space<vmem>>, vector<64x32xf32>
    %cst_12 = arith.constant dense<0.000000e+00> : vector<16x32xf32>
    %27 = tpu.matmul %25, %26, %cst_12 {dimension_numbers = #tpu.dot_dimension_numbers<[1], [0], [0], [1], [0, 0, 1, 1], [], []>} : vector<16x64xf32>, vector<64x32xf32>, vector<16x32xf32> -> vector<16x32xf32>
    %c0_13 = arith.constant 0 : index
    %c0_14 = arith.constant 0 : index
    %28 = vector.load %arg6[%c0_13, %c0_14] : memref<1x32xf32, #tpu.memory_space<vmem>>, vector<1x32xf32>
    %29 = vector.broadcast %28 : vector<1x32xf32> to vector<16x32xf32>
    %30 = arith.addf %27, %29 : vector<16x32xf32>
    %c0_15 = arith.constant 0 : index
    %c0_16 = arith.constant 0 : index
    %31 = vector.load %arg7[%c0_15, %c0_16] : memref<1x32xf32, #tpu.memory_space<vmem>>, vector<1x32xf32>
    %c0_17 = arith.constant 0 : index
    %c0_18 = arith.constant 0 : index
    %32 = vector.load %arg8[%c0_17, %c0_18] : memref<1x32xf32, #tpu.memory_space<vmem>>, vector<1x32xf32>
    %cst_19 = arith.constant dense<0.000000e+00> : vector<16xf32>
    %33 = vector.multi_reduction <add>, %30, %cst_19 [1] : vector<16x32xf32> to vector<16xf32>
    %34 = vector.shape_cast %33 : vector<16xf32> to vector<16x1xf32>
    %cst_20 = arith.constant 3.200000e+01 : f32
    %35 = vector.broadcast %cst_20 : f32 to vector<16x1xf32>
    %36 = arith.divf %34, %35 : vector<16x1xf32>
    %37 = vector.broadcast %36 : vector<16x1xf32> to vector<16x32xf32>
    %38 = arith.subf %30, %37 : vector<16x32xf32>
    %39 = arith.mulf %38, %38 : vector<16x32xf32>
    %cst_21 = arith.constant dense<0.000000e+00> : vector<16xf32>
    %40 = vector.multi_reduction <add>, %39, %cst_21 [1] : vector<16x32xf32> to vector<16xf32>
    %41 = vector.shape_cast %40 : vector<16xf32> to vector<16x1xf32>
    %cst_22 = arith.constant 3.200000e+01 : f32
    %42 = vector.broadcast %cst_22 : f32 to vector<16x1xf32>
    %43 = arith.divf %41, %42 : vector<16x1xf32>
    %44 = vector.broadcast %36 : vector<16x1xf32> to vector<16x32xf32>
    %45 = arith.subf %30, %44 : vector<16x32xf32>
    %cst_23 = arith.constant 9.99999974E-6 : f32
    %46 = vector.broadcast %cst_23 : f32 to vector<16x1xf32>
    %47 = arith.addf %43, %46 : vector<16x1xf32>
    %48 = math.rsqrt %47 : vector<16x1xf32>
    %49 = vector.broadcast %48 : vector<16x1xf32> to vector<16x32xf32>
    %50 = arith.mulf %45, %49 : vector<16x32xf32>
    %51 = vector.broadcast %31 : vector<1x32xf32> to vector<16x32xf32>
    %52 = arith.mulf %50, %51 : vector<16x32xf32>
    %53 = vector.broadcast %32 : vector<1x32xf32> to vector<16x32xf32>
    %54 = arith.addf %52, %53 : vector<16x32xf32>
    %c0_24 = arith.constant 0 : index
    %c0_25 = arith.constant 0 : index
    %c0_26 = arith.constant 0 : index
    %55 = vector.load %arg2[%c0_24, %c0_25, %c0_26] : memref<1x16x32xf32, #tpu.memory_space<vmem>>, vector<1x16x32xf32>
    %56 = vector.shape_cast %55 : vector<1x16x32xf32> to vector<16x32xf32>
    %57 = arith.addf %54, %56 : vector<16x32xf32>
    %c0_27 = arith.constant 0 : index
    %c0_28 = arith.constant 0 : index
    %c0_29 = arith.constant 0 : index
    %58 = vector.load %arg9[%c0_27, %c0_28, %c0_29] : memref<2x1x32xf32, #tpu.memory_space<vmem>>, vector<1x1x32xf32>
    %59 = vector.shape_cast %58 : vector<1x1x32xf32> to vector<1x32xf32>
    %c0_30 = arith.constant 0 : index
    %c0_31 = arith.constant 0 : index
    %c0_32 = arith.constant 0 : index
    %60 = vector.load %arg10[%c0_30, %c0_31, %c0_32] : memref<2x1x32xf32, #tpu.memory_space<vmem>>, vector<1x1x32xf32>
    %61 = vector.shape_cast %60 : vector<1x1x32xf32> to vector<1x32xf32>
    %cst_33 = arith.constant dense<0.000000e+00> : vector<16xf32>
    %62 = vector.multi_reduction <add>, %57, %cst_33 [1] : vector<16x32xf32> to vector<16xf32>
    %63 = vector.shape_cast %62 : vector<16xf32> to vector<16x1xf32>
    %cst_34 = arith.constant 3.200000e+01 : f32
    %64 = vector.broadcast %cst_34 : f32 to vector<16x1xf32>
    %65 = arith.divf %63, %64 : vector<16x1xf32>
    %66 = vector.broadcast %65 : vector<16x1xf32> to vector<16x32xf32>
    %67 = arith.subf %57, %66 : vector<16x32xf32>
    %68 = arith.mulf %67, %67 : vector<16x32xf32>
    %cst_35 = arith.constant dense<0.000000e+00> : vector<16xf32>
    %69 = vector.multi_reduction <add>, %68, %cst_35 [1] : vector<16x32xf32> to vector<16xf32>
    %70 = vector.shape_cast %69 : vector<16xf32> to vector<16x1xf32>
    %cst_36 = arith.constant 3.200000e+01 : f32
    %71 = vector.broadcast %cst_36 : f32 to vector<16x1xf32>
    %72 = arith.divf %70, %71 : vector<16x1xf32>
    %73 = vector.broadcast %65 : vector<16x1xf32> to vector<16x32xf32>
    %74 = arith.subf %57, %73 : vector<16x32xf32>
    %cst_37 = arith.constant 9.99999974E-6 : f32
    %75 = vector.broadcast %cst_37 : f32 to vector<16x1xf32>
    %76 = arith.addf %72, %75 : vector<16x1xf32>
    %77 = math.rsqrt %76 : vector<16x1xf32>
    %78 = vector.broadcast %77 : vector<16x1xf32> to vector<16x32xf32>
    %79 = arith.mulf %74, %78 : vector<16x32xf32>
    %80 = vector.broadcast %59 : vector<1x32xf32> to vector<16x32xf32>
    %81 = arith.mulf %79, %80 : vector<16x32xf32>
    %82 = vector.broadcast %61 : vector<1x32xf32> to vector<16x32xf32>
    %83 = arith.addf %81, %82 : vector<16x32xf32>
    %84 = vector.shape_cast %83 : vector<16x32xf32> to vector<1x16x32xf32>
    %85 = vector.broadcast %84 : vector<1x16x32xf32> to vector<8x16x32xf32>
    %c0_38 = arith.constant 0 : index
    %c0_39 = arith.constant 0 : index
    %c0_40 = arith.constant 0 : index
    %c0_41 = arith.constant 0 : index
    %86 = vector.load %arg11[%c0_38, %c0_39, %c0_40, %c0_41] : memref<2x8x32x8xf32, #tpu.memory_space<vmem>>, vector<1x8x32x8xf32>
    %87 = vector.shape_cast %86 : vector<1x8x32x8xf32> to vector<8x32x8xf32>
    "tpu.trace_start"() <{level = 10 : i32, message = "hnd,hde->hne"}> : () -> ()
    %cst_42 = arith.constant dense<0.000000e+00> : vector<8x16x8xf32>
    %88 = tpu.matmul %85, %87, %cst_42 {dimension_numbers = #tpu.dot_dimension_numbers<[2], [1], [1], [2], [0, 0, 0, 1, 1, 2], [0], [0]>} : vector<8x16x32xf32>, vector<8x32x8xf32>, vector<8x16x8xf32> -> vector<8x16x8xf32>
    "tpu.trace_stop"() : () -> ()
    %c0_43 = arith.constant 0 : index
    %c0_44 = arith.constant 0 : index
    %c0_45 = arith.constant 0 : index
    %c0_46 = arith.constant 0 : index
    %89 = vector.load %arg12[%c0_43, %c0_44, %c0_45, %c0_46] : memref<2x8x32x8xf32, #tpu.memory_space<vmem>>, vector<1x8x32x8xf32>
    %90 = vector.shape_cast %89 : vector<1x8x32x8xf32> to vector<8x32x8xf32>
    "tpu.trace_start"() <{level = 10 : i32, message = "hnd,hde->hne"}> : () -> ()
    %cst_47 = arith.constant dense<0.000000e+00> : vector<8x16x8xf32>
    %91 = tpu.matmul %85, %90, %cst_47 {dimension_numbers = #tpu.dot_dimension_numbers<[2], [1], [1], [2], [0, 0, 0, 1, 1, 2], [0], [0]>} : vector<8x16x32xf32>, vector<8x32x8xf32>, vector<8x16x8xf32> -> vector<8x16x8xf32>
    "tpu.trace_stop"() : () -> ()
    %c0_48 = arith.constant 0 : index
    %c0_49 = arith.constant 0 : index
    %c0_50 = arith.constant 0 : index
    %c0_51 = arith.constant 0 : index
    %92 = vector.load %arg13[%c0_48, %c0_49, %c0_50, %c0_51] : memref<2x8x32x8xf32, #tpu.memory_space<vmem>>, vector<1x8x32x8xf32>
    %93 = vector.shape_cast %92 : vector<1x8x32x8xf32> to vector<8x32x8xf32>
    "tpu.trace_start"() <{level = 10 : i32, message = "hnd,hde->hne"}> : () -> ()
    %cst_52 = arith.constant dense<0.000000e+00> : vector<8x16x8xf32>
    %94 = tpu.matmul %85, %93, %cst_52 {dimension_numbers = #tpu.dot_dimension_numbers<[2], [1], [1], [2], [0, 0, 0, 1, 1, 2], [0], [0]>} : vector<8x16x32xf32>, vector<8x32x8xf32>, vector<8x16x8xf32> -> vector<8x16x8xf32>
    "tpu.trace_stop"() : () -> ()
    "tpu.trace_start"() <{level = 10 : i32, message = "hne,hme->hnm"}> : () -> ()
    %cst_53 = arith.constant dense<0.000000e+00> : vector<8x16x16xf32>
    %95 = tpu.matmul %88, %91, %cst_53 {dimension_numbers = #tpu.dot_dimension_numbers<[2], [2], [1], [1], [0, 0, 0, 1, 1, 1], [0], [0]>} : vector<8x16x8xf32>, vector<8x16x8xf32>, vector<8x16x16xf32> -> vector<8x16x16xf32>
    "tpu.trace_stop"() : () -> ()
    %cst_54 = arith.constant 0.353553385 : f32
    %96 = vector.broadcast %cst_54 : f32 to vector<8x16x16xf32>
    %97 = arith.mulf %95, %96 : vector<8x16x16xf32>
    %cst_55 = arith.constant dense<0xFF800000> : vector<8x16xf32>
    %98 = vector.multi_reduction <maximumf>, %97, %cst_55 [2] : vector<8x16x16xf32> to vector<8x16xf32>
    %99 = vector.shape_cast %98 : vector<8x16xf32> to vector<8x16x1xf32>
    %100 = vector.broadcast %99 : vector<8x16x1xf32> to vector<8x16x16xf32>
    %101 = arith.subf %97, %100 : vector<8x16x16xf32>
    %102 = math.exp %101 : vector<8x16x16xf32>
    %cst_56 = arith.constant dense<0.000000e+00> : vector<8x16xf32>
    %103 = vector.multi_reduction <add>, %102, %cst_56 [2] : vector<8x16x16xf32> to vector<8x16xf32>
    %104 = vector.shape_cast %103 : vector<8x16xf32> to vector<8x16x1xf32>
    %105 = tpu.reciprocal %104 {approx = true} : vector<8x16x1xf32> -> vector<8x16x1xf32>
    %106 = vector.broadcast %105 : vector<8x16x1xf32> to vector<8x16x16xf32>
    %107 = arith.mulf %102, %106 : vector<8x16x16xf32>
    "tpu.trace_start"() <{level = 10 : i32, message = "hnm,hme->hne"}> : () -> ()
    %cst_57 = arith.constant dense<0.000000e+00> : vector<8x16x8xf32>
    %108 = tpu.matmul %107, %94, %cst_57 {dimension_numbers = #tpu.dot_dimension_numbers<[2], [1], [1], [2], [0, 0, 0, 1, 1, 2], [0], [0]>} : vector<8x16x16xf32>, vector<8x16x8xf32>, vector<8x16x8xf32> -> vector<8x16x8xf32>
    "tpu.trace_stop"() : () -> ()
    %c0_58 = arith.constant 0 : index
    %c0_59 = arith.constant 0 : index
    %c0_60 = arith.constant 0 : index
    %c0_61 = arith.constant 0 : index
    %109 = vector.load %arg14[%c0_58, %c0_59, %c0_60, %c0_61] : memref<2x8x8x32xf32, #tpu.memory_space<vmem>>, vector<1x8x8x32xf32>
    %110 = vector.shape_cast %109 : vector<1x8x8x32xf32> to vector<8x8x32xf32>
    "tpu.trace_start"() <{level = 10 : i32, message = "hne,hef->hnf"}> : () -> ()
    %cst_62 = arith.constant dense<0.000000e+00> : vector<8x16x32xf32>
    %111 = tpu.matmul %108, %110, %cst_62 {dimension_numbers = #tpu.dot_dimension_numbers<[2], [1], [1], [2], [0, 0, 0, 1, 1, 2], [0], [0]>} : vector<8x16x8xf32>, vector<8x8x32xf32>, vector<8x16x32xf32> -> vector<8x16x32xf32>
    "tpu.trace_stop"() : () -> ()
    %cst_63 = arith.constant dense<0.000000e+00> : vector<16x32xf32>
    %112 = vector.multi_reduction <add>, %111, %cst_63 [0] : vector<8x16x32xf32> to vector<16x32xf32>
    %c0_64 = arith.constant 0 : index
    %c0_65 = arith.constant 0 : index
    %c0_66 = arith.constant 0 : index
    %113 = vector.load %arg15[%c0_64, %c0_65, %c0_66] : memref<2x1x32xf32, #tpu.memory_space<vmem>>, vector<1x1x32xf32>
    %114 = vector.shape_cast %113 : vector<1x1x32xf32> to vector<1x32xf32>
    %115 = vector.broadcast %114 : vector<1x32xf32> to vector<16x32xf32>
    %116 = arith.addf %112, %115 : vector<16x32xf32>
    %117 = arith.addf %116, %57 : vector<16x32xf32>
    %c0_67 = arith.constant 0 : index
    %c0_68 = arith.constant 0 : index
    %c0_69 = arith.constant 0 : index
    %118 = vector.load %arg16[%c0_67, %c0_68, %c0_69] : memref<2x1x32xf32, #tpu.memory_space<vmem>>, vector<1x1x32xf32>
    %119 = vector.shape_cast %118 : vector<1x1x32xf32> to vector<1x32xf32>
    %c0_70 = arith.constant 0 : index
    %c0_71 = arith.constant 0 : index
    %c0_72 = arith.constant 0 : index
    %120 = vector.load %arg17[%c0_70, %c0_71, %c0_72] : memref<2x1x32xf32, #tpu.memory_space<vmem>>, vector<1x1x32xf32>
    %121 = vector.shape_cast %120 : vector<1x1x32xf32> to vector<1x32xf32>
    %cst_73 = arith.constant dense<0.000000e+00> : vector<16xf32>
    %122 = vector.multi_reduction <add>, %117, %cst_73 [1] : vector<16x32xf32> to vector<16xf32>
    %123 = vector.shape_cast %122 : vector<16xf32> to vector<16x1xf32>
    %cst_74 = arith.constant 3.200000e+01 : f32
    %124 = vector.broadcast %cst_74 : f32 to vector<16x1xf32>
    %125 = arith.divf %123, %124 : vector<16x1xf32>
    %126 = vector.broadcast %125 : vector<16x1xf32> to vector<16x32xf32>
    %127 = arith.subf %117, %126 : vector<16x32xf32>
    %128 = arith.mulf %127, %127 : vector<16x32xf32>
    %cst_75 = arith.constant dense<0.000000e+00> : vector<16xf32>
    %129 = vector.multi_reduction <add>, %128, %cst_75 [1] : vector<16x32xf32> to vector<16xf32>
    %130 = vector.shape_cast %129 : vector<16xf32> to vector<16x1xf32>
    %cst_76 = arith.constant 3.200000e+01 : f32
    %131 = vector.broadcast %cst_76 : f32 to vector<16x1xf32>
    %132 = arith.divf %130, %131 : vector<16x1xf32>
    %133 = vector.broadcast %125 : vector<16x1xf32> to vector<16x32xf32>
    %134 = arith.subf %117, %133 : vector<16x32xf32>
    %cst_77 = arith.constant 9.99999974E-6 : f32
    %135 = vector.broadcast %cst_77 : f32 to vector<16x1xf32>
    %136 = arith.addf %132, %135 : vector<16x1xf32>
    %137 = math.rsqrt %136 : vector<16x1xf32>
    %138 = vector.broadcast %137 : vector<16x1xf32> to vector<16x32xf32>
    %139 = arith.mulf %134, %138 : vector<16x32xf32>
    %140 = vector.broadcast %119 : vector<1x32xf32> to vector<16x32xf32>
    %141 = arith.mulf %139, %140 : vector<16x32xf32>
    %142 = vector.broadcast %121 : vector<1x32xf32> to vector<16x32xf32>
    %143 = arith.addf %141, %142 : vector<16x32xf32>
    %c0_78 = arith.constant 0 : index
    %c0_79 = arith.constant 0 : index
    %c0_80 = arith.constant 0 : index
    %144 = vector.load %arg18[%c0_78, %c0_79, %c0_80] : memref<2x32x64xf32, #tpu.memory_space<vmem>>, vector<1x32x64xf32>
    %145 = vector.shape_cast %144 : vector<1x32x64xf32> to vector<32x64xf32>
    %cst_81 = arith.constant dense<0.000000e+00> : vector<16x64xf32>
    %146 = tpu.matmul %143, %145, %cst_81 {dimension_numbers = #tpu.dot_dimension_numbers<[1], [0], [0], [1], [0, 0, 1, 1], [], []>} : vector<16x32xf32>, vector<32x64xf32>, vector<16x64xf32> -> vector<16x64xf32>
    %c0_82 = arith.constant 0 : index
    %c0_83 = arith.constant 0 : index
    %c0_84 = arith.constant 0 : index
    %147 = vector.load %arg19[%c0_82, %c0_83, %c0_84] : memref<2x1x64xf32, #tpu.memory_space<vmem>>, vector<1x1x64xf32>
    %148 = vector.shape_cast %147 : vector<1x1x64xf32> to vector<1x64xf32>
    %149 = vector.broadcast %148 : vector<1x64xf32> to vector<16x64xf32>
    %150 = arith.addf %146, %149 : vector<16x64xf32>
    %cst_85 = arith.constant 5.000000e-01 : f32
    %151 = vector.broadcast %cst_85 : f32 to vector<16x64xf32>
    %152 = arith.mulf %151, %150 : vector<16x64xf32>
    %cst_86 = arith.constant 0.707106769 : f32
    %153 = vector.broadcast %cst_86 : f32 to vector<16x64xf32>
    %154 = arith.mulf %150, %153 : vector<16x64xf32>
    %155 = math.erf %154 : vector<16x64xf32>
    %cst_87 = arith.constant 1.000000e+00 : f32
    %156 = vector.broadcast %cst_87 : f32 to vector<16x64xf32>
    %157 = arith.addf %156, %155 : vector<16x64xf32>
    %158 = arith.mulf %152, %157 : vector<16x64xf32>
    %c0_88 = arith.constant 0 : index
    %c0_89 = arith.constant 0 : index
    %c0_90 = arith.constant 0 : index
    %159 = vector.load %arg20[%c0_88, %c0_89, %c0_90] : memref<2x64x32xf32, #tpu.memory_space<vmem>>, vector<1x64x32xf32>
    %160 = vector.shape_cast %159 : vector<1x64x32xf32> to vector<64x32xf32>
    %cst_91 = arith.constant dense<0.000000e+00> : vector<16x32xf32>
    %161 = tpu.matmul %158, %160, %cst_91 {dimension_numbers = #tpu.dot_dimension_numbers<[1], [0], [0], [1], [0, 0, 1, 1], [], []>} : vector<16x64xf32>, vector<64x32xf32>, vector<16x32xf32> -> vector<16x32xf32>
    %c0_92 = arith.constant 0 : index
    %c0_93 = arith.constant 0 : index
    %c0_94 = arith.constant 0 : index
    %162 = vector.load %arg21[%c0_92, %c0_93, %c0_94] : memref<2x1x32xf32, #tpu.memory_space<vmem>>, vector<1x1x32xf32>
    %163 = vector.shape_cast %162 : vector<1x1x32xf32> to vector<1x32xf32>
    %164 = vector.broadcast %163 : vector<1x32xf32> to vector<16x32xf32>
    %165 = arith.addf %161, %164 : vector<16x32xf32>
    %166 = arith.addf %165, %117 : vector<16x32xf32>
    %c1 = arith.constant 1 : index
    %c0_95 = arith.constant 0 : index
    %c0_96 = arith.constant 0 : index
    %167 = vector.load %arg9[%c1, %c0_95, %c0_96] : memref<2x1x32xf32, #tpu.memory_space<vmem>>, vector<1x1x32xf32>
    %168 = vector.shape_cast %167 : vector<1x1x32xf32> to vector<1x32xf32>
    %c1_97 = arith.constant 1 : index
    %c0_98 = arith.constant 0 : index
    %c0_99 = arith.constant 0 : index
    %169 = vector.load %arg10[%c1_97, %c0_98, %c0_99] : memref<2x1x32xf32, #tpu.memory_space<vmem>>, vector<1x1x32xf32>
    %170 = vector.shape_cast %169 : vector<1x1x32xf32> to vector<1x32xf32>
    %cst_100 = arith.constant dense<0.000000e+00> : vector<16xf32>
    %171 = vector.multi_reduction <add>, %166, %cst_100 [1] : vector<16x32xf32> to vector<16xf32>
    %172 = vector.shape_cast %171 : vector<16xf32> to vector<16x1xf32>
    %cst_101 = arith.constant 3.200000e+01 : f32
    %173 = vector.broadcast %cst_101 : f32 to vector<16x1xf32>
    %174 = arith.divf %172, %173 : vector<16x1xf32>
    %175 = vector.broadcast %174 : vector<16x1xf32> to vector<16x32xf32>
    %176 = arith.subf %166, %175 : vector<16x32xf32>
    %177 = arith.mulf %176, %176 : vector<16x32xf32>
    %cst_102 = arith.constant dense<0.000000e+00> : vector<16xf32>
    %178 = vector.multi_reduction <add>, %177, %cst_102 [1] : vector<16x32xf32> to vector<16xf32>
    %179 = vector.shape_cast %178 : vector<16xf32> to vector<16x1xf32>
    %cst_103 = arith.constant 3.200000e+01 : f32
    %180 = vector.broadcast %cst_103 : f32 to vector<16x1xf32>
    %181 = arith.divf %179, %180 : vector<16x1xf32>
    %182 = vector.broadcast %174 : vector<16x1xf32> to vector<16x32xf32>
    %183 = arith.subf %166, %182 : vector<16x32xf32>
    %cst_104 = arith.constant 9.99999974E-6 : f32
    %184 = vector.broadcast %cst_104 : f32 to vector<16x1xf32>
    %185 = arith.addf %181, %184 : vector<16x1xf32>
    %186 = math.rsqrt %185 : vector<16x1xf32>
    %187 = vector.broadcast %186 : vector<16x1xf32> to vector<16x32xf32>
    %188 = arith.mulf %183, %187 : vector<16x32xf32>
    %189 = vector.broadcast %168 : vector<1x32xf32> to vector<16x32xf32>
    %190 = arith.mulf %188, %189 : vector<16x32xf32>
    %191 = vector.broadcast %170 : vector<1x32xf32> to vector<16x32xf32>
    %192 = arith.addf %190, %191 : vector<16x32xf32>
    %193 = vector.shape_cast %192 : vector<16x32xf32> to vector<1x16x32xf32>
    %194 = vector.broadcast %193 : vector<1x16x32xf32> to vector<8x16x32xf32>
    %c1_105 = arith.constant 1 : index
    %c0_106 = arith.constant 0 : index
    %c0_107 = arith.constant 0 : index
    %c0_108 = arith.constant 0 : index
    %195 = vector.load %arg11[%c1_105, %c0_106, %c0_107, %c0_108] : memref<2x8x32x8xf32, #tpu.memory_space<vmem>>, vector<1x8x32x8xf32>
    %196 = vector.shape_cast %195 : vector<1x8x32x8xf32> to vector<8x32x8xf32>
    "tpu.trace_start"() <{level = 10 : i32, message = "hnd,hde->hne"}> : () -> ()
    %cst_109 = arith.constant dense<0.000000e+00> : vector<8x16x8xf32>
    %197 = tpu.matmul %194, %196, %cst_109 {dimension_numbers = #tpu.dot_dimension_numbers<[2], [1], [1], [2], [0, 0, 0, 1, 1, 2], [0], [0]>} : vector<8x16x32xf32>, vector<8x32x8xf32>, vector<8x16x8xf32> -> vector<8x16x8xf32>
    "tpu.trace_stop"() : () -> ()
    %c1_110 = arith.constant 1 : index
    %c0_111 = arith.constant 0 : index
    %c0_112 = arith.constant 0 : index
    %c0_113 = arith.constant 0 : index
    %198 = vector.load %arg12[%c1_110, %c0_111, %c0_112, %c0_113] : memref<2x8x32x8xf32, #tpu.memory_space<vmem>>, vector<1x8x32x8xf32>
    %199 = vector.shape_cast %198 : vector<1x8x32x8xf32> to vector<8x32x8xf32>
    "tpu.trace_start"() <{level = 10 : i32, message = "hnd,hde->hne"}> : () -> ()
    %cst_114 = arith.constant dense<0.000000e+00> : vector<8x16x8xf32>
    %200 = tpu.matmul %194, %199, %cst_114 {dimension_numbers = #tpu.dot_dimension_numbers<[2], [1], [1], [2], [0, 0, 0, 1, 1, 2], [0], [0]>} : vector<8x16x32xf32>, vector<8x32x8xf32>, vector<8x16x8xf32> -> vector<8x16x8xf32>
    "tpu.trace_stop"() : () -> ()
    %c1_115 = arith.constant 1 : index
    %c0_116 = arith.constant 0 : index
    %c0_117 = arith.constant 0 : index
    %c0_118 = arith.constant 0 : index
    %201 = vector.load %arg13[%c1_115, %c0_116, %c0_117, %c0_118] : memref<2x8x32x8xf32, #tpu.memory_space<vmem>>, vector<1x8x32x8xf32>
    %202 = vector.shape_cast %201 : vector<1x8x32x8xf32> to vector<8x32x8xf32>
    "tpu.trace_start"() <{level = 10 : i32, message = "hnd,hde->hne"}> : () -> ()
    %cst_119 = arith.constant dense<0.000000e+00> : vector<8x16x8xf32>
    %203 = tpu.matmul %194, %202, %cst_119 {dimension_numbers = #tpu.dot_dimension_numbers<[2], [1], [1], [2], [0, 0, 0, 1, 1, 2], [0], [0]>} : vector<8x16x32xf32>, vector<8x32x8xf32>, vector<8x16x8xf32> -> vector<8x16x8xf32>
    "tpu.trace_stop"() : () -> ()
    "tpu.trace_start"() <{level = 10 : i32, message = "hne,hme->hnm"}> : () -> ()
    %cst_120 = arith.constant dense<0.000000e+00> : vector<8x16x16xf32>
    %204 = tpu.matmul %197, %200, %cst_120 {dimension_numbers = #tpu.dot_dimension_numbers<[2], [2], [1], [1], [0, 0, 0, 1, 1, 1], [0], [0]>} : vector<8x16x8xf32>, vector<8x16x8xf32>, vector<8x16x16xf32> -> vector<8x16x16xf32>
    "tpu.trace_stop"() : () -> ()
    %cst_121 = arith.constant 0.353553385 : f32
    %205 = vector.broadcast %cst_121 : f32 to vector<8x16x16xf32>
    %206 = arith.mulf %204, %205 : vector<8x16x16xf32>
    %cst_122 = arith.constant dense<0xFF800000> : vector<8x16xf32>
    %207 = vector.multi_reduction <maximumf>, %206, %cst_122 [2] : vector<8x16x16xf32> to vector<8x16xf32>
    %208 = vector.shape_cast %207 : vector<8x16xf32> to vector<8x16x1xf32>
    %209 = vector.broadcast %208 : vector<8x16x1xf32> to vector<8x16x16xf32>
    %210 = arith.subf %206, %209 : vector<8x16x16xf32>
    %211 = math.exp %210 : vector<8x16x16xf32>
    %cst_123 = arith.constant dense<0.000000e+00> : vector<8x16xf32>
    %212 = vector.multi_reduction <add>, %211, %cst_123 [2] : vector<8x16x16xf32> to vector<8x16xf32>
    %213 = vector.shape_cast %212 : vector<8x16xf32> to vector<8x16x1xf32>
    %214 = tpu.reciprocal %213 {approx = true} : vector<8x16x1xf32> -> vector<8x16x1xf32>
    %215 = vector.broadcast %214 : vector<8x16x1xf32> to vector<8x16x16xf32>
    %216 = arith.mulf %211, %215 : vector<8x16x16xf32>
    "tpu.trace_start"() <{level = 10 : i32, message = "hnm,hme->hne"}> : () -> ()
    %cst_124 = arith.constant dense<0.000000e+00> : vector<8x16x8xf32>
    %217 = tpu.matmul %216, %203, %cst_124 {dimension_numbers = #tpu.dot_dimension_numbers<[2], [1], [1], [2], [0, 0, 0, 1, 1, 2], [0], [0]>} : vector<8x16x16xf32>, vector<8x16x8xf32>, vector<8x16x8xf32> -> vector<8x16x8xf32>
    "tpu.trace_stop"() : () -> ()
    %c1_125 = arith.constant 1 : index
    %c0_126 = arith.constant 0 : index
    %c0_127 = arith.constant 0 : index
    %c0_128 = arith.constant 0 : index
    %218 = vector.load %arg14[%c1_125, %c0_126, %c0_127, %c0_128] : memref<2x8x8x32xf32, #tpu.memory_space<vmem>>, vector<1x8x8x32xf32>
    %219 = vector.shape_cast %218 : vector<1x8x8x32xf32> to vector<8x8x32xf32>
    "tpu.trace_start"() <{level = 10 : i32, message = "hne,hef->hnf"}> : () -> ()
    %cst_129 = arith.constant dense<0.000000e+00> : vector<8x16x32xf32>
    %220 = tpu.matmul %217, %219, %cst_129 {dimension_numbers = #tpu.dot_dimension_numbers<[2], [1], [1], [2], [0, 0, 0, 1, 1, 2], [0], [0]>} : vector<8x16x8xf32>, vector<8x8x32xf32>, vector<8x16x32xf32> -> vector<8x16x32xf32>
    "tpu.trace_stop"() : () -> ()
    %cst_130 = arith.constant dense<0.000000e+00> : vector<16x32xf32>
    %221 = vector.multi_reduction <add>, %220, %cst_130 [0] : vector<8x16x32xf32> to vector<16x32xf32>
    %c1_131 = arith.constant 1 : index
    %c0_132 = arith.constant 0 : index
    %c0_133 = arith.constant 0 : index
    %222 = vector.load %arg15[%c1_131, %c0_132, %c0_133] : memref<2x1x32xf32, #tpu.memory_space<vmem>>, vector<1x1x32xf32>
    %223 = vector.shape_cast %222 : vector<1x1x32xf32> to vector<1x32xf32>
    %224 = vector.broadcast %223 : vector<1x32xf32> to vector<16x32xf32>
    %225 = arith.addf %221, %224 : vector<16x32xf32>
    %226 = arith.addf %225, %166 : vector<16x32xf32>
    %c1_134 = arith.constant 1 : index
    %c0_135 = arith.constant 0 : index
    %c0_136 = arith.constant 0 : index
    %227 = vector.load %arg16[%c1_134, %c0_135, %c0_136] : memref<2x1x32xf32, #tpu.memory_space<vmem>>, vector<1x1x32xf32>
    %228 = vector.shape_cast %227 : vector<1x1x32xf32> to vector<1x32xf32>
    %c1_137 = arith.constant 1 : index
    %c0_138 = arith.constant 0 : index
    %c0_139 = arith.constant 0 : index
    %229 = vector.load %arg17[%c1_137, %c0_138, %c0_139] : memref<2x1x32xf32, #tpu.memory_space<vmem>>, vector<1x1x32xf32>
    %230 = vector.shape_cast %229 : vector<1x1x32xf32> to vector<1x32xf32>
    %cst_140 = arith.constant dense<0.000000e+00> : vector<16xf32>
    %231 = vector.multi_reduction <add>, %226, %cst_140 [1] : vector<16x32xf32> to vector<16xf32>
    %232 = vector.shape_cast %231 : vector<16xf32> to vector<16x1xf32>
    %cst_141 = arith.constant 3.200000e+01 : f32
    %233 = vector.broadcast %cst_141 : f32 to vector<16x1xf32>
    %234 = arith.divf %232, %233 : vector<16x1xf32>
    %235 = vector.broadcast %234 : vector<16x1xf32> to vector<16x32xf32>
    %236 = arith.subf %226, %235 : vector<16x32xf32>
    %237 = arith.mulf %236, %236 : vector<16x32xf32>
    %cst_142 = arith.constant dense<0.000000e+00> : vector<16xf32>
    %238 = vector.multi_reduction <add>, %237, %cst_142 [1] : vector<16x32xf32> to vector<16xf32>
    %239 = vector.shape_cast %238 : vector<16xf32> to vector<16x1xf32>
    %cst_143 = arith.constant 3.200000e+01 : f32
    %240 = vector.broadcast %cst_143 : f32 to vector<16x1xf32>
    %241 = arith.divf %239, %240 : vector<16x1xf32>
    %242 = vector.broadcast %234 : vector<16x1xf32> to vector<16x32xf32>
    %243 = arith.subf %226, %242 : vector<16x32xf32>
    %cst_144 = arith.constant 9.99999974E-6 : f32
    %244 = vector.broadcast %cst_144 : f32 to vector<16x1xf32>
    %245 = arith.addf %241, %244 : vector<16x1xf32>
    %246 = math.rsqrt %245 : vector<16x1xf32>
    %247 = vector.broadcast %246 : vector<16x1xf32> to vector<16x32xf32>
    %248 = arith.mulf %243, %247 : vector<16x32xf32>
    %249 = vector.broadcast %228 : vector<1x32xf32> to vector<16x32xf32>
    %250 = arith.mulf %248, %249 : vector<16x32xf32>
    %251 = vector.broadcast %230 : vector<1x32xf32> to vector<16x32xf32>
    %252 = arith.addf %250, %251 : vector<16x32xf32>
    %c1_145 = arith.constant 1 : index
    %c0_146 = arith.constant 0 : index
    %c0_147 = arith.constant 0 : index
    %253 = vector.load %arg18[%c1_145, %c0_146, %c0_147] : memref<2x32x64xf32, #tpu.memory_space<vmem>>, vector<1x32x64xf32>
    %254 = vector.shape_cast %253 : vector<1x32x64xf32> to vector<32x64xf32>
    %cst_148 = arith.constant dense<0.000000e+00> : vector<16x64xf32>
    %255 = tpu.matmul %252, %254, %cst_148 {dimension_numbers = #tpu.dot_dimension_numbers<[1], [0], [0], [1], [0, 0, 1, 1], [], []>} : vector<16x32xf32>, vector<32x64xf32>, vector<16x64xf32> -> vector<16x64xf32>
    %c1_149 = arith.constant 1 : index
    %c0_150 = arith.constant 0 : index
    %c0_151 = arith.constant 0 : index
    %256 = vector.load %arg19[%c1_149, %c0_150, %c0_151] : memref<2x1x64xf32, #tpu.memory_space<vmem>>, vector<1x1x64xf32>
    %257 = vector.shape_cast %256 : vector<1x1x64xf32> to vector<1x64xf32>
    %258 = vector.broadcast %257 : vector<1x64xf32> to vector<16x64xf32>
    %259 = arith.addf %255, %258 : vector<16x64xf32>
    %cst_152 = arith.constant 5.000000e-01 : f32
    %260 = vector.broadcast %cst_152 : f32 to vector<16x64xf32>
    %261 = arith.mulf %260, %259 : vector<16x64xf32>
    %cst_153 = arith.constant 0.707106769 : f32
    %262 = vector.broadcast %cst_153 : f32 to vector<16x64xf32>
    %263 = arith.mulf %259, %262 : vector<16x64xf32>
    %264 = math.erf %263 : vector<16x64xf32>
    %cst_154 = arith.constant 1.000000e+00 : f32
    %265 = vector.broadcast %cst_154 : f32 to vector<16x64xf32>
    %266 = arith.addf %265, %264 : vector<16x64xf32>
    %267 = arith.mulf %261, %266 : vector<16x64xf32>
    %c1_155 = arith.constant 1 : index
    %c0_156 = arith.constant 0 : index
    %c0_157 = arith.constant 0 : index
    %268 = vector.load %arg20[%c1_155, %c0_156, %c0_157] : memref<2x64x32xf32, #tpu.memory_space<vmem>>, vector<1x64x32xf32>
    %269 = vector.shape_cast %268 : vector<1x64x32xf32> to vector<64x32xf32>
    %cst_158 = arith.constant dense<0.000000e+00> : vector<16x32xf32>
    %270 = tpu.matmul %267, %269, %cst_158 {dimension_numbers = #tpu.dot_dimension_numbers<[1], [0], [0], [1], [0, 0, 1, 1], [], []>} : vector<16x64xf32>, vector<64x32xf32>, vector<16x32xf32> -> vector<16x32xf32>
    %c1_159 = arith.constant 1 : index
    %c0_160 = arith.constant 0 : index
    %c0_161 = arith.constant 0 : index
    %271 = vector.load %arg21[%c1_159, %c0_160, %c0_161] : memref<2x1x32xf32, #tpu.memory_space<vmem>>, vector<1x1x32xf32>
    %272 = vector.shape_cast %271 : vector<1x1x32xf32> to vector<1x32xf32>
    %273 = vector.broadcast %272 : vector<1x32xf32> to vector<16x32xf32>
    %274 = arith.addf %270, %273 : vector<16x32xf32>
    %275 = arith.addf %274, %226 : vector<16x32xf32>
    %c0_162 = arith.constant 0 : index
    %c0_163 = arith.constant 0 : index
    %276 = vector.load %arg22[%c0_162, %c0_163] : memref<1x32xf32, #tpu.memory_space<vmem>>, vector<1x32xf32>
    %c0_164 = arith.constant 0 : index
    %c0_165 = arith.constant 0 : index
    %277 = vector.load %arg23[%c0_164, %c0_165] : memref<1x32xf32, #tpu.memory_space<vmem>>, vector<1x32xf32>
    %cst_166 = arith.constant dense<0.000000e+00> : vector<16xf32>
    %278 = vector.multi_reduction <add>, %275, %cst_166 [1] : vector<16x32xf32> to vector<16xf32>
    %279 = vector.shape_cast %278 : vector<16xf32> to vector<16x1xf32>
    %cst_167 = arith.constant 3.200000e+01 : f32
    %280 = vector.broadcast %cst_167 : f32 to vector<16x1xf32>
    %281 = arith.divf %279, %280 : vector<16x1xf32>
    %282 = vector.broadcast %281 : vector<16x1xf32> to vector<16x32xf32>
    %283 = arith.subf %275, %282 : vector<16x32xf32>
    %284 = arith.mulf %283, %283 : vector<16x32xf32>
    %cst_168 = arith.constant dense<0.000000e+00> : vector<16xf32>
    %285 = vector.multi_reduction <add>, %284, %cst_168 [1] : vector<16x32xf32> to vector<16xf32>
    %286 = vector.shape_cast %285 : vector<16xf32> to vector<16x1xf32>
    %cst_169 = arith.constant 3.200000e+01 : f32
    %287 = vector.broadcast %cst_169 : f32 to vector<16x1xf32>
    %288 = arith.divf %286, %287 : vector<16x1xf32>
    %289 = vector.broadcast %281 : vector<16x1xf32> to vector<16x32xf32>
    %290 = arith.subf %275, %289 : vector<16x32xf32>
    %cst_170 = arith.constant 9.99999974E-6 : f32
    %291 = vector.broadcast %cst_170 : f32 to vector<16x1xf32>
    %292 = arith.addf %288, %291 : vector<16x1xf32>
    %293 = math.rsqrt %292 : vector<16x1xf32>
    %294 = vector.broadcast %293 : vector<16x1xf32> to vector<16x32xf32>
    %295 = arith.mulf %290, %294 : vector<16x32xf32>
    %296 = vector.broadcast %276 : vector<1x32xf32> to vector<16x32xf32>
    %297 = arith.mulf %295, %296 : vector<16x32xf32>
    %298 = vector.broadcast %277 : vector<1x32xf32> to vector<16x32xf32>
    %299 = arith.addf %297, %298 : vector<16x32xf32>
    %c0_171 = arith.constant 0 : index
    %c0_172 = arith.constant 0 : index
    %c0_173 = arith.constant 0 : index
    %300 = vector.load %arg24[%c0_171, %c0_172, %c0_173] : memref<1x16x32xf32, #tpu.memory_space<vmem>>, vector<1x16x32xf32>
    %301 = vector.shape_cast %300 : vector<1x16x32xf32> to vector<16x32xf32>
    %302 = vector.shape_cast %299 : vector<16x32xf32> to vector<1x16x32xf32>
    tpu.vector_store %arg24[%c0_171, %c0_172, %c0_173], %302 {strides = array<i32>} : memref<1x16x32xf32, #tpu.memory_space<vmem>>, vector<1x16x32xf32>,
    return
  }
  func.func @transform_0(%arg0: i32) -> (i32, i32, i32) {
    %c0_i32 = arith.constant 0 : i32
    %c0_i32_0 = arith.constant 0 : i32
    %c0_i32_1 = arith.constant 0 : i32
    return %arg0, %c0_i32, %c0_i32_0 : i32, i32, i32
  }
  func.func @transform_1(%arg0: i32) -> (i32, i32, i32) {
    %c0_i32 = arith.constant 0 : i32
    %c0_i32_0 = arith.constant 0 : i32
    %c0_i32_1 = arith.constant 0 : i32
    %c0_i32_2 = arith.constant 0 : i32
    return %c0_i32, %c0_i32_0, %c0_i32_1 : i32, i32, i32
  }
  func.func @transform_2(%arg0: i32) -> (i32, i32) {
    %c0_i32 = arith.constant 0 : i32
    %c0_i32_0 = arith.constant 0 : i32
    %c0_i32_1 = arith.constant 0 : i32
    return %c0_i32, %c0_i32_0 : i32, i32
  }
  func.func @transform_3(%arg0: i32) -> (i32, i32) {
    %c0_i32 = arith.constant 0 : i32
    %c0_i32_0 = arith.constant 0 : i32
    %c0_i32_1 = arith.constant 0 : i32
    return %c0_i32, %c0_i32_0 : i32, i32
  }
  func.func @transform_4(%arg0: i32) -> (i32, i32) {
    %c0_i32 = arith.constant 0 : i32
    %c0_i32_0 = arith.constant 0 : i32
    %c0_i32_1 = arith.constant 0 : i32
    return %c0_i32, %c0_i32_0 : i32, i32
  }
  func.func @transform_5(%arg0: i32) -> (i32, i32) {
    %c0_i32 = arith.constant 0 : i32
    %c0_i32_0 = arith.constant 0 : i32
    %c0_i32_1 = arith.constant 0 : i32
    return %c0_i32, %c0_i32_0 : i32, i32
  }
  func.func @transform_6(%arg0: i32) -> (i32, i32) {
    %c0_i32 = arith.constant 0 : i32
    %c0_i32_0 = arith.constant 0 : i32
    %c0_i32_1 = arith.constant 0 : i32
    return %c0_i32, %c0_i32_0 : i32, i32
  }
  func.func @transform_7(%arg0: i32) -> (i32, i32) {
    %c0_i32 = arith.constant 0 : i32
    %c0_i32_0 = arith.constant 0 : i32
    %c0_i32_1 = arith.constant 0 : i32
    return %c0_i32, %c0_i32_0 : i32, i32
  }
  func.func @transform_8(%arg0: i32) -> (i32, i32, i32) {
    %c0_i32 = arith.constant 0 : i32
    %c0_i32_0 = arith.constant 0 : i32
    %c0_i32_1 = arith.constant 0 : i32
    %c0_i32_2 = arith.constant 0 : i32
    return %c0_i32, %c0_i32_0, %c0_i32_1 : i32, i32, i32
  }
  func.func @transform_9(%arg0: i32) -> (i32, i32, i32) {
    %c0_i32 = arith.constant 0 : i32
    %c0_i32_0 = arith.constant 0 : i32
    %c0_i32_1 = arith.constant 0 : i32
    %c0_i32_2 = arith.constant 0 : i32
    return %c0_i32, %c0_i32_0, %c0_i32_1 : i32, i32, i32
  }
  func.func @transform_10(%arg0: i32) -> (i32, i32, i32, i32) {
    %c0_i32 = arith.constant 0 : i32
    %c0_i32_0 = arith.constant 0 : i32
    %c0_i32_1 = arith.constant 0 : i32
    %c0_i32_2 = arith.constant 0 : i32
    %c0_i32_3 = arith.constant 0 : i32
    return %c0_i32, %c0_i32_0, %c0_i32_1, %c0_i32_2 : i32, i32, i32, i32
  }
  func.func @transform_11(%arg0: i32) -> (i32, i32, i32, i32) {
    %c0_i32 = arith.constant 0 : i32
    %c0_i32_0 = arith.constant 0 : i32
    %c0_i32_1 = arith.constant 0 : i32
    %c0_i32_2 = arith.constant 0 : i32
    %c0_i32_3 = arith.constant 0 : i32
    return %c0_i32, %c0_i32_0, %c0_i32_1, %c0_i32_2 : i32, i32, i32, i32
  }
  func.func @transform_12(%arg0: i32) -> (i32, i32, i32, i32) {
    %c0_i32 = arith.constant 0 : i32
    %c0_i32_0 = arith.constant 0 : i32
    %c0_i32_1 = arith.constant 0 : i32
    %c0_i32_2 = arith.constant 0 : i32
    %c0_i32_3 = arith.constant 0 : i32
    return %c0_i32, %c0_i32_0, %c0_i32_1, %c0_i32_2 : i32, i32, i32, i32
  }
  func.func @transform_13(%arg0: i32) -> (i32, i32, i32, i32) {
    %c0_i32 = arith.constant 0 : i32
    %c0_i32_0 = arith.constant 0 : i32
    %c0_i32_1 = arith.constant 0 : i32
    %c0_i32_2 = arith.constant 0 : i32
    %c0_i32_3 = arith.constant 0 : i32
    return %c0_i32, %c0_i32_0, %c0_i32_1, %c0_i32_2 : i32, i32, i32, i32
  }
  func.func @transform_14(%arg0: i32) -> (i32, i32, i32) {
    %c0_i32 = arith.constant 0 : i32
    %c0_i32_0 = arith.constant 0 : i32
    %c0_i32_1 = arith.constant 0 : i32
    %c0_i32_2 = arith.constant 0 : i32
    return %c0_i32, %c0_i32_0, %c0_i32_1 : i32, i32, i32
  }
  func.func @transform_15(%arg0: i32) -> (i32, i32, i32) {
    %c0_i32 = arith.constant 0 : i32
    %c0_i32_0 = arith.constant 0 : i32
    %c0_i32_1 = arith.constant 0 : i32
    %c0_i32_2 = arith.constant 0 : i32
    return %c0_i32, %c0_i32_0, %c0_i32_1 : i32, i32, i32
  }
  func.func @transform_16(%arg0: i32) -> (i32, i32, i32) {
    %c0_i32 = arith.constant 0 : i32
    %c0_i32_0 = arith.constant 0 : i32
    %c0_i32_1 = arith.constant 0 : i32
    %c0_i32_2 = arith.constant 0 : i32
    return %c0_i32, %c0_i32_0, %c0_i32_1 : i32, i32, i32
  }
  func.func @transform_17(%arg0: i32) -> (i32, i32, i32) {
    %c0_i32 = arith.constant 0 : i32
    %c0_i32_0 = arith.constant 0 : i32
    %c0_i32_1 = arith.constant 0 : i32
    %c0_i32_2 = arith.constant 0 : i32
    return %c0_i32, %c0_i32_0, %c0_i32_1 : i32, i32, i32
  }
  func.func @transform_18(%arg0: i32) -> (i32, i32, i32) {
    %c0_i32 = arith.constant 0 : i32
    %c0_i32_0 = arith.constant 0 : i32
    %c0_i32_1 = arith.constant 0 : i32
    %c0_i32_2 = arith.constant 0 : i32
    return %c0_i32, %c0_i32_0, %c0_i32_1 : i32, i32, i32
  }
  func.func @transform_19(%arg0: i32) -> (i32, i32, i32) {
    %c0_i32 = arith.constant 0 : i32
    %c0_i32_0 = arith.constant 0 : i32
    %c0_i32_1 = arith.constant 0 : i32
    %c0_i32_2 = arith.constant 0 : i32
    return %c0_i32, %c0_i32_0, %c0_i32_1 : i32, i32, i32
  }
  func.func @transform_20(%arg0: i32) -> (i32, i32, i32) {
    %c0_i32 = arith.constant 0 : i32
    %c0_i32_0 = arith.constant 0 : i32
    %c0_i32_1 = arith.constant 0 : i32
    %c0_i32_2 = arith.constant 0 : i32
    return %c0_i32, %c0_i32_0, %c0_i32_1 : i32, i32, i32
  }
  func.func @transform_21(%arg0: i32) -> (i32, i32) {
    %c0_i32 = arith.constant 0 : i32
    %c0_i32_0 = arith.constant 0 : i32
    %c0_i32_1 = arith.constant 0 : i32
    return %c0_i32, %c0_i32_0 : i32, i32
  }
  func.func @transform_22(%arg0: i32) -> (i32, i32) {
    %c0_i32 = arith.constant 0 : i32
    %c0_i32_0 = arith.constant 0 : i32
    %c0_i32_1 = arith.constant 0 : i32
    return %c0_i32, %c0_i32_0 : i32, i32
  }
  func.func @transform_23(%arg0: i32) -> (i32, i32, i32) {
    %c0_i32 = arith.constant 0 : i32
    %c0_i32_0 = arith.constant 0 : i32
    %c0_i32_1 = arith.constant 0 : i32
    return %arg0, %c0_i32, %c0_i32_0 : i32, i32, i32
  }
}

</mosaic_0001>

<bundles_post_ra>
// kernel: tpu_custom_call.1
= control target key start
LH: loop header
LB: loop body
LE: loop exit
PB: predicated region body
PF: predicated region fallthrough
CT: control target
= control target key end

     0   :  { %s14442_s0 = inlined_call_operand.vmem [shape: f32[2,16,64], index: 0, kind: input, shape index: {}]   ;;  %s14443_s1 = inlined_call_operand.vmem [shape: f32[1,16,32], index: 1, kind: input, shape index: {}]   ;;  %s14444_s2 = inlined_call_operand.vmem [shape: f32[1,64], index: 2, kind: input, shape index: {}]   ;;  %s14445_s3 = inlined_call_operand.vmem [shape: f32[1,64], index: 3, kind: input, shape index: {}]   ;;  %s14446_s4 = inlined_call_operand.vmem [shape: f32[64,32], index: 4, kind: input, shape index: {}]   ;;  %s14447_s5 = inlined_call_operand.vmem [shape: f32[1,32], index: 5, kind: input, shape index: {}]   ;;  %s14448_s6 = inlined_call_operand.vmem [shape: f32[1,32], index: 6, kind: input, shape index: {}]   ;;  %s14449_s7 = inlined_call_operand.vmem [shape: f32[1,32], index: 7, kind: input, shape index: {}]   ;;  %s14450_s8 = inlined_call_operand.vmem [shape: f32[2,1,32], index: 8, kind: input, shape index: {}]   ;;  %s14451_s9 = inlined_call_operand.vmem [shape: f32[2,1,32], index: 9, kind: input, shape index: {}]   ;;  %s14452_s10 = inlined_call_operand.vmem [shape: f32[2,8,32,8], index: 10, kind: input, shape index: {}]   ;;  %s14453_s11 = inlined_call_operand.vmem [shape: f32[2,8,32,8], index: 11, kind: input, shape index: {}]   ;;  %s14454_s12 = inlined_call_operand.vmem [shape: f32[2,8,32,8], index: 12, kind: input, shape index: {}]   ;;  %s14455_s13 = inlined_call_operand.vmem [shape: f32[2,8,8,32], index: 13, kind: input, shape index: {}]   ;;  %s14456_s14 = inlined_call_operand.vmem [shape: f32[2,1,32], index: 14, kind: input, shape index: {}]   ;;  %s14457_s15 = inlined_call_operand.vmem [shape: f32[2,1,32], index: 15, kind: input, shape index: {}]   ;;  %s14458_s16 = inlined_call_operand.vmem [shape: f32[2,1,32], index: 16, kind: input, shape index: {}]   ;;  %s14459_s17 = inlined_call_operand.vmem [shape: f32[2,32,64], index: 17, kind: input, shape index: {}]   ;;  %s14460_s18 = inlined_call_operand.vmem [shape: f32[2,1,64], index: 18, kind: input, shape index: {}]   ;;  %s14461_s19 = inlined_call_operand.vmem [shape: f32[2,64,32], index: 19, kind: input, shape index: {}]   ;;  %s14462_s20 = inlined_call_operand.vmem [shape: f32[2,1,32], index: 20, kind: input, shape index: {}]   ;;  %s14463_s21 = inlined_call_operand.vmem [shape: f32[1,32], index: 21, kind: input, shape index: {}]   ;;  %s14464_s22 = inlined_call_operand.vmem [shape: f32[1,32], index: 22, kind: input, shape index: {}]   ;;  %s14465_s23 = inlined_call_operand.hbm [shape: f32[2,16,32], index: 23, kind: output, shape index: {}]  }
   0x1   :  { %14474 = sst [smem:[#allocation10_spill]] %s14442_s0 }
   0x2   :  { %14475 = sst [smem:[#allocation11_spill]] %s14443_s1 }
   0x3   :  { %14476 = sst [smem:[#allocation12_spill]] %s14444_s2 }
   0x4   :  { %14477 = sst [smem:[#allocation13_spill]] %s14445_s3 }
   0x5   :  { %14478 = sst [smem:[#allocation14_spill]] %s14446_s4 }
   0x6   :  { %14479 = sst [smem:[#allocation15_spill]] %s14447_s5 }
   0x7   :  { %14480 = sst [smem:[#allocation16_spill]] %s14448_s6 }
   0x8   :  { %14481 = sst [smem:[#allocation17_spill]] %s14449_s7 }
   0x9   :  { %14482 = sst [smem:[#allocation18_spill]] %s14450_s8 }
   0xa   :  { %14483 = sst [smem:[#allocation19_spill]] %s14451_s9 }
   0xb   :  { %28 = vsyncpa [#allocation3], 0 }
   0xc   :  { %30 = vsyncpa [#allocation3 + $0x1], 0  ;;  %s12695_s4 = smov 0   ;;  %s12697_s30 = smov 0  }
   0xd   :  { %s12699_s24 = smov 0   ;;  %s12701_s25 = smov 0  }
   0xe LB: > { %14484 = sst [smem:[#allocation5_spill]] %s12558_s4  ;;  %s12716_s5 = sadd.s32 4294967295, %s12570_s25   ;;  %s12570_s25 = sphi %s12701_s25, %s14505_s25   ;;  %s12566_s24 = sphi %s12699_s24, %s14507_s24   ;;  %s12562_s30 = sphi %s12697_s30, %s14509_s30   ;;  %s12558_s4 = sphi %s12695_s4, %s14508_s4  }
   0xf   : > { %14485 = sst [smem:[#allocation6_spill]] %s12566_s24  ;;  %s9886_s1 = sadd.s32 4294967294, %s12570_s25  }
  0x10   : > { %s12720_s26 = sadd.s32 1, %s12570_s25   ;;  %s531_s2 = sadd.s32 1, %s12566_s24 }
  0x11   : > { %14486 = sst [smem:[#allocation7_spill]] %s12720_s26  ;;  %s528_s6 = ssub.s32 %s12570_s25, %s12720_s26 }
  0x12   : > { %p541_p0 = scmp.ne.s32.totalorder %s12566_s24, %s12562_s30  ;;  %p529_p1 = scmp.eq.s32.totalorder %s528_s6, 0 }
  0x13   : > { %p542_p2 = scmp.eq.s32.totalorder %s12716_s5, 1  ;;  %p547_p3 = scmp.ne.s32.totalorder %s12562_s30, %s12558_s4 }
  0x14   : > { %p548_p4 = scmp.eq.s32.totalorder %s9886_s1, 1  ;;  %p9889_p7 = scmp.ge.s32.totalorder %s12570_s25, 1 }
  0x15   : > { %s12731_s27 = scalar_select %p529_p1, %s12566_s24, %s531_s2  }
  0x16   : > { %p12733_p5 = por %p542_p2, %p541_p0  ;;  %p12737_p6 = por %p548_p4, %p547_p3 }
  0x17   : > { %14487 = sst [smem:[#allocation8_spill]] %s12731_s27  ;;  %p640_p8 = scmp.lt.s32.totalorder %s12570_s25, 3 }
  0x18   : > { %s14489_s28 = scalar_select %p12737_p6, 1, 0 }
  0x19   : > { %p641_p9 = pnand %p9889_p7, %p640_p8 }
  0x1a   : > { %14490 = sst [smem:[#allocation9_spill]] %s14489_s28  ;;  %p704_p10 = scmp.lt.s32.totalorder (!%p641_p9), %s12716_s5, 1  ;;  %vm713_vm0 = vcmask (!%p641_p9), 523264   ;;  %vm855_vm1 = vcmask (!%p641_p9), 261120   ;;  %vm2849_vm2 = vcmask (!%p641_p9), 64512   ;;  %vm3562_vm4 = vcmask (!%p641_p9), 130048  }
  0x1b   : > { %644 = sbr.rel (%p641_p9) target bundleno = 5874 (0x16f2), region = 112  ;;  %s14491_s2 = sld [smem:[#allocation10_spill]] (!%p641_p9)  ;;  %vm13215_vm3 = vmpackc.low (!%p641_p9), %vm2849_vm2, %vm2849_vm2 }
  0x1c   : > { %s14492_s0 = sld [smem:[#allocation14_spill]] (!%p641_p9)  ;;  %s14493_s28 = sld [smem:[#allocation12_spill]] (!%p641_p9) }
  0x1d   : > { %s14496_s26 = sld [smem:[#allocation16_spill]] (!%p641_p9)  ;;  %s14498_s27 = sld [smem:[#allocation11_spill]] (!%p641_p9) }
  0x1e   : > { %s14499_s8 = sld [smem:[#allocation18_spill]] (!%p641_p9)  ;;  %s14500_s9 = sld [smem:[#allocation19_spill]] (!%p641_p9) }
  0x1f   : > { %s701_s4 = sand.u32 (!%p641_p9), 1, %s12562_s30   ;;  %s10277_s1 = sshll.u32 (!%p641_p9), %s12716_s5, 8 }
  0x22   : > { %s705_s29 = scalar_select %p704_p10, %s12716_s5, 1  ;;  %v757_v14 = vld [vmem:[%s14492_s0] sm:$0xff]  ;;  %v758_v15 = vld [vmem:[%s14492_s0 + $0x8] sm:$0xff]  ;;  %v759_v17 = vld [vmem:[%s14492_s0 + $0x10] sm:$0xff] }
  0x23   : > { %v11695_v16 = vpack.c.bf16 %v758_v15, %v757_v14  ;;  %v760_v18 = vld [vmem:[%s14492_s0 + $0x18] sm:$0xff]  ;;  %v761_v19 = vld [vmem:[%s14492_s0 + $0x20] sm:$0xff]  ;;  %v762_v21 = vld [vmem:[%s14492_s0 + $0x28] sm:$0xff]  ;;  %s14401_s5 = scalar_lea.sflag [#allocation3], %s701_s4 }
  0x24   : > { %s10276_s3 = sshll.u32 %s705_s29, 4  ;;  %v11699_v20 = vpack.c.bf16 %v760_v18, %v759_v17  ;;  %v11703_v22 = vpack.c.bf16 %v762_v21, %v761_v19  ;;  %v763_v23 = vld [vmem:[%s14492_s0 + $0x30] sm:$0xff]  ;;  %v764_v24 = vld [vmem:[%s14492_s0 + $0x38] sm:$0xff]  ;;  %v9893_v33 = vld [vmem:[%s14493_s28] ss:$0 sm:$0xff]  ;;  %s14497_s29 = sld [smem:[#allocation17_spill]] }
  0x25   : > { %s708_s6 = scalar_lea.vmem %s14491_s2, %s10276_s3  ;;  %11696 = vmatprep.subr.bf16.mxu0 %v11695_v16  ;;  %v11707_v25 = vpack.c.bf16 %v764_v24, %v763_v23  ;;  %s14494_s3 = sld [smem:[#allocation13_spill]] }
  0x26   : > { %v709_v0 = vld [vmem:[%s708_s6] sm:$0xff]  ;;  %v710_v1 = vld [vmem:[%s708_s6 + $0x8] sm:$0xff]  ;;  %11698 = vmatpush3.bf16.msra.mxu0 %v11695_v16  ;;  %s14495_s2 = sld [smem:[#allocation15_spill]] }
  0x27   : > { %v714_v2 = vsel %vm713_vm0, %v709_v0, 0.0  ;;  %v717_v3 = vsel %vm713_vm0, %v710_v1, 0.0  ;;  %11700 = vmatprep.subr.bf16.mxu0 %v11699_v20 }
  0x28   : > { %715 = vadd.xlane.f32.xlu0 %v714_v2  ;;  %v9898_v2 = vld [vmem:[%s14496_s26] ss:$0 sm:$0xff]  ;;  %s9890_s26 = sshll.u32 %s701_s4, 4 }
  0x2a   : > { %11702 = vmatpush3.bf16.msra.mxu0 %v11699_v20 }
  0x2b   : > { %11704 = vmatprep.subr.bf16.mxu0 %v11703_v22  ;;  %v9894_v35 = vld [vmem:[%s14494_s3] ss:$0 sm:$0xff] }
  0x2c   : > { %718 = vadd.xlane.f32.xlu0 %v717_v3  ;;  %v9895_v42 = vld [vmem:[%s14495_s2] ss:$0 sm:$0xff]  ;;  %s703_s2 = scalar_lea.vmem [#allocation2], %s9890_s26 }
  0x2d   : > { %s9824_s0 = sshll.u32 %s703_s2, 4  ;;  %s14397_s0 = int_to_ptr.vmem [resolvable:$true] %s9824_s0 }
  0x2e   : > { %11706 = vmatpush3.bf16.msra.mxu0 %v11703_v22  ;;  %s12508_s26 = scalar_lea.vmem %s14397_s0, 256 }
  0x2f   : > { %11708 = vmatprep.subr.bf16.mxu0 %v11707_v25  ;;  %p12509_p11 = scmp.ne.s32.totalorder %s14397_s0, %s12508_s26 }
  0x31   : > { %p12510_p12 = pnand %p12509_p11, %p12733_p5 }
  0x32   : > { %11710 = vmatpush3.bf16.msra.mxu0 %v11707_v25 }
  0x33   : > { %p12511_p13 = pneg %p12510_p12 }
  0xb5   : > { %v716_v4 = vpop.xlane.xlu0 %715 }
  0xb6   : > { %v721_v5 = vmul.f32 0.015625, %v716_v4 }
  0xb8   : > { %v723_v6 = vsub.f32 %v709_v0, %v721_v5  ;;  %v9899_v5 = vld [vmem:[%s14497_s29] ss:$0 sm:$0xff] }
  0xb9   : > { %v719_v7 = vpop.xlane.xlu0 %718 }
  0xba   : > { %v722_v8 = vmul.f32 0.015625, %v719_v7  ;;  %v725_v9 = vmul.f32 %v723_v6, %v723_v6 }
  0xbc   : > { %v724_v10 = vsub.f32 %v710_v1, %v722_v8  ;;  %v727_v11 = vsel %vm713_vm0, %v725_v9, 0.0  ;;  %v900_v8 = vld [vmem:[%s14498_s27 + $0x8] sm:$0xff] }
  0xbd   : > { %728 = vadd.xlane.f32.xlu1 %v727_v11  ;;  %v899_v11 = vld [vmem:[%s14498_s27] sm:$0xff] }
  0xbe   : > { %v726_v12 = vmul.f32 %v724_v10, %v724_v10 }
  0xc0   : > { %v730_v13 = vsel %vm713_vm0, %v726_v12, 0.0 }
  0xc1   : > { %731 = vadd.xlane.f32.xlu1 %v730_v13 }
 0x14a   : > { %v729_v26 = vpop.xlane.xlu1 %728 }
 0x14b   : > { %v733_v27 = vmul.f32 0.015625, %v729_v26 }
 0x14d   : > { %v735_v28 = vadd.f32 1e-05, %v733_v27  ;;  %v947_v27 = vld [vmem:[%s14452_s10] sm:$0xff] }
 0x14e   : > { %v732_v29 = vpop.xlane.xlu1 %731 }
 0x14f   : > { %12344 = vrsqrt.f32 %v735_v28  ;;  %v734_v30 = vmul.f32 0.015625, %v732_v29  ;;  %v948_v28 = vld [vmem:[%s14452_s10 + $0x8] sm:$0xff]  ;;  %v955_v29 = vld [vmem:[%s14452_s10 + $0x40] sm:$0xff] }
 0x151   : > { %v736_v31 = vadd.f32 1e-05, %v734_v30  ;;  %v11711_v30 = vpack.c.bf16 %v948_v28, %v947_v27  ;;  %v975_v28 = vld [vmem:[%s14452_s10 + $0xe0] sm:$0xff] }
 0x153   : > { %12346 = vrsqrt.f32 %v736_v31  ;;  %v956_v31 = vld [vmem:[%s14452_s10 + $0x48] sm:$0xff]  ;;  %11712 = vmatprep.subr.bf16.mxu1 %v11711_v30 }
 0x154   : > { %11714 = vmatpush3.bf16.msra.mxu1 %v11711_v30 }
 0x159   : > { %v12345_v32 = vpop.eup %12344 }
 0x15a   : > { %v739_v34 = vmul.f32 %v12345_v32, %v723_v6  ;;  %v11727_v32 = vpack.c.bf16 %v956_v31, %v955_v29  ;;  %v976_v29 = vld [vmem:[%s14452_s10 + $0xe8] sm:$0xff]  ;;  %v1593_v31 = vld [vmem:[%s14453_s11 + $0x40] sm:$0xff] }
 0x15c   : > { %v747_v36 = vmul.f32 %v9893_v33, %v739_v34  ;;  %11728 = vmatprep.subr.bf16.mxu0 %v11727_v32  ;;  %v950_v34 = vld [vmem:[%s14452_s10 + $0x18] sm:$0xff] }
 0x15d   : > { %v12347_v37 = vpop.eup %12346 }
 0x15e   : > { %v740_v38 = vmul.f32 %v12347_v37, %v724_v10  ;;  %v755_v39 = vadd.f32 %v9894_v35, %v747_v36  ;;  %v958_v37 = vld [vmem:[%s14452_s10 + $0x58] sm:$0xff] }
 0x160   : > { %v748_v40 = vmul.f32 %v9893_v33, %v740_v38  ;;  %10800 = vmatprep.mubr.msk.f32.mxu0 %vm713_vm0, %v755_v39  ;;  %v949_v33 = vld [vmem:[%s14452_s10 + $0x10] sm:$0xff]  ;;  %v951_v39 = vld [vmem:[%s14452_s10 + $0x20] sm:$0xff] }
 0x161   : > { %v11715_v36 = vpack.c.bf16 %v950_v34, %v949_v33  ;;  %v11767_v33 = vpack.c.bf16 %v976_v29, %v975_v28  ;;  %v2221_v28 = vld [vmem:[%s14454_s12 + $0x20] sm:$0xff]  ;;  %v2222_v29 = vld [vmem:[%s14454_s12 + $0x28] sm:$0xff] }
 0x162   : > { %v756_v41 = vadd.f32 %v9894_v35, %v748_v40  ;;  %v957_v35 = vld [vmem:[%s14452_s10 + $0x50] sm:$0xff]  ;;  %v952_v40 = vld [vmem:[%s14452_s10 + $0x28] sm:$0xff] }
 0x163   : > { %v11731_v38 = vpack.c.bf16 %v958_v37, %v957_v35  ;;  %11716 = vmatprep.subr.bf16.mxu1 %v11715_v36  ;;  %v977_v35 = vld [vmem:[%s14452_s10 + $0xf0] sm:$0xff] }
 0x164   : > { %10801 = vmatmul.mubr.msk.f32.vlgmr.msra.gmra.mrb[0].mxu0 %vm713_vm0, %v756_v41  ;;  %11718 = vmatpush3.bf16.msra.mxu1 %v11715_v36  ;;  %v963_v41 = vld [vmem:[%s14452_s10 + $0x80] sm:$0xff]  ;;  %v978_v36 = vld [vmem:[%s14452_s10 + $0xf8] sm:$0xff]  ;;  %v1595_v37 = vld [vmem:[%s14453_s11 + $0x50] sm:$0xff] }
 0x165   : > { %11730 = vmatpush3.bf16.msra.mxu0 %v11727_v32  ;;  %v1594_v32 = vld [vmem:[%s14453_s11 + $0x48] sm:$0xff] }
 0x166   : > { %11732 = vmatprep.subr.bf16.mxu0 %v11731_v38  ;;  %v11791_v34 = vpack.c.bf16 %v1594_v32, %v1593_v31  ;;  %v2233_v31 = vld [vmem:[%s14454_s12 + $0x80] sm:$0xff]  ;;  %v2234_v32 = vld [vmem:[%s14454_s12 + $0x88] sm:$0xff] }
 0x169   : > { %11734 = vmatpush3.bf16.msra.mxu0 %v11731_v38  ;;  %v1596_v38 = vld [vmem:[%s14453_s11 + $0x58] sm:$0xff] }
 0x237   : > { %v10802_v43 = vpop.f32.mrb[0].mxu0 }
 0x238   : > { %v850_v44 = vadd.f32 %v10802_v43, %v9895_v42  ;;  %v844_v45 = vpop.f32.mrb[1].mxu0  ;;  %v964_v43 = vld [vmem:[%s14452_s10 + $0x88] sm:$0xff] }
 0x239   : > { %v845_v46 = vadd.f32 %v9895_v42, %v844_v45  ;;  %v11719_v42 = vpack.c.bf16 %v952_v40, %v951_v39  ;;  %v11771_v39 = vpack.c.bf16 %v978_v36, %v977_v35  ;;  %v1589_v40 = vld [vmem:[%s14453_s11 + $0x20] sm:$0xff]  ;;  %v2223_v35 = vld [vmem:[%s14454_s12 + $0x30] sm:$0xff]  ;;  %v2224_v36 = vld [vmem:[%s14454_s12 + $0x38] sm:$0xff] }
 0x23a   : > { %v859_v47 = vsel %vm855_vm1, %v850_v44, 0.0 }
 0x23b   : > { %860 = vadd.xlane.f32.xlu1 %v859_v47  ;;  %v856_v48 = vsel %vm855_vm1, %v845_v46, 0.0  ;;  %11720 = vmatprep.subr.bf16.mxu1 %v11719_v42 }
 0x23c   : > { %857 = vadd.xlane.f32.xlu0 %v856_v48 }
 0x2c8   : > { %v861_v49 = vpop.xlane.xlu1 %860 }
 0x2c9   : > { %v864_v50 = vmul.f32 0.03125, %v861_v49  ;;  %v858_v51 = vpop.xlane.xlu0 %857 }
 0x2ca   : > { %v863_v52 = vmul.f32 0.03125, %v858_v51 }
 0x2cb   : > { %v866_v53 = vsub.f32 %v850_v44, %v864_v50  ;;  %v11743_v44 = vpack.c.bf16 %v964_v43, %v963_v41  ;;  %v1590_v41 = vld [vmem:[%s14453_s11 + $0x28] sm:$0xff]  ;;  %v1601_v43 = vld [vmem:[%s14453_s11 + $0x80] sm:$0xff] }
 0x2cc   : > { %v865_v54 = vsub.f32 %v845_v46, %v863_v52  ;;  %v9900_v52 = vld [vmem:[%s14499_s8] ss:$0 sm:$0xff] }
 0x2cd   : > { %v868_v55 = vmul.f32 %v866_v53, %v866_v53  ;;  %11744 = vmatprep.subr.bf16.mxu0 %v11743_v44 }
 0x2ce   : > { %v867_v56 = vmul.f32 %v865_v54, %v865_v54 }
 0x2cf   : > { %v872_v57 = vsel %vm855_vm1, %v868_v55, 0.0 }
 0x2d0   : > { %873 = vadd.xlane.f32.xlu1 %v872_v57  ;;  %v869_v58 = vsel %vm855_vm1, %v867_v56, 0.0  ;;  %v9901_v56 = vld [vmem:[%s14500_s9] ss:$0 sm:$0xff] }
 0x2d1   : > { %870 = vadd.xlane.f32.xlu0 %v869_v58 }
 0x35d   : > { %v874_v59 = vpop.xlane.xlu1 %873 }
 0x35e   : > { %v876_v60 = vmul.f32 0.03125, %v874_v59  ;;  %v871_v61 = vpop.xlane.xlu0 %870  ;;  %v953_v59 = vld [vmem:[%s14452_s10 + $0x30] sm:$0xff] }
 0x35f   : > { %v875_v62 = vmul.f32 0.03125, %v871_v61  ;;  %v965_v61 = vld [vmem:[%s14452_s10 + $0x90] sm:$0xff] }
 0x360   : > { %v878_v63 = vadd.f32 1e-05, %v876_v60  ;;  %v954_v60 = vld [vmem:[%s14452_s10 + $0x38] sm:$0xff] }
 0x361   : > { %v877_v0 = vadd.f32 1e-05, %v875_v62  ;;  %v966_v62 = vld [vmem:[%s14452_s10 + $0x98] sm:$0xff] }
 0x362   : > { %12348 = vrsqrt.f32 %v878_v63 }
 0x363   : > { %12350 = vrsqrt.f32 %v877_v0 }
 0x36c   : > { %v12349_v1 = vpop.eup %12348 }
 0x36d   : > { %v12351_v3 = vpop.eup %12350  ;;  %v882_v4 = vmul.f32 %v12349_v1, %v866_v53  ;;  %v959_v1 = vld [vmem:[%s14452_s10 + $0x60] sm:$0xff] }
 0x36e   : > { %v881_v6 = vmul.f32 %v12351_v3, %v865_v54  ;;  %v11747_v3 = vpack.c.bf16 %v966_v62, %v965_v61  ;;  %v1611_v61 = vld [vmem:[%s14453_s11 + $0xd0] sm:$0xff]  ;;  %v1612_v62 = vld [vmem:[%s14453_s11 + $0xd8] sm:$0xff] }
 0x36f   : > { %v890_v7 = vmul.f32 %v9898_v2, %v882_v4  ;;  %v960_v4 = vld [vmem:[%s14452_s10 + $0x68] sm:$0xff] }
 0x370   : > { %v889_v9 = vmul.f32 %v9898_v2, %v881_v6  ;;  %v11723_v2 = vpack.c.bf16 %v954_v60, %v953_v59  ;;  %v972_v6 = vld [vmem:[%s14452_s10 + $0xc8] sm:$0xff]  ;;  %v1599_v59 = vld [vmem:[%s14453_s11 + $0x70] sm:$0xff]  ;;  %v1600_v60 = vld [vmem:[%s14453_s11 + $0x78] sm:$0xff] }
 0x371   : > { %v898_v10 = vadd.f32 %v9899_v5, %v890_v7  ;;  %v11735_v7 = vpack.c.bf16 %v960_v4, %v959_v1  ;;  %v11803_v1 = vpack.c.bf16 %v1600_v60, %v1599_v59  ;;  %v11827_v4 = vpack.c.bf16 %v1612_v62, %v1611_v61  ;;  %v2245_v59 = vld [vmem:[%s14454_s12 + $0xe0] sm:$0xff]  ;;  %v2246_v60 = vld [vmem:[%s14454_s12 + $0xe8] sm:$0xff]  ;;  %v2247_v62 = vld [vmem:[%s14454_s12 + $0xf0] sm:$0xff] }
 0x372   : > { %v897_v12 = vadd.f32 %v9899_v5, %v889_v9  ;;  %v971_v5 = vld [vmem:[%s14452_s10 + $0xc0] sm:$0xff]  ;;  %v961_v9 = vld [vmem:[%s14452_s10 + $0x70] sm:$0xff]  ;;  %v11895_v61 = vpack.c.bf16 %v2246_v60, %v2245_v59 }
 0x373   : > { %v12803_v13 = vadd.f32 %v900_v8, %v898_v10  ;;  %v11759_v8 = vpack.c.bf16 %v972_v6, %v971_v5  ;;  %v962_v10 = vld [vmem:[%s14452_s10 + $0x78] sm:$0xff]  ;;  %v2217_v5 = vld [vmem:[%s14454_s12] sm:$0xff]  ;;  %v2218_v6 = vld [vmem:[%s14454_s12 + $0x8] sm:$0xff] }
 0x374   : > { %v12805_v14 = vadd.f32 %v899_v11, %v897_v12  ;;  %v973_v11 = vld [vmem:[%s14452_s10 + $0xd0] sm:$0xff]  ;;  %v974_v12 = vld [vmem:[%s14452_s10 + $0xd8] sm:$0xff] }
 0x375   : > { %v908_v15 = vsel %vm855_vm1, %v12803_v13, 0.0 }
 0x376   : > { %909 = vadd.xlane.f32.xlu1 %v908_v15  ;;  %v905_v16 = vsel %vm855_vm1, %v12805_v14, 0.0  ;;  %v11739_v15 = vpack.c.bf16 %v962_v10, %v961_v9  ;;  %v1607_v9 = vld [vmem:[%s14453_s11 + $0xb0] sm:$0xff]  ;;  %v1608_v10 = vld [vmem:[%s14453_s11 + $0xb8] sm:$0xff] }
 0x377   : > { %906 = vadd.xlane.f32.xlu0 %v905_v16  ;;  %v11763_v16 = vpack.c.bf16 %v974_v12, %v973_v11  ;;  %v2219_v11 = vld [vmem:[%s14454_s12 + $0x10] sm:$0xff]  ;;  %v2220_v12 = vld [vmem:[%s14454_s12 + $0x18] sm:$0xff] }
 0x403   : > { %v910_v17 = vpop.xlane.xlu1 %909 }
 0x404   : > { %v912_v18 = vmul.f32 0.03125, %v910_v17  ;;  %v907_v19 = vpop.xlane.xlu0 %906  ;;  %v967_v17 = vld [vmem:[%s14452_s10 + $0xa0] sm:$0xff] }
 0x405   : > { %v911_v20 = vmul.f32 0.03125, %v907_v19  ;;  %v1585_v19 = vld [vmem:[%s14453_s11] sm:$0xff] }
 0x406   : > { %v914_v21 = vsub.f32 %v12803_v13, %v912_v18  ;;  %v968_v18 = vld [vmem:[%s14452_s10 + $0xa8] sm:$0xff] }
 0x407   : > { %v913_v22 = vsub.f32 %v12805_v14, %v911_v20  ;;  %v1586_v20 = vld [vmem:[%s14453_s11 + $0x8] sm:$0xff] }
 0x408   : > { %v916_v23 = vmul.f32 %v914_v21, %v914_v21 }
 0x409   : > { %v915_v24 = vmul.f32 %v913_v22, %v913_v22 }
 0x40a   : > { %v920_v25 = vsel %vm855_vm1, %v916_v23, 0.0  ;;  %v969_v23 = vld [vmem:[%s14452_s10 + $0xb0] sm:$0xff] }
 0x40b   : > { %921 = vadd.xlane.f32.xlu1 %v920_v25  ;;  %v917_v26 = vsel %vm855_vm1, %v915_v24, 0.0  ;;  %v970_v24 = vld [vmem:[%s14452_s10 + $0xb8] sm:$0xff]  ;;  %v1587_v25 = vld [vmem:[%s14453_s11 + $0x10] sm:$0xff] }
 0x40c   : > { %918 = vadd.xlane.f32.xlu0 %v917_v26  ;;  %v1588_v26 = vld [vmem:[%s14453_s11 + $0x18] sm:$0xff]  ;;  %v11755_v27 = vpack.c.bf16 %v970_v24, %v969_v23  ;;  %v1615_v23 = vld [vmem:[%s14453_s11 + $0xf0] sm:$0xff] }
 0x40d   : > { %v11779_v30 = vpack.c.bf16 %v1588_v26, %v1587_v25  ;;  %v1616_v24 = vld [vmem:[%s14453_s11 + $0xf8] sm:$0xff]  ;;  %v2227_v25 = vld [vmem:[%s14454_s12 + $0x50] sm:$0xff] }
 0x40e   : > { %v2228_v26 = vld [vmem:[%s14454_s12 + $0x58] sm:$0xff] }
 0x498   : > { %v922_v45 = vpop.xlane.xlu1 %921 }
 0x499   : > { %v924_v46 = vmul.f32 0.03125, %v922_v45  ;;  %v919_v47 = vpop.xlane.xlu0 %918  ;;  %v11783_v45 = vpack.c.bf16 %v1590_v41, %v1589_v40  ;;  %v2229_v40 = vld [vmem:[%s14454_s12 + $0x60] sm:$0xff]  ;;  %v2230_v41 = vld [vmem:[%s14454_s12 + $0x68] sm:$0xff] }
 0x49a   : > { %v923_v48 = vmul.f32 0.03125, %v919_v47  ;;  %v1591_v47 = vld [vmem:[%s14453_s11 + $0x30] sm:$0xff] }
 0x49b   : > { %v926_v49 = vadd.f32 1e-05, %v924_v46 }
 0x49c   : > { %v925_v50 = vadd.f32 1e-05, %v923_v48  ;;  %v1592_v48 = vld [vmem:[%s14453_s11 + $0x38] sm:$0xff] }
 0x49d   : > { %12352 = vrsqrt.f32 %v926_v49  ;;  %v1603_v49 = vld [vmem:[%s14453_s11 + $0x90] sm:$0xff] }
 0x49e   : > { %12354 = vrsqrt.f32 %v925_v50  ;;  %v1604_v50 = vld [vmem:[%s14453_s11 + $0x98] sm:$0xff] }
 0x4a7   : > { %v12353_v51 = vpop.eup %12352 }
 0x4a8   : > { %v12355_v53 = vpop.eup %12354  ;;  %v930_v54 = vmul.f32 %v12353_v51, %v914_v21  ;;  %v11751_v21 = vpack.c.bf16 %v968_v18, %v967_v17  ;;  %v11787_v51 = vpack.c.bf16 %v1592_v48, %v1591_v47  ;;  %v1614_v17 = vld [vmem:[%s14453_s11 + $0xe8] sm:$0xff]  ;;  %v11843_v18 = vpack.c.bf16 %v2220_v12, %v2219_v11  ;;  %v2231_v47 = vld [vmem:[%s14454_s12 + $0x70] sm:$0xff]  ;;  %v2232_v48 = vld [vmem:[%s14454_s12 + $0x78] sm:$0xff] }
 0x4a9   : > { %v929_v55 = vmul.f32 %v12355_v53, %v913_v22  ;;  %v11775_v22 = vpack.c.bf16 %v1586_v20, %v1585_v19  ;;  %v1598_v53 = vld [vmem:[%s14453_s11 + $0x68] sm:$0xff]  ;;  %v2225_v19 = vld [vmem:[%s14454_s12 + $0x40] sm:$0xff] }
 0x4aa   : > { %v938_v57 = vmul.f32 %v9900_v52, %v930_v54  ;;  %v11811_v54 = vpack.c.bf16 %v1604_v50, %v1603_v49  ;;  %v2226_v20 = vld [vmem:[%s14454_s12 + $0x48] sm:$0xff]  ;;  %v2243_v49 = vld [vmem:[%s14454_s12 + $0xd0] sm:$0xff]  ;;  %v2244_v50 = vld [vmem:[%s14454_s12 + $0xd8] sm:$0xff] }
 0x4ab   : > { %v937_v58 = vmul.f32 %v9900_v52, %v929_v55  ;;  %v1597_v52 = vld [vmem:[%s14453_s11 + $0x60] sm:$0xff] }
 0x4ac   : > { %v12871_v0 = vadd.f32 %v9901_v56, %v938_v57  ;;  %v1609_v55 = vld [vmem:[%s14453_s11 + $0xc0] sm:$0xff]  ;;  %v11799_v57 = vpack.c.bf16 %v1598_v53, %v1597_v52  ;;  %v2238_v53 = vld [vmem:[%s14454_s12 + $0xa8] sm:$0xff] }
 0x4ad   : > { %v12869_v63 = vadd.f32 %v9901_v56, %v937_v58  ;;  %v1610_v56 = vld [vmem:[%s14453_s11 + $0xc8] sm:$0xff]  ;;  %v2237_v52 = vld [vmem:[%s14454_s12 + $0xa0] sm:$0xff] }
 0x4ae   : > { %v11823_v58 = vpack.c.bf16 %v1610_v56, %v1609_v55  ;;  %v11879_v55 = vpack.c.bf16 %v2238_v53, %v2237_v52  ;;  %v2239_v56 = vld [vmem:[%s14454_s12 + $0xb0] sm:$0xff] }
 0x4af   : > { %10811 = vmatprep.mubr.msk.f32.mxu1 %vm855_vm1, %v12869_v63  ;;  %10833 = vmatprep.mubr.msk.f32.mxu0 %vm855_vm1, %v12869_v63 }
 0x4b0   : > { %10812 = vmatmul.mubr.msk.f32.vlgmr.msra.gmra.mrb[0].mxu1 %vm855_vm1, %v12871_v0  ;;  %10834 = vmatmul.mubr.msk.f32.vlgmr.msra.gmra.mrb[2].mxu0 %vm855_vm1, %v12871_v0 }
 0x4b1   : > { %11722 = vmatpush3.bf16.msra.mxu1 %v11719_v42  ;;  %11746 = vmatpush3.bf16.msra.mxu0 %v11743_v44  ;;  %v11795_v42 = vpack.c.bf16 %v1596_v38, %v1595_v37  ;;  %v1602_v44 = vld [vmem:[%s14453_s11 + $0x88] sm:$0xff]  ;;  %v2235_v37 = vld [vmem:[%s14454_s12 + $0x90] sm:$0xff]  ;;  %v2236_v38 = vld [vmem:[%s14454_s12 + $0x98] sm:$0xff] }
 0x4b2   : > { %10822 = vmatprep.mubr.msk.f32.mxu1 %vm855_vm1, %v12869_v63  ;;  %10855 = vmatprep.mubr.msk.f32.mxu0 %vm855_vm1, %v12869_v63  ;;  %v11807_v46 = vpack.c.bf16 %v1602_v44, %v1601_v43  ;;  %v2241_v43 = vld [vmem:[%s14454_s12 + $0xc0] sm:$0xff]  ;;  %v2242_v44 = vld [vmem:[%s14454_s12 + $0xc8] sm:$0xff] }
 0x4b3   : > { %11724 = vmatprep.subr.bf16.mxu1 %v11723_v2  ;;  %11748 = vmatprep.subr.bf16.mxu0 %v11747_v3 }
 0x4b5   : > { %11726 = vmatpush3.bf16.msra.mxu1 %v11723_v2  ;;  %11750 = vmatpush3.bf16.msra.mxu0 %v11747_v3  ;;  %v1605_v2 = vld [vmem:[%s14453_s11 + $0xa0] sm:$0xff]  ;;  %v1606_v3 = vld [vmem:[%s14453_s11 + $0xa8] sm:$0xff] }
 0x4b6   : > { %11736 = vmatprep.subr.bf16.mxu1 %v11735_v7  ;;  %11760 = vmatprep.subr.bf16.mxu0 %v11759_v8 }
 0x4b8   : > { %10823 = vmatmul.mubr.msk.f32.vlgmr.msra.gmra.mrb[2].mxu1 %vm855_vm1, %v12871_v0  ;;  %10856 = vmatmul.mubr.msk.f32.vlgmr.msra.gmra.mrb[4].mxu0 %vm855_vm1, %v12871_v0 }
 0x4b9   : > { %11738 = vmatpush3.bf16.msra.mxu1 %v11735_v7  ;;  %10844 = vmatprep.mubr.msk.f32.mxu1 %vm855_vm1, %v12869_v63  ;;  %v11815_v7 = vpack.c.bf16 %v1606_v3, %v1605_v2 }
 0x4ba   : > { %11762 = vmatpush3.bf16.msra.mxu0 %v11759_v8  ;;  %10877 = vmatprep.mubr.msk.f32.mxu0 %vm855_vm1, %v12869_v63  ;;  %v11839_v8 = vpack.c.bf16 %v2218_v6, %v2217_v5 }
 0x4bb   : > { %11740 = vmatprep.subr.bf16.mxu1 %v11739_v15  ;;  %11764 = vmatprep.subr.bf16.mxu0 %v11763_v16 }
 0x4bd   : > { %11742 = vmatpush3.bf16.msra.mxu1 %v11739_v15  ;;  %v11819_v15 = vpack.c.bf16 %v1608_v10, %v1607_v9 }
 0x4be   : > { %11766 = vmatpush3.bf16.msra.mxu0 %v11763_v16  ;;  %11752 = vmatprep.subr.bf16.mxu1 %v11751_v21  ;;  %v1613_v16 = vld [vmem:[%s14453_s11 + $0xe0] sm:$0xff] }
 0x4bf   : > { %11776 = vmatprep.subr.bf16.mxu0 %v11775_v22 }
 0x4c0   : > { %10845 = vmatmul.mubr.msk.f32.vlgmr.msra.gmra.mrb[4].mxu1 %vm855_vm1, %v12871_v0 }
 0x4c1   : > { %10878 = vmatmul.mubr.msk.f32.vlgmr.msra.gmra.mrb[6].mxu0 %vm855_vm1, %v12871_v0  ;;  %11754 = vmatpush3.bf16.msra.mxu1 %v11751_v21  ;;  %v11831_v21 = vpack.c.bf16 %v1614_v17, %v1613_v16 }
 0x4c2   : > { %10866 = vmatprep.mubr.msk.f32.mxu1 %vm855_vm1, %v12869_v63  ;;  %11778 = vmatpush3.bf16.msra.mxu0 %v11775_v22  ;;  %v11855_v22 = vpack.c.bf16 %v2226_v20, %v2225_v19 }
 0x4c3   : > { %10899 = vmatprep.mubr.msk.f32.mxu0 %vm855_vm1, %v12869_v63  ;;  %11756 = vmatprep.subr.bf16.mxu1 %v11755_v27 }
 0x4c4   : > { %11780 = vmatprep.subr.bf16.mxu0 %v11779_v30 }
 0x4c5   : > { %11758 = vmatpush3.bf16.msra.mxu1 %v11755_v27  ;;  %v11835_v27 = vpack.c.bf16 %v1616_v24, %v1615_v23 }
 0x4c6   : > { %11782 = vmatpush3.bf16.msra.mxu0 %v11779_v30  ;;  %11768 = vmatprep.subr.bf16.mxu1 %v11767_v33  ;;  %v11859_v30 = vpack.c.bf16 %v2228_v26, %v2227_v25 }
 0x4c7   : > { %11792 = vmatprep.subr.bf16.mxu0 %v11791_v34 }
 0x4c8   : > { %10867 = vmatmul.mubr.msk.f32.vlgmr.msra.gmra.mrb[6].mxu1 %vm855_vm1, %v12871_v0 }
 0x4c9   : > { %10900 = vmatmul.mubr.msk.f32.vlgmr.msra.gmra.mrb[8].mxu0 %vm855_vm1, %v12871_v0  ;;  %11770 = vmatpush3.bf16.msra.mxu1 %v11767_v33  ;;  %v11847_v33 = vpack.c.bf16 %v2222_v29, %v2221_v28 }
 0x4ca   : > { %10888 = vmatprep.mubr.msk.f32.mxu1 %vm855_vm1, %v12869_v63  ;;  %11794 = vmatpush3.bf16.msra.mxu0 %v11791_v34  ;;  %v11871_v34 = vpack.c.bf16 %v2234_v32, %v2233_v31 }
 0x4cb   : > { %10921 = vmatprep.mubr.msk.f32.mxu0 %vm855_vm1, %v12869_v63  ;;  %11772 = vmatprep.subr.bf16.mxu1 %v11771_v39 }
 0x4cc   : > { %11796 = vmatprep.subr.bf16.mxu0 %v11795_v42 }
 0x4cd   : > { %11774 = vmatpush3.bf16.msra.mxu1 %v11771_v39  ;;  %v11851_v39 = vpack.c.bf16 %v2224_v36, %v2223_v35 }
 0x4ce   : > { %11798 = vmatpush3.bf16.msra.mxu0 %v11795_v42  ;;  %11784 = vmatprep.subr.bf16.mxu1 %v11783_v45  ;;  %v11875_v42 = vpack.c.bf16 %v2236_v38, %v2235_v37 }
 0x4cf   : > { %11808 = vmatprep.subr.bf16.mxu0 %v11807_v46 }
 0x4d0   : > { %10889 = vmatmul.mubr.msk.f32.vlgmr.msra.gmra.mrb[8].mxu1 %vm855_vm1, %v12871_v0 }
 0x4d1   : > { %10922 = vmatmul.mubr.msk.f32.vlgmr.msra.gmra.mrb[10].mxu0 %vm855_vm1, %v12871_v0  ;;  %11786 = vmatpush3.bf16.msra.mxu1 %v11783_v45  ;;  %v11863_v45 = vpack.c.bf16 %v2230_v41, %v2229_v40 }
 0x4d2   : > { %10910 = vmatprep.mubr.msk.f32.mxu1 %vm855_vm1, %v12869_v63  ;;  %11810 = vmatpush3.bf16.msra.mxu0 %v11807_v46  ;;  %v11887_v46 = vpack.c.bf16 %v2242_v44, %v2241_v43 }
 0x4d3   : > { %10943 = vmatprep.mubr.msk.f32.mxu0 %vm855_vm1, %v12869_v63  ;;  %11788 = vmatprep.subr.bf16.mxu1 %v11787_v51 }
 0x4d4   : > { %11812 = vmatprep.subr.bf16.mxu0 %v11811_v54 }
 0x4d5   : > { %11790 = vmatpush3.bf16.msra.mxu1 %v11787_v51  ;;  %v11867_v51 = vpack.c.bf16 %v2232_v48, %v2231_v47 }
 0x4d6   : > { %11814 = vmatpush3.bf16.msra.mxu0 %v11811_v54  ;;  %11800 = vmatprep.subr.bf16.mxu1 %v11799_v57  ;;  %v11891_v54 = vpack.c.bf16 %v2244_v50, %v2243_v49 }
 0x4d7   : > { %11824 = vmatprep.subr.bf16.mxu0 %v11823_v58 }
 0x4d8   : > { %10911 = vmatmul.mubr.msk.f32.vlgmr.msra.gmra.mrb[10].mxu1 %vm855_vm1, %v12871_v0 }
 0x4d9   : > { %10944 = vmatmul.mubr.msk.f32.vlgmr.msra.gmra.mrb[12].mxu0 %vm855_vm1, %v12871_v0  ;;  %11802 = vmatpush3.bf16.msra.mxu1 %v11799_v57  ;;  %v2240_v57 = vld [vmem:[%s14454_s12 + $0xb8] sm:$0xff] }
 0x4da   : > { %10932 = vmatprep.mubr.msk.f32.mxu1 %vm855_vm1, %v12869_v63  ;;  %11826 = vmatpush3.bf16.msra.mxu0 %v11823_v58  ;;  %v11883_v58 = vpack.c.bf16 %v2240_v57, %v2239_v56 }
 0x4db   : > { %10965 = vmatprep.mubr.msk.f32.mxu0 %vm855_vm1, %v12869_v63  ;;  %11804 = vmatprep.subr.bf16.mxu1 %v11803_v1 }
 0x4dc   : > { %11828 = vmatprep.subr.bf16.mxu0 %v11827_v4 }
 0x4dd   : > { %11806 = vmatpush3.bf16.msra.mxu1 %v11803_v1  ;;  %v2248_v1 = vld [vmem:[%s14454_s12 + $0xf8] sm:$0xff] }
 0x4de   : > { %11830 = vmatpush3.bf16.msra.mxu0 %v11827_v4  ;;  %11816 = vmatprep.subr.bf16.mxu1 %v11815_v7  ;;  %v11899_v2 = vpack.c.bf16 %v2248_v1, %v2247_v62 }
 0x4df   : > { %11840 = vmatprep.subr.bf16.mxu0 %v11839_v8 }
 0x4e0   : > { %10933 = vmatmul.mubr.msk.f32.vlgmr.msra.gmra.mrb[12].mxu1 %vm855_vm1, %v12871_v0 }
 0x4e1   : > { %10966 = vmatmul.mubr.msk.f32.vlgmr.msra.gmra.mrb[14].mxu0 %vm855_vm1, %v12871_v0  ;;  %11818 = vmatpush3.bf16.msra.mxu1 %v11815_v7 }
 0x4e2   : > { %10954 = vmatprep.mubr.msk.f32.mxu1 %vm855_vm1, %v12869_v63  ;;  %11842 = vmatpush3.bf16.msra.mxu0 %v11839_v8 }
 0x4e3   : > { %10987 = vmatprep.mubr.msk.f32.mxu0 %vm855_vm1, %v12869_v63  ;;  %11820 = vmatprep.subr.bf16.mxu1 %v11819_v15 }
 0x4e4   : > { %11844 = vmatprep.subr.bf16.mxu0 %v11843_v18 }
 0x4e5   : > { %11822 = vmatpush3.bf16.msra.mxu1 %v11819_v15 }
 0x4e6   : > { %11846 = vmatpush3.bf16.msra.mxu0 %v11843_v18  ;;  %11832 = vmatprep.subr.bf16.mxu1 %v11831_v21 }
 0x4e7   : > { %11856 = vmatprep.subr.bf16.mxu0 %v11855_v22 }
 0x4e8   : > { %10955 = vmatmul.mubr.msk.f32.vlgmr.msra.gmra.mrb[14].mxu1 %vm855_vm1, %v12871_v0 }
 0x4e9   : > { %10988 = vmatmul.mubr.msk.f32.vlgmr.msra.gmra.mrb[16].mxu0 %vm855_vm1, %v12871_v0  ;;  %11834 = vmatpush3.bf16.msra.mxu1 %v11831_v21 }
 0x4ea   : > { %10976 = vmatprep.mubr.msk.f32.mxu1 %vm855_vm1, %v12869_v63  ;;  %11858 = vmatpush3.bf16.msra.mxu0 %v11855_v22 }
 0x4eb   : > { %11009 = vmatprep.mubr.msk.f32.mxu0 %vm855_vm1, %v12869_v63  ;;  %11836 = vmatprep.subr.bf16.mxu1 %v11835_v27 }
 0x4ec   : > { %11860 = vmatprep.subr.bf16.mxu0 %v11859_v30 }
 0x4ed   : > { %11838 = vmatpush3.bf16.msra.mxu1 %v11835_v27 }
 0x4ee   : > { %11862 = vmatpush3.bf16.msra.mxu0 %v11859_v30  ;;  %11848 = vmatprep.subr.bf16.mxu1 %v11847_v33 }
 0x4ef   : > { %11872 = vmatprep.subr.bf16.mxu0 %v11871_v34 }
 0x4f0   : > { %10977 = vmatmul.mubr.msk.f32.vlgmr.msra.gmra.mrb[16].mxu1 %vm855_vm1, %v12871_v0 }
 0x4f1   : > { %11010 = vmatmul.mubr.msk.f32.vlgmr.msra.gmra.mrb[18].mxu0 %vm855_vm1, %v12871_v0  ;;  %11850 = vmatpush3.bf16.msra.mxu1 %v11847_v33 }
 0x4f2   : > { %10998 = vmatprep.mubr.msk.f32.mxu1 %vm855_vm1, %v12869_v63  ;;  %11874 = vmatpush3.bf16.msra.mxu0 %v11871_v34 }
 0x4f3   : > { %11031 = vmatprep.mubr.msk.f32.mxu0 %vm855_vm1, %v12869_v63  ;;  %11852 = vmatprep.subr.bf16.mxu1 %v11851_v39 }
 0x4f4   : > { %11876 = vmatprep.subr.bf16.mxu0 %v11875_v42 }
 0x4f5   : > { %11854 = vmatpush3.bf16.msra.mxu1 %v11851_v39 }
 0x4f6   : > { %11878 = vmatpush3.bf16.msra.mxu0 %v11875_v42  ;;  %11864 = vmatprep.subr.bf16.mxu1 %v11863_v45 }
 0x4f7   : > { %11888 = vmatprep.subr.bf16.mxu0 %v11887_v46 }
 0x4f8   : > { %10999 = vmatmul.mubr.msk.f32.vlgmr.msra.gmra.mrb[18].mxu1 %vm855_vm1, %v12871_v0 }
 0x4f9   : > { %11032 = vmatmul.mubr.msk.f32.vlgmr.msra.gmra.mrb[20].mxu0 %vm855_vm1, %v12871_v0  ;;  %11866 = vmatpush3.bf16.msra.mxu1 %v11863_v45 }
 0x4fa   : > { %11020 = vmatprep.mubr.msk.f32.mxu1 %vm855_vm1, %v12869_v63  ;;  %11890 = vmatpush3.bf16.msra.mxu0 %v11887_v46 }
 0x4fb   : > { %11053 = vmatprep.mubr.msk.f32.mxu0 %vm855_vm1, %v12869_v63  ;;  %11868 = vmatprep.subr.bf16.mxu1 %v11867_v51 }
 0x4fc   : > { %11892 = vmatprep.subr.bf16.mxu0 %v11891_v54 }
 0x4fd   : > { %11870 = vmatpush3.bf16.msra.mxu1 %v11867_v51 }
 0x4fe   : > { %11894 = vmatpush3.bf16.msra.mxu0 %v11891_v54  ;;  %11880 = vmatprep.subr.bf16.mxu1 %v11879_v55 }
 0x500   : > { %11021 = vmatmul.mubr.msk.f32.vlgmr.msra.gmra.mrb[20].mxu1 %vm855_vm1, %v12871_v0 }
 0x501   : > { %11054 = vmatmul.mubr.msk.f32.vlgmr.msra.gmra.mrb[22].mxu0 %vm855_vm1, %v12871_v0  ;;  %11882 = vmatpush3.bf16.msra.mxu1 %v11879_v55 }
 0x502   : > { %11042 = vmatprep.mubr.msk.f32.mxu1 %vm855_vm1, %v12869_v63  ;;  %11884 = vmatprep.subr.bf16.mxu1 %v11883_v58 }
 0x505   : > { %11886 = vmatpush3.bf16.msra.mxu1 %v11883_v58 }
 0x506   : > { %11896 = vmatprep.subr.bf16.mxu1 %v11895_v61 }
 0x508   : > { %11043 = vmatmul.mubr.msk.f32.vlgmr.msra.gmra.mrb[22].mxu1 %vm855_vm1, %v12871_v0 }
 0x509   : > { %11898 = vmatpush3.bf16.msra.mxu1 %v11895_v61  ;;  %11064 = vmatprep.mubr.msk.f32.mxu1 %vm855_vm1, %v12869_v63 }
 0x50a   : > { %11900 = vmatprep.subr.bf16.mxu1 %v11899_v2 }
 0x50d   : > { %11902 = vmatpush3.bf16.msra.mxu1 %v11899_v2 }
 0x510   : > { %11065 = vmatmul.mubr.msk.f32.vlgmr.msra.gmra.mrb[24].mxu1 %vm855_vm1, %v12871_v0 }
 0x583   : > { %v10813_v3 = vpop.f32.mrb[0].mxu1  ;;  %v10835_v4 = vpop.f32.mrb[2].mxu0 }
 0x584   : > { %v1051_v5 = vpop.f32.mrb[1].mxu1  ;;  %v1201_v6 = vpop.f32.mrb[3].mxu0 }
 0x585   : > { %11071 = vmatprep.mubr.msk.f32.mxu0 %vm2849_vm2, %v1051_v5 }
 0x58b   : > { %v10824_v7 = vpop.f32.mrb[2].mxu1  ;;  %v10857_v8 = vpop.f32.mrb[4].mxu0 }
 0x58c   : > { %v1126_v9 = vpop.f32.mrb[3].mxu1  ;;  %v1351_v10 = vpop.f32.mrb[5].mxu0 }
 0x58d   : > { %11078 = vmatprep.mubr.msk.f32.mxu1 %vm2849_vm2, %v1126_v9 }
 0x593   : > { %v10846_v11 = vpop.f32.mrb[4].mxu1 }
 0x594   : > { %v10879_v63 = vpop.f32.mrb[6].mxu0  ;;  %v1276_v12 = vpop.f32.mrb[5].mxu1 }
 0x595   : > { %v1501_v15 = vpop.f32.mrb[7].mxu0 }
 0x59b   : > { %v13211_v16 = vpop.f32.mrb[6].mxu1 }
 0x59c   : > { %v10901_v0 = vpop.f32.mrb[8].mxu0  ;;  %v1426_v17 = vpop.f32.mrb[7].mxu1 }
 0x59d   : > { %v1683_v18 = vpop.f32.mrb[9].mxu0 }
 0x59e   : > { %v11903_v20 = vpack.c.bf16 %v10901_v0, %v1683_v18 }
 0x5a0   : > { %11905 = vmatprep.subr.msk.bf16.mxu0 %vm13215_vm3, %v11903_v20 }
 0x5a1   : > { %11908 = vmatpush3.bf16.xpose.msk.msra.mxu0 %vm13215_vm3, %v11903_v20 }
 0x5a3   : > { %v13223_v21 = vpop.f32.mrb[8].mxu1 }
 0x5a4   : > { %v10923_v22 = vpop.f32.mrb[10].mxu0  ;;  %v1576_v23 = vpop.f32.mrb[9].mxu1 }
 0x5a5   : > { %v1833_v24 = vpop.f32.mrb[11].mxu0 }
 0x5a6   : > { %v11915_v25 = vpack.c.bf16 %v10923_v22, %v1833_v24 }
 0x5a8   : > { %11072 = vmatmul.mubr.msk.f32.vlgmr.msra.gmra.mrb[24].mxu0 %vm2849_vm2, %v10813_v3  ;;  %11917 = vmatprep.subr.msk.bf16.mxu0 %vm13215_vm3, %v11915_v25 }
 0x5a9   : > { %11920 = vmatpush3.bf16.xpose.msk.msra.mxu0 %vm13215_vm3, %v11915_v25  ;;  %11085 = vmatprep.mubr.msk.f32.mxu0 %vm2849_vm2, %v1201_v6 }
 0x5ab   : > { %v10912_v26 = vpop.f32.mrb[10].mxu1 }
 0x5ac   : > { %v10945_v27 = vpop.f32.mrb[12].mxu0  ;;  %v1758_v28 = vpop.f32.mrb[11].mxu1 }
 0x5ad   : > { %v11909_v29 = vpack.c.bf16 %v10912_v26, %v1758_v28  ;;  %v1983_v30 = vpop.f32.mrb[13].mxu0 }
 0x5ae   : > { %v11927_v31 = vpack.c.bf16 %v10945_v27, %v1983_v30 }
 0x5af   : > { %11911 = vmatprep.subr.msk.bf16.mxu1 %vm13215_vm3, %v11909_v29 }
 0x5b0   : > { %11086 = vmatmul.mubr.msk.f32.vlgmr.msra.gmra.mrb[26].mxu0 %vm2849_vm2, %v10835_v4  ;;  %11929 = vmatprep.subr.msk.bf16.mxu0 %vm13215_vm3, %v11927_v31 }
 0x5b1   : > { %11914 = vmatpush3.bf16.xpose.msk.msra.mxu1 %vm13215_vm3, %v11909_v29  ;;  %11932 = vmatpush3.bf16.xpose.msk.msra.mxu0 %vm13215_vm3, %v11927_v31 }
 0x5b2   : > { %11099 = vmatprep.mubr.msk.f32.mxu0 %vm2849_vm2, %v1351_v10 }
 0x5b3   : > { %v10934_v32 = vpop.f32.mrb[12].mxu1 }
 0x5b4   : > { %v10967_v33 = vpop.f32.mrb[14].mxu0  ;;  %v1908_v34 = vpop.f32.mrb[13].mxu1 }
 0x5b5   : > { %v11921_v35 = vpack.c.bf16 %v10934_v32, %v1908_v34  ;;  %v2133_v36 = vpop.f32.mrb[15].mxu0 }
 0x5b6   : > { %v11939_v37 = vpack.c.bf16 %v10967_v33, %v2133_v36 }
 0x5b7   : > { %11923 = vmatprep.subr.msk.bf16.mxu1 %vm13215_vm3, %v11921_v35 }
 0x5b8   : > { %11079 = vmatmul.mubr.msk.f32.vlgmr.msra.gmra.mrb[26].mxu1 %vm2849_vm2, %v10824_v7  ;;  %11100 = vmatmul.mubr.msk.f32.vlgmr.msra.gmra.mrb[28].mxu0 %vm2849_vm2, %v10857_v8 }
 0x5b9   : > { %11941 = vmatprep.subr.msk.bf16.mxu0 %vm13215_vm3, %v11939_v37  ;;  %11926 = vmatpush3.bf16.xpose.msk.msra.mxu1 %vm13215_vm3, %v11921_v35 }
 0x5ba   : > { %11092 = vmatprep.mubr.msk.f32.mxu1 %vm2849_vm2, %v1276_v12  ;;  %11944 = vmatpush3.bf16.xpose.msk.msra.mxu0 %vm13215_vm3, %v11939_v37 }
 0x5bb   : > { %11113 = vmatprep.mubr.msk.f32.mxu0 %vm2849_vm2, %v1501_v15  ;;  %v10956_v38 = vpop.f32.mrb[14].mxu1 }
 0x5bc   : > { %v10989_v39 = vpop.f32.mrb[16].mxu0  ;;  %v2058_v40 = vpop.f32.mrb[15].mxu1 }
 0x5bd   : > { %v11933_v41 = vpack.c.bf16 %v10956_v38, %v2058_v40  ;;  %v2315_v42 = vpop.f32.mrb[17].mxu0 }
 0x5be   : > { %v11951_v43 = vpack.c.bf16 %v10989_v39, %v2315_v42 }
 0x5bf   : > { %11935 = vmatprep.subr.msk.bf16.mxu1 %vm13215_vm3, %v11933_v41 }
 0x5c0   : > { %11093 = vmatmul.mubr.msk.f32.vlgmr.msra.gmra.mrb[28].mxu1 %vm2849_vm2, %v10846_v11  ;;  %11952 = vmatprep.subr.bf16.mxu0 %v11951_v43 }
 0x5c1   : > { %11114 = vmatmul.mubr.msk.f32.vlgmr.msra.gmra.mrb[30].mxu0 %vm2849_vm2, %v10879_v63  ;;  %11938 = vmatpush3.bf16.xpose.msk.msra.mxu1 %vm13215_vm3, %v11933_v41 }
 0x5c2   : > { %11106 = vmatprep.mubr.msk.f32.mxu1 %vm2849_vm2, %v1426_v17  ;;  %11954 = vmatpush3.bf16.msra.mxu0 %v11951_v43 }
 0x5c3   : > { %v10978_v44 = vpop.f32.mrb[16].mxu1 }
 0x5c4   : > { %v11011_v45 = vpop.f32.mrb[18].mxu0  ;;  %v2208_v46 = vpop.f32.mrb[17].mxu1 }
 0x5c5   : > { %v11945_v47 = vpack.c.bf16 %v10978_v44, %v2208_v46  ;;  %v2465_v48 = vpop.f32.mrb[19].mxu0 }
 0x5c6   : > { %v13260_v49 = vpack.c.bf16 %v11011_v45, %v2465_v48 }
 0x5c7   : > { %11947 = vmatprep.subr.msk.bf16.mxu1 %vm13215_vm3, %v11945_v47 }
 0x5c8   : > { %11107 = vmatmul.mubr.msk.f32.vlgmr.msra.gmra.mrb[30].mxu1 %vm2849_vm2, %v13211_v16 }
 0x5c9   : > { %11950 = vmatpush3.bf16.xpose.msk.msra.mxu1 %vm13215_vm3, %v11945_v47  ;;  %11120 = vmatprep.mubr.msk.f32.mxu1 %vm2849_vm2, %v1576_v23 }
 0x5cb   : > { %v11000_v50 = vpop.f32.mrb[18].mxu1 }
 0x5cc   : > { %v11033_v51 = vpop.f32.mrb[20].mxu0  ;;  %v2390_v52 = vpop.f32.mrb[19].mxu1 }
 0x5cd   : > { %v13269_v53 = vpack.c.bf16 %v11000_v50, %v2390_v52  ;;  %v2615_v54 = vpop.f32.mrb[21].mxu0 }
 0x5ce   : > { %v13271_v55 = vpack.c.bf16 %v11033_v51, %v2615_v54 }
 0x5cf   : > { %11956 = vmatprep.subr.bf16.mxu0 %v13269_v53 }
 0x5d0   : > { %11121 = vmatmul.mubr.msk.f32.vlgmr.msra.gmra.mrb[32].mxu1 %vm2849_vm2, %v13223_v21 }
 0x5d3   : > { %v11022_v56 = vpop.f32.mrb[20].mxu1 }
 0x5d4   : > { %v11055_v57 = vpop.f32.mrb[22].mxu0  ;;  %v2540_v58 = vpop.f32.mrb[21].mxu1 }
 0x5d5   : > { %v11963_v59 = vpack.c.bf16 %v11022_v56, %v2540_v58  ;;  %v2765_v60 = vpop.f32.mrb[23].mxu0 }
 0x5d6   : > { %v13276_v61 = vpack.c.bf16 %v11055_v57, %v2765_v60 }
 0x5d7   : > { %11964 = vmatprep.subr.bf16.mxu1 %v11963_v59 }
 0x5d8   : > { %11966 = vmatpush3.bf16.msra.mxu1 %v11963_v59 }
 0x5db   : > { %v11044_v62 = vpop.f32.mrb[22].mxu1 }
 0x5dc   : > { %v2690_v1 = vpop.f32.mrb[23].mxu1 }
 0x5dd   : > { %v13278_v2 = vpack.c.bf16 %v11044_v62, %v2690_v1 }
 0x5df   : > { %11972 = vmatprep.subr.bf16.mxu1 %v13278_v2 }
 0x5e3   : > { %v11066_v3 = vpop.f32.mrb[24].mxu1 }
 0x5e4   : > { %v2840_v4 = vpop.f32.mrb[25].mxu1 }
 0x5e5   : > { %v13281_v5 = vpack.c.bf16 %v11066_v3, %v2840_v4 }
 0x67b   : > { %v11073_v6 = vpop.f32.mrb[24].mxu0 }
 0x67c   : > { %v13283_v7 = vmul.f32 0.35355338, %v11073_v6  ;;  %v2928_v8 = vpop.f32.mrb[25].mxu0 }
 0x67d   : > { %v13285_v9 = vmul.f32 0.35355338, %v2928_v8 }
 0x67e   : > { %v3566_v10 = vsel %vm3562_vm4, %v13283_v7, -inf }
 0x67f   : > { %3567 = vmax.xlane.f32.xlu1 %v3566_v10  ;;  %v3563_v11 = vsel %vm3562_vm4, %v13285_v9, -inf }
 0x680   : > { %3564 = vmax.xlane.f32.xlu0 %v3563_v11 }
 0x683   : > { %v11087_v63 = vpop.f32.mrb[26].mxu0 }
 0x684   : > { %v13291_v12 = vmul.f32 0.35355338, %v11087_v63  ;;  %v3102_v15 = vpop.f32.mrb[27].mxu0 }
 0x685   : > { %v13293_v16 = vmul.f32 0.35355338, %v3102_v15 }
 0x686   : > { %v3578_v0 = vsel %vm3562_vm4, %v13291_v12, -inf }
 0x687   : > { %3579 = vmax.xlane.f32.xlu1 %v3578_v0  ;;  %v3575_v17 = vsel %vm3562_vm4, %v13293_v16, -inf }
 0x688   : > { %3576 = vmax.xlane.f32.xlu0 %v3575_v17 }
 0x68b   : > { %v11080_v18 = vpop.f32.mrb[26].mxu1  ;;  %v11101_v20 = vpop.f32.mrb[28].mxu0 }
 0x68c   : > { %v13299_v21 = vmul.f32 0.35355338, %v11080_v18  ;;  %v3015_v22 = vpop.f32.mrb[27].mxu1  ;;  %v3276_v23 = vpop.f32.mrb[29].mxu0  ;;  %v13303_v25 = vmul.f32 0.35355338, %v11101_v20 }
 0x68d   : > { %v13301_v24 = vmul.f32 0.35355338, %v3015_v22  ;;  %v13307_v27 = vmul.f32 0.35355338, %v3276_v23 }
 0x68e   : > { %v3572_v26 = vsel %vm3562_vm4, %v13299_v21, -inf  ;;  %v3590_v29 = vsel %vm3562_vm4, %v13303_v25, -inf }
 0x68f   : > { %3573 = vmax.xlane.f32.xlu1 %v3572_v26  ;;  %v3569_v28 = vsel %vm3562_vm4, %v13301_v24, -inf  ;;  %v3587_v31 = vsel %vm3562_vm4, %v13307_v27, -inf }
 0x690   : > { %3570 = vmax.xlane.f32.xlu0 %v3569_v28 }
 0x693   : > { %3591 = vmax.xlane.f32.xlu1 %v3590_v29  ;;  %v11094_v30 = vpop.f32.mrb[28].mxu1 }
 0x694   : > { %v11115_v32 = vpop.f32.mrb[30].mxu0  ;;  %v13315_v33 = vmul.f32 0.35355338, %v11094_v30  ;;  %3588 = vmax.xlane.f32.xlu0 %v3587_v31  ;;  %v3189_v34 = vpop.f32.mrb[29].mxu1 }
 0x695   : > { %v3450_v35 = vpop.f32.mrb[31].mxu0  ;;  %v13317_v36 = vmul.f32 0.35355338, %v3189_v34  ;;  %v13319_v37 = vmul.f32 0.35355338, %v11115_v32 }
 0x696   : > { %v3584_v38 = vsel %vm3562_vm4, %v13315_v33, -inf  ;;  %v13323_v39 = vmul.f32 0.35355338, %v3450_v35 }
 0x697   : > { %3585 = vmax.xlane.f32.xlu1 %v3584_v38  ;;  %v3581_v40 = vsel %vm3562_vm4, %v13317_v36, -inf  ;;  %v3602_v41 = vsel %vm3562_vm4, %v13319_v37, -inf }
 0x698   : > { %3582 = vmax.xlane.f32.xlu0 %v3581_v40  ;;  %v3599_v43 = vsel %vm3562_vm4, %v13323_v39, -inf }
 0x69b   : > { %3603 = vmax.xlane.f32.xlu1 %v3602_v41  ;;  %v11108_v42 = vpop.f32.mrb[30].mxu1 }
 0x69c   : > { %v13331_v44 = vmul.f32 0.35355338, %v11108_v42  ;;  %3600 = vmax.xlane.f32.xlu0 %v3599_v43  ;;  %v3363_v45 = vpop.f32.mrb[31].mxu1 }
 0x69d   : > { %v13333_v46 = vmul.f32 0.35355338, %v3363_v45 }
 0x69e   : > { %v3596_v47 = vsel %vm3562_vm4, %v13331_v44, -inf }
 0x69f   : > { %3597 = vmax.xlane.f32.xlu1 %v3596_v47  ;;  %v3593_v48 = vsel %vm3562_vm4, %v13333_v46, -inf }
 0x6a0   : > { %3594 = vmax.xlane.f32.xlu0 %v3593_v48 }
 0x6a3   : > { %v11122_v50 = vpop.f32.mrb[32].mxu1 }
 0x6a4   : > { %v13339_v51 = vmul.f32 0.35355338, %v11122_v50  ;;  %v3537_v52 = vpop.f32.mrb[33].mxu1 }
 0x6a5   : > { %v13341_v54 = vmul.f32 0.35355338, %v3537_v52 }
 0x6a6   : > { %v3608_v56 = vsel %vm3562_vm4, %v13339_v51, -inf }
 0x6a7   : > { %3609 = vmax.xlane.f32.xlu1 %v3608_v56  ;;  %v3605_v57 = vsel %vm3562_vm4, %v13341_v54, -inf }
 0x6a8   : > { %3606 = vmax.xlane.f32.xlu0 %v3605_v57 }
 0x70c   : > { %v3568_v58 = vpop.xlane.xlu1 %3567 }
 0x70d   : > { %v3612_v59 = vsub.f32 %v13283_v7, %v3568_v58  ;;  %v3565_v60 = vpop.xlane.xlu0 %3564 }
 0x70e   : > { %v3611_v62 = vsub.f32 %v13285_v9, %v3565_v60 }
 0x70f   : > { %v3629_v1 = vmul.f32 1.442695, %v3612_v59 }
 0x710   : > { %v3627_v3 = vmul.f32 1.442695, %v3611_v62 }
 0x711   : > { %12356 = vpow2.f32 %v3629_v1 }
 0x712   : > { %12358 = vpow2.f32 %v3627_v3 }
 0x714   : > { %v3580_v4 = vpop.xlane.xlu1 %3579 }
 0x715   : > { %v3616_v6 = vsub.f32 %v13291_v12, %v3580_v4  ;;  %v3577_v8 = vpop.xlane.xlu0 %3576 }
 0x716   : > { %v3615_v10 = vsub.f32 %v13293_v16, %v3577_v8 }
 0x717   : > { %v3637_v11 = vmul.f32 1.442695, %v3616_v6 }
 0x718   : > { %v3635_v63 = vmul.f32 1.442695, %v3615_v10 }
 0x719   : > { %12360 = vpow2.f32 %v3637_v11 }
 0x71a   : > { %12362 = vpow2.f32 %v3635_v63 }
 0x71b   : > { %v13351_v15 = vpop.eup %12356 }
 0x71c   : > { %v13353_v7 = vpop.eup %12358  ;;  %v3574_v0 = vpop.xlane.xlu1 %3573  ;;  %v3662_v9 = vsel %vm3562_vm4, %v13351_v15, 0.0 }
 0x71d   : > { %v3614_v17 = vsub.f32 %v13299_v21, %v3574_v0  ;;  %v3571_v18 = vpop.xlane.xlu0 %3570  ;;  %3663 = vadd.xlane.f32.xlu1 %v3662_v9  ;;  %v3659_v12 = vsel %vm3562_vm4, %v13353_v7, 0.0 }
 0x71e   : > { %v3613_v16 = vsub.f32 %v13301_v24, %v3571_v18  ;;  %3660 = vadd.xlane.f32.xlu0 %v3659_v12 }
 0x71f   : > { %v3633_v20 = vmul.f32 1.442695, %v3614_v17 }
 0x720   : > { %v3631_v22 = vmul.f32 1.442695, %v3613_v16  ;;  %v3592_v23 = vpop.xlane.xlu1 %3591 }
 0x721   : > { %12364 = vpow2.f32 %v3633_v20  ;;  %v3620_v26 = vsub.f32 %v13303_v25, %v3592_v23  ;;  %v3589_v28 = vpop.xlane.xlu0 %3588 }
 0x722   : > { %12366 = vpow2.f32 %v3631_v22  ;;  %v3619_v29 = vsub.f32 %v13307_v27, %v3589_v28 }
 0x723   : > { %v13363_v30 = vpop.eup %12360  ;;  %v3645_v21 = vmul.f32 1.442695, %v3620_v26 }
 0x724   : > { %v13365_v31 = vpop.eup %12362  ;;  %v3643_v32 = vmul.f32 1.442695, %v3619_v29  ;;  %v3586_v34 = vpop.xlane.xlu1 %3585  ;;  %v3674_v24 = vsel %vm3562_vm4, %v13363_v30, 0.0 }
 0x725   : > { %12368 = vpow2.f32 %v3645_v21  ;;  %v3618_v35 = vsub.f32 %v13315_v33, %v3586_v34  ;;  %v3583_v38 = vpop.xlane.xlu0 %3582  ;;  %3675 = vadd.xlane.f32.xlu1 %v3674_v24  ;;  %v3671_v25 = vsel %vm3562_vm4, %v13365_v31, 0.0 }
 0x726   : > { %12370 = vpow2.f32 %v3643_v32  ;;  %v3617_v27 = vsub.f32 %v13317_v36, %v3583_v38  ;;  %3672 = vadd.xlane.f32.xlu0 %v3671_v25 }
 0x727   : > { %v3641_v40 = vmul.f32 1.442695, %v3618_v35 }
 0x728   : > { %v3639_v41 = vmul.f32 1.442695, %v3617_v27  ;;  %v3604_v42 = vpop.xlane.xlu1 %3603 }
 0x729   : > { %12372 = vpow2.f32 %v3641_v40  ;;  %v3624_v43 = vsub.f32 %v13319_v37, %v3604_v42  ;;  %v3601_v45 = vpop.xlane.xlu0 %3600 }
 0x72a   : > { %12374 = vpow2.f32 %v3639_v41  ;;  %v3623_v47 = vsub.f32 %v13323_v39, %v3601_v45 }
 0x72b   : > { %v13375_v33 = vpop.eup %12364  ;;  %v3653_v48 = vmul.f32 1.442695, %v3624_v43 }
 0x72c   : > { %v13377_v50 = vpop.eup %12366  ;;  %v3651_v52 = vmul.f32 1.442695, %v3623_v47  ;;  %v3598_v56 = vpop.xlane.xlu1 %3597  ;;  %v3668_v36 = vsel %vm3562_vm4, %v13375_v33, 0.0 }
 0x72d   : > { %12376 = vpow2.f32 %v3653_v48  ;;  %v3622_v57 = vsub.f32 %v13331_v44, %v3598_v56  ;;  %v3595_v58 = vpop.xlane.xlu0 %3594  ;;  %3669 = vadd.xlane.f32.xlu1 %v3668_v36  ;;  %v3665_v37 = vsel %vm3562_vm4, %v13377_v50, 0.0 }
 0x72e   : > { %12378 = vpow2.f32 %v3651_v52  ;;  %v3621_v39 = vsub.f32 %v13333_v46, %v3595_v58  ;;  %3666 = vadd.xlane.f32.xlu0 %v3665_v37 }
 0x72f   : > { %v13385_v59 = vpop.eup %12368  ;;  %v3649_v60 = vmul.f32 1.442695, %v3622_v57 }
 0x730   : > { %v13387_v62 = vpop.eup %12370  ;;  %v3647_v1 = vmul.f32 1.442695, %v3621_v39  ;;  %v3686_v3 = vsel %vm3562_vm4, %v13385_v59, 0.0 }
 0x731   : > { %12380 = vpow2.f32 %v3649_v60  ;;  %3687 = vadd.xlane.f32.xlu1 %v3686_v3  ;;  %v3683_v44 = vsel %vm3562_vm4, %v13387_v62, 0.0 }
 0x732   : > { %12382 = vpow2.f32 %v3647_v1  ;;  %3684 = vadd.xlane.f32.xlu0 %v3683_v44 }
 0x733   : > { %v13393_v4 = vpop.eup %12372 }
 0x734   : > { %v13395_v46 = vpop.eup %12374  ;;  %v3610_v6 = vpop.xlane.xlu1 %3609  ;;  %v3680_v8 = vsel %vm3562_vm4, %v13393_v4, 0.0 }
 0x735   : > { %v3626_v10 = vsub.f32 %v13339_v51, %v3610_v6  ;;  %3681 = vadd.xlane.f32.xlu1 %v3680_v8  ;;  %v3607_v11 = vpop.xlane.xlu0 %3606  ;;  %v3677_v63 = vsel %vm3562_vm4, %v13395_v46, 0.0 }
 0x736   : > { %v3625_v0 = vsub.f32 %v13341_v54, %v3607_v11  ;;  %3678 = vadd.xlane.f32.xlu0 %v3677_v63 }
 0x737   : > { %v13403_v9 = vpop.eup %12376  ;;  %v3657_v17 = vmul.f32 1.442695, %v3626_v10 }
 0x738   : > { %v13405_v18 = vpop.eup %12378  ;;  %v3655_v12 = vmul.f32 1.442695, %v3625_v0  ;;  %v3698_v16 = vsel %vm3562_vm4, %v13403_v9, 0.0 }
 0x739   : > { %12384 = vpow2.f32 %v3657_v17  ;;  %3699 = vadd.xlane.f32.xlu1 %v3698_v16  ;;  %v3695_v51 = vsel %vm3562_vm4, %v13405_v18, 0.0  ;;  %v4390_v16 = vld [vmem:[%s14455_s13 + $0x18] sm:$0xff] }
 0x73a   : > { %12386 = vpow2.f32 %v3655_v12  ;;  %3696 = vadd.xlane.f32.xlu0 %v3695_v51  ;;  %v4389_v12 = vld [vmem:[%s14455_s13 + $0x10] sm:$0xff] }
 0x73b   : > { %v13411_v20 = vpop.eup %12380 }
 0x73c   : > { %v13413_v54 = vpop.eup %12382  ;;  %v3692_v22 = vsel %vm3562_vm4, %v13411_v20, 0.0 }
 0x73d   : > { %3693 = vadd.xlane.f32.xlu1 %v3692_v22  ;;  %v3689_v23 = vsel %vm3562_vm4, %v13413_v54, 0.0 }
 0x73e   : > { %3690 = vadd.xlane.f32.xlu0 %v3689_v23 }
 0x743   : > { %v13419_v26 = vpop.eup %12384 }
 0x744   : > { %v13421_v28 = vpop.eup %12386  ;;  %v3704_v29 = vsel %vm3562_vm4, %v13419_v26, 0.0 }
 0x745   : > { %3705 = vadd.xlane.f32.xlu1 %v3704_v29  ;;  %v3701_v21 = vsel %vm3562_vm4, %v13421_v28, 0.0 }
 0x746   : > { %3702 = vadd.xlane.f32.xlu0 %v3701_v21  ;;  %v4393_v21 = vld [vmem:[%s14455_s13 + $0x30] sm:$0xff] }
 0x7aa   : > { %v3664_v32 = vpop.xlane.xlu1 %3663 }
 0x7ab   : > { %12388 = vrcp.f32 %v3664_v32  ;;  %v3661_v34 = vpop.xlane.xlu0 %3660 }
 0x7ac   : > { %12390 = vrcp.f32 %v3661_v34 }
 0x7b2   : > { %v3676_v38 = vpop.xlane.xlu1 %3675 }
 0x7b3   : > { %v3673_v25 = vpop.xlane.xlu0 %3672 }
 0x7b4   : > { %12392 = vrcp.f32 %v3673_v25 }
 0x7b5   : > { %v12389_v24 = vpop.eup %12388 }
 0x7b6   : > { %v12391_v35 = vpop.eup %12390  ;;  %v3724_v40 = vmul.f32 %v12389_v24, %v13351_v15 }
 0x7b7   : > { %v3723_v27 = vmul.f32 %v12391_v35, %v13353_v7 }
 0x7b9   : > { %11127 = vmatprep.mubr.msk.f32.mxu0 %vm3562_vm4, %v3723_v27 }
 0x7ba   : > { %v3670_v41 = vpop.xlane.xlu1 %3669  ;;  %11128 = vmatmul.mubr.msk.f32.vlgmr.msra.gmra.mrb[32].mxu0 %vm3562_vm4, %v3724_v40 }
 0x7bb   : > { %12394 = vrcp.f32 %v3670_v41  ;;  %11958 = vmatpush3.bf16.msra.mxu0 %v13269_v53  ;;  %v3667_v42 = vpop.xlane.xlu0 %3666 }
 0x7bc   : > { %11960 = vmatprep.subr.bf16.mxu0 %v13260_v49  ;;  %12396 = vrcp.f32 %v3667_v42 }
 0x7bd   : > { %12398 = vrcp.f32 %v3676_v38  ;;  %v4394_v38 = vld [vmem:[%s14455_s13 + $0x38] sm:$0xff] }
 0x7be   : > { %v3688_v43 = vpop.xlane.xlu1 %3687  ;;  %v12393_v47 = vpop.eup %12392 }
 0x7bf   : > { %v3685_v45 = vpop.xlane.xlu0 %3684  ;;  %v3727_v37 = vmul.f32 %v12393_v47, %v13365_v31 }
 0x7c0   : > { %12400 = vrcp.f32 %v3685_v45 }
 0x7c1   : > { %12402 = vrcp.f32 %v3688_v43 }
 0x7c2   : > { %v3682_v7 = vpop.xlane.xlu1 %3681 }
 0x7c3   : > { %12404 = vrcp.f32 %v3682_v7  ;;  %v3679_v15 = vpop.xlane.xlu0 %3678 }
 0x7c4   : > { %12406 = vrcp.f32 %v3679_v15 }
 0x7c5   : > { %v12395_v48 = vpop.eup %12394 }
 0x7c6   : > { %v12397_v52 = vpop.eup %12396  ;;  %v3700_v56 = vpop.xlane.xlu1 %3699  ;;  %v3726_v57 = vmul.f32 %v12395_v48, %v13375_v33 }
 0x7c7   : > { %12408 = vrcp.f32 %v3700_v56  ;;  %v3697_v36 = vpop.xlane.xlu0 %3696  ;;  %v3725_v53 = vmul.f32 %v12397_v52, %v13377_v50  ;;  %v12399_v58 = vpop.eup %12398 }
 0x7c8   : > { %12410 = vrcp.f32 %v3697_v36  ;;  %v3728_v50 = vmul.f32 %v12399_v58, %v13363_v30 }
 0x7c9   : > { %11134 = vmatprep.mubr.msk.f32.mxu0 %vm3562_vm4, %v3725_v53 }
 0x7ca   : > { %v12401_v39 = vpop.eup %12400  ;;  %v3694_v60 = vpop.xlane.xlu1 %3693  ;;  %11135 = vmatmul.mubr.msk.f32.vlgmr.msra.gmra.mrb[34].mxu0 %vm3562_vm4, %v3726_v57 }
 0x7cb   : > { %12412 = vrcp.f32 %v3694_v60  ;;  %11962 = vmatpush3.bf16.msra.mxu0 %v13260_v49  ;;  %11141 = vmatprep.mubr.msk.f32.mxu0 %vm3562_vm4, %v3727_v37  ;;  %v3691_v1 = vpop.xlane.xlu0 %3690  ;;  %v12403_v3 = vpop.eup %12402  ;;  %v3731_v44 = vmul.f32 %v12401_v39, %v13387_v62 }
 0x7cc   : > { %11968 = vmatprep.subr.bf16.mxu0 %v13271_v55  ;;  %12414 = vrcp.f32 %v3691_v1  ;;  %v3732_v6 = vmul.f32 %v12403_v3, %v13385_v59 }
 0x7cd   : > { %v12405_v33 = vpop.eup %12404 }
 0x7ce   : > { %v12407_v31 = vpop.eup %12406  ;;  %11142 = vmatmul.mubr.msk.f32.vlgmr.msra.gmra.mrb[36].mxu0 %vm3562_vm4, %v3728_v50  ;;  %v3730_v8 = vmul.f32 %v12405_v33, %v13393_v4 }
 0x7cf   : > { %11970 = vmatpush3.bf16.msra.mxu0 %v13271_v55  ;;  %11155 = vmatprep.mubr.msk.f32.mxu0 %vm3562_vm4, %v3731_v44  ;;  %v3729_v49 = vmul.f32 %v12407_v31, %v13395_v46 }
 0x7d0   : > { %11976 = vmatprep.subr.bf16.mxu0 %v13276_v61 }
 0x7d1   : > { %v12409_v30 = vpop.eup %12408  ;;  %11148 = vmatprep.mubr.msk.f32.mxu1 %vm3562_vm4, %v3729_v49 }
 0x7d2   : > { %v12411_v10 = vpop.eup %12410  ;;  %v3706_v62 = vpop.xlane.xlu1 %3705  ;;  %11149 = vmatmul.mubr.msk.f32.vlgmr.msra.gmra.mrb[34].mxu1 %vm3562_vm4, %v3730_v8  ;;  %11156 = vmatmul.mubr.msk.f32.vlgmr.msra.gmra.mrb[38].mxu0 %vm3562_vm4, %v3732_v6  ;;  %v3736_v4 = vmul.f32 %v12409_v30, %v13403_v9 }
 0x7d3   : > { %12416 = vrcp.f32 %v3706_v62  ;;  %11974 = vmatpush3.bf16.msra.mxu1 %v13278_v2  ;;  %11978 = vmatpush3.bf16.msra.mxu0 %v13276_v61  ;;  %v3703_v55 = vpop.xlane.xlu0 %3702  ;;  %v3735_v59 = vmul.f32 %v12411_v10, %v13405_v18  ;;  %v4387_v18 = vld [vmem:[%s14455_s13] sm:$0xff] }
 0x7d4   : > { %11980 = vmatprep.subr.bf16.mxu1 %v13281_v5  ;;  %12418 = vrcp.f32 %v3703_v55  ;;  %11179 = vmatprep.subr.mxu0 %v4387_v18 }
 0x7d5   : > { %v12413_v46 = vpop.eup %12412  ;;  %11169 = vmatprep.mubr.msk.f32.mxu0 %vm3562_vm4, %v3735_v59 }
 0x7d6   : > { %v12415_v11 = vpop.eup %12414  ;;  %11170 = vmatmul.mubr.msk.f32.vlgmr.msra.gmra.mrb[40].mxu0 %vm3562_vm4, %v3736_v4  ;;  %v3734_v2 = vmul.f32 %v12413_v46, %v13411_v20 }
 0x7d7   : > { %v3733_v63 = vmul.f32 %v12415_v11, %v13413_v54  ;;  %11180 = vmatpush3.msra.mxu0 %v4387_v18  ;;  %v4391_v54 = vld [vmem:[%s14455_s13 + $0x20] sm:$0xff] }
 0x7d8   : > { %11189 = vmatprep.subr.mxu0 %v4389_v12 }
 0x7d9   : > { %11162 = vmatprep.mubr.msk.f32.mxu1 %vm3562_vm4, %v3733_v63 }
 0x7da   : > { %11163 = vmatmul.mubr.msk.f32.vlgmr.msra.gmra.mrb[36].mxu1 %vm3562_vm4, %v3734_v2 }
 0x7db   : > { %11982 = vmatpush3.bf16.msra.mxu1 %v13281_v5  ;;  %v4388_v5 = vld [vmem:[%s14455_s13 + $0x8] sm:$0xff] }
 0x7dc   : > { %11184 = vmatprep.subr.mxu1 %v4388_v5 }
 0x7dd   : > { %v12417_v61 = vpop.eup %12416 }
 0x7de   : > { %v12419_v0 = vpop.eup %12418  ;;  %v3738_v17 = vmul.f32 %v12417_v61, %v13419_v26  ;;  %v4392_v26 = vld [vmem:[%s14455_s13 + $0x28] sm:$0xff] }
 0x7df   : > { %v3737_v9 = vmul.f32 %v12419_v0, %v13421_v28 }
 0x7e1   : > { %11176 = vmatprep.mubr.msk.f32.mxu1 %vm3562_vm4, %v3737_v9 }
 0x7e2   : > { %11177 = vmatmul.mubr.msk.f32.vlgmr.msra.gmra.mrb[38].mxu1 %vm3562_vm4, %v3738_v17 }
 0x7e3   : > { %11185 = vmatpush3.msra.mxu1 %v4388_v5 }
 0x7e4   : > { %11194 = vmatprep.subr.mxu1 %v4390_v16 }
 0x88d   : > { %v11129_v51 = vpop.f32.mrb[32].mxu0 }
 0x88e   : > { %v3811_v20 = vpop.f32.mrb[33].mxu0 }
 0x88f   : > { %11181 = vmatprep.mubr.msk.f32.mxu0 %vm2849_vm2, %v3811_v20  ;;  %v10014_v20 = vld [vmem:[%s14456_s14] ss:$0 sm:$0xff] }
 0x890   : > { %11182 = vmatmul.mubr.msk.f32.vlgmr.msra.gmra.mrb[42].mxu0 %vm2849_vm2, %v11129_v51 }
 0x891   : > { %11190 = vmatpush3.msra.mxu0 %v4389_v12 }
 0x892   : > { %11199 = vmatprep.subr.mxu0 %v4391_v54 }
 0x89d   : > { %v11136_v22 = vpop.f32.mrb[34].mxu0 }
 0x89e   : > { %v3892_v23 = vpop.f32.mrb[35].mxu0 }
 0x89f   : > { %11186 = vmatprep.mubr.msk.f32.mxu1 %vm2849_vm2, %v3892_v23 }
 0x8a0   : > { %11187 = vmatmul.mubr.msk.f32.vlgmr.msra.gmra.mrb[40].mxu1 %vm2849_vm2, %v11136_v22 }
 0x8a1   : > { %v11143_v28 = vpop.f32.mrb[36].mxu0  ;;  %11195 = vmatpush3.msra.mxu1 %v4390_v16 }
 0x8a2   : > { %v3973_v29 = vpop.f32.mrb[37].mxu0  ;;  %11204 = vmatprep.subr.mxu1 %v4392_v26 }
 0x8a3   : > { %11191 = vmatprep.mubr.msk.f32.mxu0 %vm2849_vm2, %v3973_v29 }
 0x8a4   : > { %11192 = vmatmul.mubr.msk.f32.vlgmr.msra.gmra.mrb[44].mxu0 %vm2849_vm2, %v11143_v28 }
 0x8a5   : > { %v11150_v32 = vpop.f32.mrb[34].mxu1  ;;  %v11157_v34 = vpop.f32.mrb[38].mxu0  ;;  %11200 = vmatpush3.msra.mxu0 %v4391_v54 }
 0x8a6   : > { %v4054_v24 = vpop.f32.mrb[35].mxu1  ;;  %v4135_v35 = vpop.f32.mrb[39].mxu0  ;;  %11209 = vmatprep.subr.mxu0 %v4393_v21 }
 0x8a7   : > { %11196 = vmatprep.mubr.msk.f32.mxu1 %vm2849_vm2, %v4054_v24  ;;  %11201 = vmatprep.mubr.msk.f32.mxu0 %vm2849_vm2, %v4135_v35 }
 0x8a8   : > { %11197 = vmatmul.mubr.msk.f32.vlgmr.msra.gmra.mrb[42].mxu1 %vm2849_vm2, %v11150_v32  ;;  %11202 = vmatmul.mubr.msk.f32.vlgmr.msra.gmra.mrb[46].mxu0 %vm2849_vm2, %v11157_v34 }
 0x8a9   : > { %v11171_v25 = vpop.f32.mrb[40].mxu0  ;;  %11210 = vmatpush3.msra.mxu0 %v4393_v21  ;;  %11205 = vmatpush3.msra.mxu1 %v4392_v26 }
 0x8aa   : > { %v4297_v27 = vpop.f32.mrb[41].mxu0  ;;  %11214 = vmatprep.subr.mxu1 %v4394_v38 }
 0x8ab   : > { %11211 = vmatprep.mubr.msk.f32.mxu0 %vm2849_vm2, %v4297_v27 }
 0x8ac   : > { %11212 = vmatmul.mubr.msk.f32.vlgmr.msra.gmra.mrb[48].mxu0 %vm2849_vm2, %v11171_v25 }
 0x8ad   : > { %v11164_v40 = vpop.f32.mrb[36].mxu1 }
 0x8ae   : > { %v4216_v41 = vpop.f32.mrb[37].mxu1 }
 0x8af   : > { %11206 = vmatprep.mubr.msk.f32.mxu1 %vm2849_vm2, %v4216_v41 }
 0x8b0   : > { %11207 = vmatmul.mubr.msk.f32.vlgmr.msra.gmra.mrb[44].mxu1 %vm2849_vm2, %v11164_v40 }
 0x8b1   : > { %11215 = vmatpush3.msra.mxu1 %v4394_v38 }
 0x8b5   : > { %v11178_v42 = vpop.f32.mrb[38].mxu1 }
 0x8b6   : > { %v4378_v43 = vpop.f32.mrb[39].mxu1 }
 0x8b7   : > { %11216 = vmatprep.mubr.msk.f32.mxu1 %vm2849_vm2, %v4378_v43 }
 0x8b8   : > { %11217 = vmatmul.mubr.msk.f32.vlgmr.msra.gmra.mrb[46].mxu1 %vm2849_vm2, %v11178_v42 }
 0x963   : > { %v11183_v45 = vpop.f32.mrb[42].mxu0 }
 0x964   : > { %v4467_v7 = vpop.f32.mrb[43].mxu0  ;;  %v5058_v47 = vsel %vm855_vm1, %v11183_v45, 0.0  ;;  %v5128_v45 = vld [vmem:[%s14459_s17] sm:$0xff] }
 0x965   : > { %v5043_v56 = vsel %vm855_vm1, %v4467_v7, 0.0  ;;  %v5129_v7 = vld [vmem:[%s14459_s17 + $0x8] sm:$0xff] }
 0x973   : > { %v11188_v15 = vpop.f32.mrb[40].mxu1 }
 0x974   : > { %v5059_v48 = vsel %vm855_vm1, %v11188_v15, 0.0  ;;  %v4548_v52 = vpop.f32.mrb[41].mxu1  ;;  %v11983_v15 = vpack.c.bf16 %v5129_v7, %v5128_v45 }
 0x975   : > { %v5060_v36 = vadd.f32 %v5059_v48, %v5058_v47  ;;  %v5044_v53 = vsel %vm855_vm1, %v4548_v52, 0.0  ;;  %v5130_v47 = vld [vmem:[%s14459_s17 + $0x10] sm:$0xff]  ;;  %v5131_v48 = vld [vmem:[%s14459_s17 + $0x18] sm:$0xff] }
 0x976   : > { %v5045_v57 = vadd.f32 %v5044_v53, %v5043_v56  ;;  %v11987_v52 = vpack.c.bf16 %v5131_v48, %v5130_v47  ;;  %11984 = vmatprep.subr.bf16.mxu0 %v11983_v15 }
 0x977   : > { %v11193_v58 = vpop.f32.mrb[44].mxu0  ;;  %11986 = vmatpush3.bf16.msra.mxu0 %v11983_v15 }
 0x978   : > { %v5061_v37 = vsel %vm855_vm1, %v11193_v58, 0.0  ;;  %v4629_v39 = vpop.f32.mrb[45].mxu0  ;;  %11988 = vmatprep.subr.bf16.mxu0 %v11987_v52 }
 0x979   : > { %v5062_v60 = vadd.f32 %v5061_v37, %v5060_v36  ;;  %v5046_v1 = vsel %vm855_vm1, %v4629_v39, 0.0 }
 0x97a   : > { %v5047_v3 = vadd.f32 %v5046_v1, %v5045_v57 }
 0x97b   : > { %v11198_v50 = vpop.f32.mrb[42].mxu1  ;;  %v11203_v33 = vpop.f32.mrb[46].mxu0  ;;  %11990 = vmatpush3.bf16.msra.mxu0 %v11987_v52  ;;  %v10027_v52 = vld [vmem:[%s14452_s10 + $0x100] sm:$0xff] }
 0x97c   : > { %v5063_v44 = vsel %vm855_vm1, %v11198_v50, 0.0  ;;  %v4710_v31 = vpop.f32.mrb[43].mxu1  ;;  %v4791_v49 = vpop.f32.mrb[47].mxu0  ;;  %v5065_v30 = vsel %vm855_vm1, %v11203_v33, 0.0  ;;  %v10016_v33 = vld [vmem:[%s14458_s16] ss:$0 sm:$0xff] }
 0x97d   : > { %v5064_v6 = vadd.f32 %v5063_v44, %v5062_v60  ;;  %v5048_v8 = vsel %vm855_vm1, %v4710_v31, 0.0  ;;  %v5050_v55 = vsel %vm855_vm1, %v4791_v49, 0.0  ;;  %v10015_v60 = vld [vmem:[%s14457_s15] ss:$0 sm:$0xff] }
 0x97e   : > { %v5049_v10 = vadd.f32 %v5048_v8, %v5047_v3  ;;  %v5230_v8 = vld [vmem:[%s14461_s19] sm:$0xff] }
 0x97f   : > { %v5066_v62 = vadd.f32 %v5065_v30, %v5064_v6  ;;  %v11213_v59 = vpop.f32.mrb[48].mxu0  ;;  %v5231_v30 = vld [vmem:[%s14461_s19 + $0x8] sm:$0xff] }
 0x980   : > { %v5051_v4 = vadd.f32 %v5050_v55, %v5049_v10  ;;  %v4953_v46 = vpop.f32.mrb[49].mxu0  ;;  %v5069_v9 = vsel %vm855_vm1, %v11213_v59, 0.0  ;;  %v11991_v10 = vpack.c.bf16 %v5231_v30, %v5230_v8  ;;  %v5233_v55 = vld [vmem:[%s14461_s19 + $0x18] sm:$0xff] }
 0x981   : > { %v5054_v18 = vsel %vm855_vm1, %v4953_v46, 0.0  ;;  %v5235_v46 = vld [vmem:[%s14461_s19 + $0x28] sm:$0xff] }
 0x982   : > { %11992 = vmatprep.subr.bf16.mxu1 %v11991_v10 }
 0x983   : > { %v11208_v11 = vpop.f32.mrb[44].mxu1  ;;  %11994 = vmatpush3.bf16.msra.mxu1 %v11991_v10 }
 0x984   : > { %v5067_v63 = vsel %vm855_vm1, %v11208_v11, 0.0  ;;  %v4872_v2 = vpop.f32.mrb[45].mxu1 }
 0x985   : > { %v5068_v61 = vadd.f32 %v5067_v63, %v5066_v62  ;;  %v5052_v0 = vsel %vm855_vm1, %v4872_v2, 0.0  ;;  %v5232_v62 = vld [vmem:[%s14461_s19 + $0x10] sm:$0xff]  ;;  %v5237_v2 = vld [vmem:[%s14461_s19 + $0x38] sm:$0xff] }
 0x986   : > { %v5053_v17 = vadd.f32 %v5052_v0, %v5051_v4  ;;  %v11995_v59 = vpack.c.bf16 %v5233_v55, %v5232_v62  ;;  %v5234_v4 = vld [vmem:[%s14461_s19 + $0x20] sm:$0xff]  ;;  %v5236_v63 = vld [vmem:[%s14461_s19 + $0x30] sm:$0xff] }
 0x987   : > { %v5070_v5 = vadd.f32 %v5069_v9, %v5068_v61  ;;  %v11999_v11 = vpack.c.bf16 %v5235_v46, %v5234_v4  ;;  %v12003_v61 = vpack.c.bf16 %v5237_v2, %v5236_v63  ;;  %v10017_v0 = vld [vmem:[%s14460_s18] ss:$0 sm:$0xff] }
 0x988   : > { %v5055_v12 = vadd.f32 %v5054_v18, %v5053_v17  ;;  %11996 = vmatprep.subr.bf16.mxu1 %v11995_v59 }
 0x989   : > { %11998 = vmatpush3.bf16.msra.mxu1 %v11995_v59 }
 0x98a   : > { %12000 = vmatprep.subr.bf16.mxu1 %v11999_v11 }
 0x98b   : > { %v11218_v16 = vpop.f32.mrb[46].mxu1 }
 0x98c   : > { %v5071_v51 = vsel %vm855_vm1, %v11218_v16, 0.0  ;;  %v5034_v54 = vpop.f32.mrb[47].mxu1 }
 0x98d   : > { %v5072_v22 = vadd.f32 %v5071_v51, %v5070_v5  ;;  %v5056_v23 = vsel %vm855_vm1, %v5034_v54, 0.0  ;;  %12002 = vmatpush3.bf16.msra.mxu1 %v11999_v11  ;;  %v10025_v11 = vld [vmem:[%s14499_s8 + $0x1] ss:$0 sm:$0xff]  ;;  %s12572_s8 = smov [#allocation2]  }
 0x98e   : > { %v5057_v26 = vadd.f32 %v5056_v23, %v5055_v12  ;;  %12004 = vmatprep.subr.bf16.mxu1 %v12003_v61  ;;  %s12512_s28 = sshll.u32 %s12572_s8, 4  ;;  %s12513_s28 = int_to_ptr.vmem [resolvable:$false] %s12512_s28 }
 0x98f   : > { %v5081_v28 = vadd.f32 %v10014_v20, %v5072_v22  ;;  %s12514_s6 = scalar_lea.vmem %s12513_s28, 512  ;;  %p12515_p0 = scmp.lt.s32.totalorder %s14397_s0, %s12513_s28 }
 0x990   : > { %v5080_v29 = vadd.f32 %v10014_v20, %v5057_v26  ;;  %p12516_p1 = scmp.lt.s32.totalorder %s12514_s6, %s12508_s26 }
 0x991   : > { %v13529_v21 = vadd.f32 %v5081_v28, %v12803_v13  ;;  %12006 = vmatpush3.bf16.msra.mxu1 %v12003_v61 }
 0x992   : > { %v13532_v32 = vadd.f32 %v5080_v29, %v12805_v14  ;;  %p12517_p2 = por %p12516_p1, %p12515_p0 }
 0x993   : > { %v5089_v34 = vsel %vm855_vm1, %v13529_v21, 0.0 }
 0x994   : > { %5090 = vadd.xlane.f32.xlu1 %v5089_v34  ;;  %v5086_v24 = vsel %vm855_vm1, %v13532_v32, 0.0  ;;  %v10020_v34 = vld [vmem:[%s14462_s20] ss:$0 sm:$0xff]  ;;  %p12518_p3 = pnand %p12517_p2, %p12511_p13 }
 0x995   : > { %5087 = vadd.xlane.f32.xlu0 %v5086_v24 }
 0xa21   : > { %v5091_v35 = vpop.xlane.xlu1 %5090 }
 0xa22   : > { %v5093_v38 = vmul.f32 0.03125, %v5091_v35  ;;  %v5088_v25 = vpop.xlane.xlu0 %5087 }
 0xa23   : > { %v5092_v27 = vmul.f32 0.03125, %v5088_v25 }
 0xa24   : > { %v5095_v40 = vsub.f32 %v13529_v21, %v5093_v38 }
 0xa25   : > { %v5094_v13 = vsub.f32 %v13532_v32, %v5092_v27 }
 0xa26   : > { %v5097_v41 = vmul.f32 %v5095_v40, %v5095_v40 }
 0xa27   : > { %v5096_v42 = vmul.f32 %v5094_v13, %v5094_v13 }
 0xa28   : > { %v5101_v14 = vsel %vm855_vm1, %v5097_v41, 0.0 }
 0xa29   : > { %5102 = vadd.xlane.f32.xlu1 %v5101_v14  ;;  %v5098_v43 = vsel %vm855_vm1, %v5096_v42, 0.0 }
 0xa2a   : > { %5099 = vadd.xlane.f32.xlu0 %v5098_v43 }
 0xab6   : > { %v5103_v56 = vpop.xlane.xlu1 %5102 }
 0xab7   : > { %v5105_v36 = vmul.f32 0.03125, %v5103_v56  ;;  %v5100_v53 = vpop.xlane.xlu0 %5099  ;;  %v10028_v56 = vld [vmem:[%s14452_s10 + $0x108] sm:$0xff] }
 0xab8   : > { %v5104_v57 = vmul.f32 0.03125, %v5100_v53  ;;  %v12007_v53 = vpack.c.bf16 %v10028_v56, %v10027_v52  ;;  %v10078_v52 = vld [vmem:[%s14453_s11 + $0x118] sm:$0xff] }
 0xab9   : > { %v5107_v58 = vadd.f32 1e-05, %v5105_v36  ;;  %v10035_v36 = vld [vmem:[%s14452_s10 + $0x140] sm:$0xff] }
 0xaba   : > { %v5106_v37 = vadd.f32 1e-05, %v5104_v57  ;;  %v10036_v57 = vld [vmem:[%s14452_s10 + $0x148] sm:$0xff]  ;;  %12008 = vmatprep.subr.bf16.mxu0 %v12007_v53 }
 0xabb   : > { %12420 = vrsqrt.f32 %v5107_v58  ;;  %v12023_v58 = vpack.c.bf16 %v10036_v57, %v10035_v36  ;;  %v10055_v36 = vld [vmem:[%s14452_s10 + $0x1e0] sm:$0xff] }
 0xabc   : > { %12422 = vrsqrt.f32 %v5106_v37  ;;  %v10029_v37 = vld [vmem:[%s14452_s10 + $0x110] sm:$0xff] }
 0xabd   : > { %12024 = vmatprep.subr.bf16.mxu1 %v12023_v58 }
 0xac5   : > { %v12421_v39 = vpop.eup %12420 }
 0xac6   : > { %v12423_v1 = vpop.eup %12422  ;;  %v5111_v3 = vmul.f32 %v12421_v39, %v5095_v40  ;;  %v10030_v39 = vld [vmem:[%s14452_s10 + $0x118] sm:$0xff] }
 0xac7   : > { %v5110_v50 = vmul.f32 %v12423_v1, %v5094_v13  ;;  %v12011_v1 = vpack.c.bf16 %v10030_v39, %v10029_v37  ;;  %v10084_v37 = vld [vmem:[%s14453_s11 + $0x148] sm:$0xff] }
 0xac8   : > { %v5119_v44 = vmul.f32 %v10015_v60, %v5111_v3  ;;  %v10038_v3 = vld [vmem:[%s14452_s10 + $0x158] sm:$0xff] }
 0xac9   : > { %v5118_v31 = vmul.f32 %v10015_v60, %v5110_v50  ;;  %v10037_v60 = vld [vmem:[%s14452_s10 + $0x150] sm:$0xff] }
 0xaca   : > { %v5127_v6 = vadd.f32 %v10016_v33, %v5119_v44  ;;  %v12027_v50 = vpack.c.bf16 %v10038_v3, %v10037_v60  ;;  %v10032_v44 = vld [vmem:[%s14452_s10 + $0x128] sm:$0xff]  ;;  %v10058_v3 = vld [vmem:[%s14452_s10 + $0x1f8] sm:$0xff] }
 0xacb   : > { %v5126_v49 = vadd.f32 %v10016_v33, %v5118_v31  ;;  %v10031_v33 = vld [vmem:[%s14452_s10 + $0x120] sm:$0xff] }
 0xacc   : > { %v10043_v31 = vld [vmem:[%s14452_s10 + $0x180] sm:$0xff] }
 0xacd   : > { %11227 = vmatprep.mubr.msk.f32.mxu0 %vm855_vm1, %v5126_v49  ;;  %v12015_v49 = vpack.c.bf16 %v10032_v44, %v10031_v33  ;;  %v10086_v33 = vld [vmem:[%s14453_s11 + $0x158] sm:$0xff] }
 0xace   : > { %11228 = vmatmul.mubr.msk.f32.vlgmr.msra.gmra.mrb[50].mxu0 %vm855_vm1, %v5127_v6  ;;  %v10044_v6 = vld [vmem:[%s14452_s10 + $0x188] sm:$0xff] }
 0xacf   : > { %12010 = vmatpush3.bf16.msra.mxu0 %v12007_v53  ;;  %v12039_v8 = vpack.c.bf16 %v10044_v6, %v10043_v31  ;;  %v10056_v53 = vld [vmem:[%s14452_s10 + $0x1e8] sm:$0xff]  ;;  %v10079_v31 = vld [vmem:[%s14453_s11 + $0x120] sm:$0xff] }
 0xad0   : > { %12012 = vmatprep.subr.bf16.mxu0 %v12011_v1  ;;  %v12063_v39 = vpack.c.bf16 %v10056_v53, %v10055_v36  ;;  %v10127_v53 = vld [vmem:[%s14454_s12 + $0x120] sm:$0xff] }
 0xad3   : > { %12014 = vmatpush3.bf16.msra.mxu0 %v12011_v1  ;;  %v10057_v1 = vld [vmem:[%s14452_s10 + $0x1f0] sm:$0xff] }
 0xad4   : > { %12016 = vmatprep.subr.bf16.mxu0 %v12015_v49  ;;  %v12067_v44 = vpack.c.bf16 %v10058_v3, %v10057_v1  ;;  %v10129_v3 = vld [vmem:[%s14454_s12 + $0x130] sm:$0xff] }
 0xba1   : > { %v11229_v9 = vpop.f32.mrb[50].mxu0 }
 0xba2   : > { %v5217_v17 = vadd.f32 %v11229_v9, %v10017_v0  ;;  %v5211_v18 = vpop.f32.mrb[51].mxu0 }
 0xba3   : > { %v5212_v5 = vadd.f32 %v10017_v0, %v5211_v18  ;;  %v10026_v0 = vld [vmem:[%s14500_s9 + $0x1] ss:$0 sm:$0xff]  ;;  %v10033_v18 = vld [vmem:[%s14452_s10 + $0x130] sm:$0xff]  ;;  %s14395_s9 = scalar_lea.hbm %s14465_s23, %s10277_s1 }
 0xba4   : > { %v5223_v12 = vmul.f32 0.70710677, %v5217_v17  ;;  %v5221_v26 = vmul.f32 0.5, %v5217_v17 }
 0xba5   : > { %v5222_v16 = vmul.f32 0.70710677, %v5212_v5  ;;  %v5220_v22 = vmul.f32 0.5, %v5212_v5  ;;  %v10034_v5 = vld [vmem:[%s14452_s10 + $0x138] sm:$0xff] }
 0xba6   : > { %12424 = verf.f32 %v5223_v12  ;;  %v10045_v12 = vld [vmem:[%s14452_s10 + $0x190] sm:$0xff] }
 0xba7   : > { %12426 = verf.f32 %v5222_v16  ;;  %v10046_v16 = vld [vmem:[%s14452_s10 + $0x198] sm:$0xff] }
 0xbb0   : > { %v12425_v51 = vpop.eup %12424 }
 0xbb1   : > { %v12427_v20 = vpop.eup %12426  ;;  %v5227_v54 = vadd.f32 1.0, %v12425_v51 }
 0xbb2   : > { %v5226_v23 = vadd.f32 1.0, %v12427_v20 }
 0xbb3   : > { %v5229_v29 = vmul.f32 %v5227_v54, %v5221_v26  ;;  %v10039_v54 = vld [vmem:[%s14452_s10 + $0x160] sm:$0xff]  ;;  %v10040_v26 = vld [vmem:[%s14452_s10 + $0x168] sm:$0xff] }
 0xbb4   : > { %v5228_v28 = vmul.f32 %v5226_v23, %v5220_v22  ;;  %v12019_v22 = vpack.c.bf16 %v10034_v5, %v10033_v18  ;;  %v12043_v23 = vpack.c.bf16 %v10046_v16, %v10045_v12  ;;  %v10089_v5 = vld [vmem:[%s14453_s11 + $0x170] sm:$0xff]  ;;  %v10090_v12 = vld [vmem:[%s14453_s11 + $0x178] sm:$0xff] }
 0xbb5   : > { %v10101_v16 = vld [vmem:[%s14453_s11 + $0x1d0] sm:$0xff] }
 0xbb6   : > { %11246 = vmatprep.mubr.msk.f32.mxu1 %vm713_vm0, %v5228_v28  ;;  %v10051_v28 = vld [vmem:[%s14452_s10 + $0x1c0] sm:$0xff] }
 0xbb7   : > { %11247 = vmatmul.mubr.msk.f32.vlgmr.msra.gmra.mrb[48].mxu1 %vm713_vm0, %v5229_v29  ;;  %v10052_v29 = vld [vmem:[%s14452_s10 + $0x1c8] sm:$0xff] }
 0xbb8   : > { %12026 = vmatpush3.bf16.msra.mxu1 %v12023_v58  ;;  %v10083_v58 = vld [vmem:[%s14453_s11 + $0x140] sm:$0xff] }
 0xbb9   : > { %12028 = vmatprep.subr.bf16.mxu1 %v12027_v50  ;;  %v12087_v60 = vpack.c.bf16 %v10084_v37, %v10083_v58  ;;  %v10139_v37 = vld [vmem:[%s14454_s12 + $0x180] sm:$0xff] }
 0xbbc   : > { %12030 = vmatpush3.bf16.msra.mxu1 %v12027_v50  ;;  %v10085_v50 = vld [vmem:[%s14453_s11 + $0x150] sm:$0xff] }
 0xbbd   : > { %12040 = vmatprep.subr.bf16.mxu1 %v12039_v8  ;;  %v12091_v6 = vpack.c.bf16 %v10086_v33, %v10085_v50  ;;  %v10130_v50 = vld [vmem:[%s14454_s12 + $0x138] sm:$0xff]  ;;  %v10141_v33 = vld [vmem:[%s14454_s12 + $0x190] sm:$0xff] }
 0xc8a   : > { %v11248_v24 = vpop.f32.mrb[48].mxu1 }
 0xc8b   : > { %v5323_v35 = vadd.f32 %v11248_v24, %v10020_v34  ;;  %v5317_v38 = vpop.f32.mrb[49].mxu1  ;;  %v12055_v24 = vpack.c.bf16 %v10052_v29, %v10051_v28  ;;  %v10123_v29 = vld [vmem:[%s14454_s12 + $0x100] sm:$0xff] }
 0xc8c   : > { %v5318_v25 = vadd.f32 %v10020_v34, %v5317_v38  ;;  %v12031_v34 = vpack.c.bf16 %v10040_v26, %v10039_v54  ;;  %v10042_v38 = vld [vmem:[%s14452_s10 + $0x178] sm:$0xff]  ;;  %v10096_v26 = vld [vmem:[%s14453_s11 + $0x1a8] sm:$0xff] }
 0xc8d   : > { %v13595_v27 = vadd.f32 %v5323_v35, %v13529_v21  ;;  %v10041_v35 = vld [vmem:[%s14452_s10 + $0x170] sm:$0xff]  ;;  %v10102_v54 = vld [vmem:[%s14453_s11 + $0x1d8] sm:$0xff] }
 0xc8e   : > { %v13598_v40 = vadd.f32 %v5318_v25, %v13532_v32  ;;  %v10053_v25 = vld [vmem:[%s14452_s10 + $0x1d0] sm:$0xff]  ;;  %v12123_v28 = vpack.c.bf16 %v10102_v54, %v10101_v16  ;;  %v10152_v16 = vld [vmem:[%s14454_s12 + $0x1e8] sm:$0xff] }
 0xc8f   : > { %v5335_v13 = vsel %vm855_vm1, %v13595_v27, 0.0 }
 0xc90   : > { %5336 = vadd.xlane.f32.xlu1 %v5335_v13  ;;  %v5332_v41 = vsel %vm855_vm1, %v13598_v40, 0.0  ;;  %v10054_v13 = vld [vmem:[%s14452_s10 + $0x1d8] sm:$0xff] }
 0xc91   : > { %5333 = vadd.xlane.f32.xlu0 %v5332_v41  ;;  %v12035_v41 = vpack.c.bf16 %v10042_v38, %v10041_v35  ;;  %v10097_v38 = vld [vmem:[%s14453_s11 + $0x1b0] sm:$0xff] }
 0xd1d   : > { %v5337_v42 = vpop.xlane.xlu1 %5336 }
 0xd1e   : > { %v5339_v14 = vmul.f32 0.03125, %v5337_v42  ;;  %v5334_v43 = vpop.xlane.xlu0 %5333  ;;  %v12059_v42 = vpack.c.bf16 %v10054_v13, %v10053_v25  ;;  %v10098_v25 = vld [vmem:[%s14453_s11 + $0x1b8] sm:$0xff]  ;;  %v10125_v13 = vld [vmem:[%s14454_s12 + $0x110] sm:$0xff] }
 0xd1f   : > { %v5338_v45 = vmul.f32 0.03125, %v5334_v43  ;;  %v10048_v43 = vld [vmem:[%s14452_s10 + $0x1a8] sm:$0xff] }
 0xd20   : > { %v5341_v7 = vsub.f32 %v13595_v27, %v5339_v14  ;;  %v10047_v14 = vld [vmem:[%s14452_s10 + $0x1a0] sm:$0xff] }
 0xd21   : > { %v5340_v21 = vsub.f32 %v13598_v40, %v5338_v45  ;;  %v10075_v45 = vld [vmem:[%s14453_s11 + $0x100] sm:$0xff] }
 0xd22   : > { %v5343_v15 = vmul.f32 %v5341_v7, %v5341_v7 }
 0xd23   : > { %v5342_v47 = vmul.f32 %v5340_v21, %v5340_v21 }
 0xd24   : > { %v5347_v32 = vsel %vm855_vm1, %v5343_v15, 0.0 }
 0xd25   : > { %5348 = vadd.xlane.f32.xlu1 %v5347_v32  ;;  %v5344_v48 = vsel %vm855_vm1, %v5342_v47, 0.0  ;;  %v10049_v47 = vld [vmem:[%s14452_s10 + $0x1b0] sm:$0xff]  ;;  %v10050_v32 = vld [vmem:[%s14452_s10 + $0x1b8] sm:$0xff] }
 0xd26   : > { %5345 = vadd.xlane.f32.xlu0 %v5344_v48  ;;  %v10077_v48 = vld [vmem:[%s14453_s11 + $0x110] sm:$0xff]  ;;  %v12051_v56 = vpack.c.bf16 %v10050_v32, %v10049_v47 }
 0xd27   : > { %v12075_v57 = vpack.c.bf16 %v10078_v52, %v10077_v48  ;;  %v10105_v32 = vld [vmem:[%s14453_s11 + $0x1f0] sm:$0xff]  ;;  %v10106_v48 = vld [vmem:[%s14453_s11 + $0x1f8] sm:$0xff] }
 0xd28   : > { %v10133_v52 = vld [vmem:[%s14454_s12 + $0x150] sm:$0xff]  ;;  %v12131_v36 = vpack.c.bf16 %v10106_v48, %v10105_v32 }
 0xdb2   : > { %v5349_v30 = vpop.xlane.xlu1 %5348 }
 0xdb3   : > { %v5351_v10 = vmul.f32 0.03125, %v5349_v30  ;;  %v5346_v62 = vpop.xlane.xlu0 %5345  ;;  %v10092_v30 = vld [vmem:[%s14453_s11 + $0x188] sm:$0xff] }
 0xdb4   : > { %v5350_v55 = vmul.f32 0.03125, %v5346_v62 }
 0xdb5   : > { %v5353_v59 = vadd.f32 1e-05, %v5351_v10 }
 0xdb6   : > { %v5352_v4 = vadd.f32 1e-05, %v5350_v55  ;;  %v10081_v55 = vld [vmem:[%s14453_s11 + $0x130] sm:$0xff] }
 0xdb7   : > { %12428 = vrsqrt.f32 %v5353_v59  ;;  %v10082_v59 = vld [vmem:[%s14453_s11 + $0x138] sm:$0xff] }
 0xdb8   : > { %12430 = vrsqrt.f32 %v5352_v4  ;;  %v10093_v4 = vld [vmem:[%s14453_s11 + $0x190] sm:$0xff] }
 0xdc1   : > { %v12429_v46 = vpop.eup %12428 }
 0xdc2   : > { %v12431_v63 = vpop.eup %12430  ;;  %v5357_v2 = vmul.f32 %v12429_v46, %v5341_v7  ;;  %v10076_v7 = vld [vmem:[%s14453_s11 + $0x108] sm:$0xff]  ;;  %v10094_v46 = vld [vmem:[%s14453_s11 + $0x198] sm:$0xff] }
 0xdc3   : > { %v5356_v61 = vmul.f32 %v12431_v63, %v5340_v21  ;;  %v12047_v21 = vpack.c.bf16 %v10048_v43, %v10047_v14  ;;  %v12071_v15 = vpack.c.bf16 %v10076_v7, %v10075_v45  ;;  %v10087_v63 = vld [vmem:[%s14453_s11 + $0x160] sm:$0xff]  ;;  %v10104_v43 = vld [vmem:[%s14453_s11 + $0x1e8] sm:$0xff] }
 0xdc4   : > { %v5365_v9 = vmul.f32 %v10025_v11, %v5357_v2  ;;  %v10088_v2 = vld [vmem:[%s14453_s11 + $0x168] sm:$0xff]  ;;  %v10103_v14 = vld [vmem:[%s14453_s11 + $0x1e0] sm:$0xff] }
 0xdc5   : > { %v5364_v17 = vmul.f32 %v10025_v11, %v5356_v61  ;;  %v12083_v11 = vpack.c.bf16 %v10082_v59, %v10081_v55  ;;  %v12107_v61 = vpack.c.bf16 %v10094_v46, %v10093_v4  ;;  %v10131_v7 = vld [vmem:[%s14454_s12 + $0x140] sm:$0xff]  ;;  %v10137_v59 = vld [vmem:[%s14454_s12 + $0x170] sm:$0xff]  ;;  %v10138_v4 = vld [vmem:[%s14454_s12 + $0x178] sm:$0xff] }
 0xdc6   : > { %v13664_v20 = vadd.f32 %v10026_v0, %v5365_v9  ;;  %v10100_v9 = vld [vmem:[%s14453_s11 + $0x1c8] sm:$0xff]  ;;  %v10149_v46 = vld [vmem:[%s14454_s12 + $0x1d0] sm:$0xff] }
 0xdc7   : > { %v13662_v51 = vadd.f32 %v10026_v0, %v5364_v17  ;;  %v10099_v0 = vld [vmem:[%s14453_s11 + $0x1c0] sm:$0xff]  ;;  %v12095_v17 = vpack.c.bf16 %v10088_v2, %v10087_v63  ;;  %v12163_v63 = vpack.c.bf16 %v10138_v4, %v10137_v59 }
 0xdc8   : > { %v12119_v18 = vpack.c.bf16 %v10100_v9, %v10099_v0  ;;  %v10143_v2 = vld [vmem:[%s14454_s12 + $0x1a0] sm:$0xff] }
 0xdc9   : > { %11257 = vmatprep.mubr.msk.f32.mxu0 %vm855_vm1, %v13662_v51  ;;  %11279 = vmatprep.mubr.msk.f32.mxu1 %vm855_vm1, %v13662_v51 }
 0xdca   : > { %11258 = vmatmul.mubr.msk.f32.vlgmr.msra.gmra.mrb[52].mxu0 %vm855_vm1, %v13664_v20  ;;  %11280 = vmatmul.mubr.msk.f32.vlgmr.msra.gmra.mrb[50].mxu1 %vm855_vm1, %v13664_v20 }
 0xdcb   : > { %12018 = vmatpush3.bf16.msra.mxu0 %v12015_v49  ;;  %12042 = vmatpush3.bf16.msra.mxu1 %v12039_v8  ;;  %v10080_v49 = vld [vmem:[%s14453_s11 + $0x128] sm:$0xff]  ;;  %v10091_v8 = vld [vmem:[%s14453_s11 + $0x180] sm:$0xff] }
 0xdcc   : > { %11268 = vmatprep.mubr.msk.f32.mxu0 %vm855_vm1, %v13662_v51  ;;  %11301 = vmatprep.mubr.msk.f32.mxu1 %vm855_vm1, %v13662_v51  ;;  %v12079_v10 = vpack.c.bf16 %v10080_v49, %v10079_v31  ;;  %v12103_v62 = vpack.c.bf16 %v10092_v30, %v10091_v8  ;;  %v12147_v31 = vpack.c.bf16 %v10130_v50, %v10129_v3  ;;  %v10135_v49 = vld [vmem:[%s14454_s12 + $0x160] sm:$0xff] }
 0xdcd   : > { %12020 = vmatprep.subr.bf16.mxu0 %v12019_v22  ;;  %12044 = vmatprep.subr.bf16.mxu1 %v12043_v23  ;;  %v10147_v30 = vld [vmem:[%s14454_s12 + $0x1c0] sm:$0xff] }
 0xdcf   : > { %12022 = vmatpush3.bf16.msra.mxu0 %v12019_v22  ;;  %12046 = vmatpush3.bf16.msra.mxu1 %v12043_v23  ;;  %v12099_v22 = vpack.c.bf16 %v10090_v12, %v10089_v5  ;;  %v10095_v23 = vld [vmem:[%s14453_s11 + $0x1a0] sm:$0xff] }
 0xdd0   : > { %12032 = vmatprep.subr.bf16.mxu0 %v12031_v34  ;;  %12056 = vmatprep.subr.bf16.mxu1 %v12055_v24  ;;  %v10151_v12 = vld [vmem:[%s14454_s12 + $0x1e0] sm:$0xff] }
 0xdd1   : > { %v12191_v54 = vpack.c.bf16 %v10152_v16, %v10151_v12 }
 0xdd2   : > { %11269 = vmatmul.mubr.msk.f32.vlgmr.msra.gmra.mrb[54].mxu0 %vm855_vm1, %v13664_v20  ;;  %11302 = vmatmul.mubr.msk.f32.vlgmr.msra.gmra.mrb[52].mxu1 %vm855_vm1, %v13664_v20 }
 0xdd3   : > { %12034 = vmatpush3.bf16.msra.mxu0 %v12031_v34  ;;  %11290 = vmatprep.mubr.msk.f32.mxu0 %vm855_vm1, %v13662_v51  ;;  %v10124_v34 = vld [vmem:[%s14454_s12 + $0x108] sm:$0xff] }
 0xdd4   : > { %12058 = vmatpush3.bf16.msra.mxu1 %v12055_v24  ;;  %11323 = vmatprep.mubr.msk.f32.mxu1 %vm855_vm1, %v13662_v51  ;;  %v12111_v24 = vpack.c.bf16 %v10096_v26, %v10095_v23  ;;  %v12135_v35 = vpack.c.bf16 %v10124_v34, %v10123_v29  ;;  %v10154_v23 = vld [vmem:[%s14454_s12 + $0x1f8] sm:$0xff] }
 0xdd5   : > { %12036 = vmatprep.subr.bf16.mxu0 %v12035_v41  ;;  %12060 = vmatprep.subr.bf16.mxu1 %v12059_v42 }
 0xdd7   : > { %12038 = vmatpush3.bf16.msra.mxu0 %v12035_v41  ;;  %v10126_v41 = vld [vmem:[%s14454_s12 + $0x118] sm:$0xff] }
 0xdd8   : > { %12062 = vmatpush3.bf16.msra.mxu1 %v12059_v42  ;;  %12048 = vmatprep.subr.bf16.mxu0 %v12047_v21  ;;  %v12115_v42 = vpack.c.bf16 %v10098_v25, %v10097_v38  ;;  %v12139_v45 = vpack.c.bf16 %v10126_v41, %v10125_v13 }
 0xdd9   : > { %12072 = vmatprep.subr.bf16.mxu1 %v12071_v15 }
 0xdda   : > { %11291 = vmatmul.mubr.msk.f32.vlgmr.msra.gmra.mrb[56].mxu0 %vm855_vm1, %v13664_v20 }
 0xddb   : > { %11324 = vmatmul.mubr.msk.f32.vlgmr.msra.gmra.mrb[54].mxu1 %vm855_vm1, %v13664_v20  ;;  %12050 = vmatpush3.bf16.msra.mxu0 %v12047_v21  ;;  %v10132_v21 = vld [vmem:[%s14454_s12 + $0x148] sm:$0xff] }
 0xddc   : > { %11312 = vmatprep.mubr.msk.f32.mxu0 %vm855_vm1, %v13662_v51  ;;  %12074 = vmatpush3.bf16.msra.mxu1 %v12071_v15  ;;  %v12127_v15 = vpack.c.bf16 %v10104_v43, %v10103_v14  ;;  %v12151_v47 = vpack.c.bf16 %v10132_v21, %v10131_v7 }
 0xddd   : > { %11345 = vmatprep.mubr.msk.f32.mxu1 %vm855_vm1, %v13662_v51  ;;  %12052 = vmatprep.subr.bf16.mxu0 %v12051_v56 }
 0xdde   : > { %12076 = vmatprep.subr.bf16.mxu1 %v12075_v57 }
 0xddf   : > { %12054 = vmatpush3.bf16.msra.mxu0 %v12051_v56  ;;  %v10134_v56 = vld [vmem:[%s14454_s12 + $0x158] sm:$0xff] }
 0xde0   : > { %12078 = vmatpush3.bf16.msra.mxu1 %v12075_v57  ;;  %12064 = vmatprep.subr.bf16.mxu0 %v12063_v39  ;;  %v10128_v57 = vld [vmem:[%s14454_s12 + $0x128] sm:$0xff]  ;;  %v12155_v58 = vpack.c.bf16 %v10134_v56, %v10133_v52 }
 0xde1   : > { %12088 = vmatprep.subr.bf16.mxu1 %v12087_v60 }
 0xde2   : > { %11313 = vmatmul.mubr.msk.f32.vlgmr.msra.gmra.mrb[58].mxu0 %vm855_vm1, %v13664_v20 }
 0xde3   : > { %11346 = vmatmul.mubr.msk.f32.vlgmr.msra.gmra.mrb[56].mxu1 %vm855_vm1, %v13664_v20  ;;  %12066 = vmatpush3.bf16.msra.mxu0 %v12063_v39  ;;  %v10140_v39 = vld [vmem:[%s14454_s12 + $0x188] sm:$0xff] }
 0xde4   : > { %11334 = vmatprep.mubr.msk.f32.mxu0 %vm855_vm1, %v13662_v51  ;;  %12090 = vmatpush3.bf16.msra.mxu1 %v12087_v60  ;;  %v12143_v60 = vpack.c.bf16 %v10128_v57, %v10127_v53  ;;  %v12167_v1 = vpack.c.bf16 %v10140_v39, %v10139_v37 }
 0xde5   : > { %11367 = vmatprep.mubr.msk.f32.mxu1 %vm855_vm1, %v13662_v51  ;;  %12068 = vmatprep.subr.bf16.mxu0 %v12067_v44 }
 0xde6   : > { %12092 = vmatprep.subr.bf16.mxu1 %v12091_v6 }
 0xde7   : > { %12070 = vmatpush3.bf16.msra.mxu0 %v12067_v44  ;;  %v10142_v44 = vld [vmem:[%s14454_s12 + $0x198] sm:$0xff] }
 0xde8   : > { %12094 = vmatpush3.bf16.msra.mxu1 %v12091_v6  ;;  %12080 = vmatprep.subr.bf16.mxu0 %v12079_v10  ;;  %v10136_v6 = vld [vmem:[%s14454_s12 + $0x168] sm:$0xff]  ;;  %v12171_v8 = vpack.c.bf16 %v10142_v44, %v10141_v33 }
 0xde9   : > { %12104 = vmatprep.subr.bf16.mxu1 %v12103_v62 }
 0xdea   : > { %11335 = vmatmul.mubr.msk.f32.vlgmr.msra.gmra.mrb[60].mxu0 %vm855_vm1, %v13664_v20 }
 0xdeb   : > { %11368 = vmatmul.mubr.msk.f32.vlgmr.msra.gmra.mrb[58].mxu1 %vm855_vm1, %v13664_v20  ;;  %12082 = vmatpush3.bf16.msra.mxu0 %v12079_v10  ;;  %v10148_v10 = vld [vmem:[%s14454_s12 + $0x1c8] sm:$0xff] }
 0xdec   : > { %11356 = vmatprep.mubr.msk.f32.mxu0 %vm855_vm1, %v13662_v51  ;;  %12106 = vmatpush3.bf16.msra.mxu1 %v12103_v62  ;;  %v12159_v62 = vpack.c.bf16 %v10136_v6, %v10135_v49  ;;  %v12183_v55 = vpack.c.bf16 %v10148_v10, %v10147_v30 }
 0xded   : > { %11389 = vmatprep.mubr.msk.f32.mxu1 %vm855_vm1, %v13662_v51  ;;  %12084 = vmatprep.subr.bf16.mxu0 %v12083_v11 }
 0xdee   : > { %12108 = vmatprep.subr.bf16.mxu1 %v12107_v61 }
 0xdef   : > { %12086 = vmatpush3.bf16.msra.mxu0 %v12083_v11  ;;  %v10150_v11 = vld [vmem:[%s14454_s12 + $0x1d8] sm:$0xff] }
 0xdf0   : > { %12110 = vmatpush3.bf16.msra.mxu1 %v12107_v61  ;;  %12096 = vmatprep.subr.bf16.mxu0 %v12095_v17  ;;  %v10144_v61 = vld [vmem:[%s14454_s12 + $0x1a8] sm:$0xff]  ;;  %v12187_v0 = vpack.c.bf16 %v10150_v11, %v10149_v46 }
 0xdf1   : > { %12120 = vmatprep.subr.bf16.mxu1 %v12119_v18  ;;  %v12175_v9 = vpack.c.bf16 %v10144_v61, %v10143_v2 }
 0xdf2   : > { %11357 = vmatmul.mubr.msk.f32.vlgmr.msra.gmra.mrb[62].mxu0 %vm855_vm1, %v13664_v20 }
 0xdf3   : > { %11390 = vmatmul.mubr.msk.f32.vlgmr.msra.gmra.mrb[60].mxu1 %vm855_vm1, %v13664_v20  ;;  %12098 = vmatpush3.bf16.msra.mxu0 %v12095_v17  ;;  %v10145_v17 = vld [vmem:[%s14454_s12 + $0x1b0] sm:$0xff] }
 0xdf4   : > { %11378 = vmatprep.mubr.msk.f32.mxu0 %vm855_vm1, %v13662_v51  ;;  %12122 = vmatpush3.bf16.msra.mxu1 %v12119_v18  ;;  %v10146_v18 = vld [vmem:[%s14454_s12 + $0x1b8] sm:$0xff] }
 0xdf5   : > { %11411 = vmatprep.mubr.msk.f32.mxu1 %vm855_vm1, %v13662_v51  ;;  %12100 = vmatprep.subr.bf16.mxu0 %v12099_v22  ;;  %v12179_v5 = vpack.c.bf16 %v10146_v18, %v10145_v17 }
 0xdf6   : > { %12124 = vmatprep.subr.bf16.mxu1 %v12123_v28 }
 0xdf7   : > { %12102 = vmatpush3.bf16.msra.mxu0 %v12099_v22  ;;  %v10153_v22 = vld [vmem:[%s14454_s12 + $0x1f0] sm:$0xff] }
 0xdf8   : > { %12126 = vmatpush3.bf16.msra.mxu1 %v12123_v28  ;;  %12112 = vmatprep.subr.bf16.mxu0 %v12111_v24  ;;  %v12195_v26 = vpack.c.bf16 %v10154_v23, %v10153_v22 }
 0xdf9   : > { %12136 = vmatprep.subr.bf16.mxu1 %v12135_v35 }
 0xdfa   : > { %11379 = vmatmul.mubr.msk.f32.vlgmr.msra.gmra.mrb[64].mxu0 %vm855_vm1, %v13664_v20 }
 0xdfb   : > { %11412 = vmatmul.mubr.msk.f32.vlgmr.msra.gmra.mrb[62].mxu1 %vm855_vm1, %v13664_v20  ;;  %12114 = vmatpush3.bf16.msra.mxu0 %v12111_v24 }
 0xdfc   : > { %11400 = vmatprep.mubr.msk.f32.mxu0 %vm855_vm1, %v13662_v51  ;;  %12138 = vmatpush3.bf16.msra.mxu1 %v12135_v35 }
 0xdfd   : > { %11433 = vmatprep.mubr.msk.f32.mxu1 %vm855_vm1, %v13662_v51  ;;  %12116 = vmatprep.subr.bf16.mxu0 %v12115_v42 }
 0xdfe   : > { %12140 = vmatprep.subr.bf16.mxu1 %v12139_v45 }
 0xdff   : > { %12118 = vmatpush3.bf16.msra.mxu0 %v12115_v42 }
 0xe00   : > { %12142 = vmatpush3.bf16.msra.mxu1 %v12139_v45  ;;  %12128 = vmatprep.subr.bf16.mxu0 %v12127_v15 }
 0xe01   : > { %12152 = vmatprep.subr.bf16.mxu1 %v12151_v47 }
 0xe02   : > { %11401 = vmatmul.mubr.msk.f32.vlgmr.msra.gmra.mrb[66].mxu0 %vm855_vm1, %v13664_v20 }
 0xe03   : > { %11434 = vmatmul.mubr.msk.f32.vlgmr.msra.gmra.mrb[64].mxu1 %vm855_vm1, %v13664_v20  ;;  %12130 = vmatpush3.bf16.msra.mxu0 %v12127_v15 }
 0xe04   : > { %11422 = vmatprep.mubr.msk.f32.mxu0 %vm855_vm1, %v13662_v51  ;;  %12154 = vmatpush3.bf16.msra.mxu1 %v12151_v47 }
 0xe05   : > { %11455 = vmatprep.mubr.msk.f32.mxu1 %vm855_vm1, %v13662_v51  ;;  %12132 = vmatprep.subr.bf16.mxu0 %v12131_v36 }
 0xe06   : > { %12156 = vmatprep.subr.bf16.mxu1 %v12155_v58 }
 0xe07   : > { %12134 = vmatpush3.bf16.msra.mxu0 %v12131_v36 }
 0xe08   : > { %12158 = vmatpush3.bf16.msra.mxu1 %v12155_v58  ;;  %12144 = vmatprep.subr.bf16.mxu0 %v12143_v60 }
 0xe09   : > { %12168 = vmatprep.subr.bf16.mxu1 %v12167_v1 }
 0xe0a   : > { %11423 = vmatmul.mubr.msk.f32.vlgmr.msra.gmra.mrb[68].mxu0 %vm855_vm1, %v13664_v20 }
 0xe0b   : > { %11456 = vmatmul.mubr.msk.f32.vlgmr.msra.gmra.mrb[66].mxu1 %vm855_vm1, %v13664_v20  ;;  %12146 = vmatpush3.bf16.msra.mxu0 %v12143_v60 }
 0xe0c   : > { %11444 = vmatprep.mubr.msk.f32.mxu0 %vm855_vm1, %v13662_v51  ;;  %12170 = vmatpush3.bf16.msra.mxu1 %v12167_v1 }
 0xe0d   : > { %11477 = vmatprep.mubr.msk.f32.mxu1 %vm855_vm1, %v13662_v51  ;;  %12148 = vmatprep.subr.bf16.mxu0 %v12147_v31 }
 0xe0e   : > { %12172 = vmatprep.subr.bf16.mxu1 %v12171_v8 }
 0xe0f   : > { %12150 = vmatpush3.bf16.msra.mxu0 %v12147_v31 }
 0xe10   : > { %12174 = vmatpush3.bf16.msra.mxu1 %v12171_v8  ;;  %12160 = vmatprep.subr.bf16.mxu0 %v12159_v62 }
 0xe11   : > { %12184 = vmatprep.subr.bf16.mxu1 %v12183_v55 }
 0xe12   : > { %11445 = vmatmul.mubr.msk.f32.vlgmr.msra.gmra.mrb[70].mxu0 %vm855_vm1, %v13664_v20 }
 0xe13   : > { %11478 = vmatmul.mubr.msk.f32.vlgmr.msra.gmra.mrb[68].mxu1 %vm855_vm1, %v13664_v20  ;;  %12162 = vmatpush3.bf16.msra.mxu0 %v12159_v62 }
 0xe14   : > { %11466 = vmatprep.mubr.msk.f32.mxu0 %vm855_vm1, %v13662_v51  ;;  %12186 = vmatpush3.bf16.msra.mxu1 %v12183_v55 }
 0xe15   : > { %11499 = vmatprep.mubr.msk.f32.mxu1 %vm855_vm1, %v13662_v51  ;;  %12164 = vmatprep.subr.bf16.mxu0 %v12163_v63 }
 0xe16   : > { %12188 = vmatprep.subr.bf16.mxu1 %v12187_v0 }
 0xe17   : > { %12166 = vmatpush3.bf16.msra.mxu0 %v12163_v63 }
 0xe18   : > { %12190 = vmatpush3.bf16.msra.mxu1 %v12187_v0  ;;  %12176 = vmatprep.subr.bf16.mxu0 %v12175_v9 }
 0xe1a   : > { %11467 = vmatmul.mubr.msk.f32.vlgmr.msra.gmra.mrb[72].mxu0 %vm855_vm1, %v13664_v20 }
 0xe1b   : > { %11500 = vmatmul.mubr.msk.f32.vlgmr.msra.gmra.mrb[70].mxu1 %vm855_vm1, %v13664_v20  ;;  %12178 = vmatpush3.bf16.msra.mxu0 %v12175_v9 }
 0xe1c   : > { %11488 = vmatprep.mubr.msk.f32.mxu0 %vm855_vm1, %v13662_v51  ;;  %12180 = vmatprep.subr.bf16.mxu0 %v12179_v5 }
 0xe1f   : > { %12182 = vmatpush3.bf16.msra.mxu0 %v12179_v5 }
 0xe20   : > { %12192 = vmatprep.subr.bf16.mxu0 %v12191_v54 }
 0xe22   : > { %11489 = vmatmul.mubr.msk.f32.vlgmr.msra.gmra.mrb[74].mxu0 %vm855_vm1, %v13664_v20 }
 0xe23   : > { %12194 = vmatpush3.bf16.msra.mxu0 %v12191_v54  ;;  %11510 = vmatprep.mubr.msk.f32.mxu0 %vm855_vm1, %v13662_v51 }
 0xe24   : > { %12196 = vmatprep.subr.bf16.mxu0 %v12195_v26 }
 0xe27   : > { %12198 = vmatpush3.bf16.msra.mxu0 %v12195_v26 }
 0xe2a   : > { %11511 = vmatmul.mubr.msk.f32.vlgmr.msra.gmra.mrb[76].mxu0 %vm855_vm1, %v13664_v20 }
 0xe9d   : > { %v11259_v28 = vpop.f32.mrb[52].mxu0  ;;  %v11281_v29 = vpop.f32.mrb[50].mxu1 }
 0xe9e   : > { %v5479_v34 = vpop.f32.mrb[53].mxu0  ;;  %v5629_v24 = vpop.f32.mrb[51].mxu1 }
 0xe9f   : > { %11517 = vmatprep.mubr.msk.f32.mxu1 %vm2849_vm2, %v5479_v34 }
 0xea5   : > { %v11270_v35 = vpop.f32.mrb[54].mxu0  ;;  %v11303_v38 = vpop.f32.mrb[52].mxu1 }
 0xea6   : > { %v5554_v25 = vpop.f32.mrb[55].mxu0  ;;  %v5779_v13 = vpop.f32.mrb[53].mxu1 }
 0xea7   : > { %11524 = vmatprep.mubr.msk.f32.mxu0 %vm2849_vm2, %v5554_v25 }
 0xead   : > { %v11292_v41 = vpop.f32.mrb[56].mxu0 }
 0xeae   : > { %v11325_v42 = vpop.f32.mrb[54].mxu1  ;;  %v5704_v51 = vpop.f32.mrb[57].mxu0 }
 0xeaf   : > { %v5929_v14 = vpop.f32.mrb[55].mxu1 }
 0xeb5   : > { %v11314_v43 = vpop.f32.mrb[58].mxu0 }
 0xeb6   : > { %v11347_v45 = vpop.f32.mrb[56].mxu1  ;;  %v5854_v7 = vpop.f32.mrb[59].mxu0 }
 0xeb7   : > { %v6112_v20 = vpop.f32.mrb[57].mxu1 }
 0xeb8   : > { %v12199_v21 = vpack.c.bf16 %v11347_v45, %v6112_v20 }
 0xeba   : > { %12201 = vmatprep.subr.msk.bf16.mxu1 %vm13215_vm3, %v12199_v21 }
 0xebb   : > { %12204 = vmatpush3.bf16.xpose.msk.msra.mxu1 %vm13215_vm3, %v12199_v21 }
 0xebd   : > { %v14008_v15 = vpop.f32.mrb[60].mxu0 }
 0xebe   : > { %v11369_v47 = vpop.f32.mrb[58].mxu1  ;;  %v6004_v32 = vpop.f32.mrb[61].mxu0 }
 0xebf   : > { %v6262_v48 = vpop.f32.mrb[59].mxu1 }
 0xec0   : > { %v12211_v52 = vpack.c.bf16 %v11369_v47, %v6262_v48 }
 0xec2   : > { %11518 = vmatmul.mubr.msk.f32.vlgmr.msra.gmra.mrb[72].mxu1 %vm2849_vm2, %v11259_v28  ;;  %12213 = vmatprep.subr.msk.bf16.mxu1 %vm13215_vm3, %v12211_v52 }
 0xec3   : > { %12216 = vmatpush3.bf16.xpose.msk.msra.mxu1 %vm13215_vm3, %v12211_v52  ;;  %11531 = vmatprep.mubr.msk.f32.mxu1 %vm2849_vm2, %v5629_v24 }
 0xec5   : > { %v11358_v56 = vpop.f32.mrb[62].mxu0 }
 0xec6   : > { %v11391_v36 = vpop.f32.mrb[60].mxu1  ;;  %v6187_v53 = vpop.f32.mrb[63].mxu0 }
 0xec7   : > { %v12205_v57 = vpack.c.bf16 %v11358_v56, %v6187_v53  ;;  %v6412_v58 = vpop.f32.mrb[61].mxu1 }
 0xec8   : > { %v12223_v37 = vpack.c.bf16 %v11391_v36, %v6412_v58 }
 0xec9   : > { %12207 = vmatprep.subr.msk.bf16.mxu0 %vm13215_vm3, %v12205_v57 }
 0xeca   : > { %11532 = vmatmul.mubr.msk.f32.vlgmr.msra.gmra.mrb[74].mxu1 %vm2849_vm2, %v11281_v29  ;;  %12225 = vmatprep.subr.msk.bf16.mxu1 %vm13215_vm3, %v12223_v37 }
 0xecb   : > { %12210 = vmatpush3.bf16.xpose.msk.msra.mxu0 %vm13215_vm3, %v12205_v57  ;;  %12228 = vmatpush3.bf16.xpose.msk.msra.mxu1 %vm13215_vm3, %v12223_v37 }
 0xecc   : > { %11545 = vmatprep.mubr.msk.f32.mxu1 %vm2849_vm2, %v5779_v13 }
 0xecd   : > { %v11380_v39 = vpop.f32.mrb[64].mxu0 }
 0xece   : > { %v11413_v60 = vpop.f32.mrb[62].mxu1  ;;  %v6337_v1 = vpop.f32.mrb[65].mxu0 }
 0xecf   : > { %v12217_v3 = vpack.c.bf16 %v11380_v39, %v6337_v1  ;;  %v6562_v50 = vpop.f32.mrb[63].mxu1 }
 0xed0   : > { %v12235_v33 = vpack.c.bf16 %v11413_v60, %v6562_v50 }
 0xed1   : > { %12219 = vmatprep.subr.msk.bf16.mxu0 %vm13215_vm3, %v12217_v3 }
 0xed2   : > { %11525 = vmatmul.mubr.msk.f32.vlgmr.msra.gmra.mrb[78].mxu0 %vm2849_vm2, %v11270_v35  ;;  %11546 = vmatmul.mubr.msk.f32.vlgmr.msra.gmra.mrb[76].mxu1 %vm2849_vm2, %v11303_v38 }
 0xed3   : > { %12237 = vmatprep.subr.msk.bf16.mxu1 %vm13215_vm3, %v12235_v33  ;;  %12222 = vmatpush3.bf16.xpose.msk.msra.mxu0 %vm13215_vm3, %v12217_v3 }
 0xed4   : > { %11538 = vmatprep.mubr.msk.f32.mxu0 %vm2849_vm2, %v5704_v51  ;;  %12240 = vmatpush3.bf16.xpose.msk.msra.mxu1 %vm13215_vm3, %v12235_v33 }
 0xed5   : > { %11559 = vmatprep.mubr.msk.f32.mxu1 %vm2849_vm2, %v5929_v14  ;;  %v11402_v44 = vpop.f32.mrb[66].mxu0 }
 0xed6   : > { %v11435_v31 = vpop.f32.mrb[64].mxu1  ;;  %v6487_v49 = vpop.f32.mrb[67].mxu0 }
 0xed7   : > { %v12229_v6 = vpack.c.bf16 %v11402_v44, %v6487_v49  ;;  %v6745_v8 = vpop.f32.mrb[65].mxu1 }
 0xed8   : > { %v12247_v30 = vpack.c.bf16 %v11435_v31, %v6745_v8 }
 0xed9   : > { %12231 = vmatprep.subr.msk.bf16.mxu0 %vm13215_vm3, %v12229_v6 }
 0xeda   : > { %11539 = vmatmul.mubr.msk.f32.vlgmr.msra.gmra.mrb[80].mxu0 %vm2849_vm2, %v11292_v41  ;;  %12248 = vmatprep.subr.bf16.mxu1 %v12247_v30 }
 0xedb   : > { %11560 = vmatmul.mubr.msk.f32.vlgmr.msra.gmra.mrb[78].mxu1 %vm2849_vm2, %v11325_v42  ;;  %12234 = vmatpush3.bf16.xpose.msk.msra.mxu0 %vm13215_vm3, %v12229_v6 }
 0xedc   : > { %11552 = vmatprep.mubr.msk.f32.mxu0 %vm2849_vm2, %v5854_v7  ;;  %12250 = vmatpush3.bf16.msra.mxu1 %v12247_v30 }
 0xedd   : > { %v11424_v10 = vpop.f32.mrb[68].mxu0 }
 0xede   : > { %v11457_v62 = vpop.f32.mrb[66].mxu1  ;;  %v6637_v55 = vpop.f32.mrb[69].mxu0 }
 0xedf   : > { %v12241_v59 = vpack.c.bf16 %v11424_v10, %v6637_v55  ;;  %v6895_v4 = vpop.f32.mrb[67].mxu1 }
 0xee0   : > { %v12255_v46 = vpack.c.bf16 %v11457_v62, %v6895_v4 }
 0xee1   : > { %12243 = vmatprep.subr.msk.bf16.mxu0 %vm13215_vm3, %v12241_v59 }
 0xee2   : > { %11553 = vmatmul.mubr.msk.f32.vlgmr.msra.gmra.mrb[82].mxu0 %vm2849_vm2, %v11314_v43 }
 0xee3   : > { %12246 = vmatpush3.bf16.xpose.msk.msra.mxu0 %vm13215_vm3, %v12241_v59  ;;  %11566 = vmatprep.mubr.msk.f32.mxu0 %vm2849_vm2, %v6004_v32 }
 0xee4   : > { %12256 = vmatprep.subr.bf16.mxu0 %v12255_v46 }
 0xee5   : > { %v11446_v11 = vpop.f32.mrb[70].mxu0 }
 0xee6   : > { %v11479_v63 = vpop.f32.mrb[68].mxu1  ;;  %v6820_v2 = vpop.f32.mrb[71].mxu0 }
 0xee7   : > { %v14051_v61 = vpack.c.bf16 %v11446_v11, %v6820_v2  ;;  %v7045_v0 = vpop.f32.mrb[69].mxu1 }
 0xee8   : > { %v14053_v9 = vpack.c.bf16 %v11479_v63, %v7045_v0 }
 0xee9   : > { %12252 = vmatprep.subr.bf16.mxu1 %v14051_v61 }
 0xeea   : > { %11567 = vmatmul.mubr.msk.f32.vlgmr.msra.gmra.mrb[84].mxu0 %vm2849_vm2, %v14008_v15 }
 0xeeb   : > { %12258 = vmatpush3.bf16.msra.mxu0 %v12255_v46 }
 0xeec   : > { %12264 = vmatprep.subr.bf16.mxu0 %v14053_v9 }
 0xeed   : > { %v11468_v19 = vpop.f32.mrb[72].mxu0 }
 0xeee   : > { %v11501_v17 = vpop.f32.mrb[70].mxu1  ;;  %v6970_v18 = vpop.f32.mrb[73].mxu0 }
 0xeef   : > { %v14059_v5 = vpack.c.bf16 %v11468_v19, %v6970_v18  ;;  %v7195_v12 = vpop.f32.mrb[71].mxu1 }
 0xef0   : > { %v14061_v16 = vpack.c.bf16 %v11501_v17, %v7195_v12 }
 0xef5   : > { %v11490_v54 = vpop.f32.mrb[74].mxu0 }
 0xef6   : > { %v7120_v22 = vpop.f32.mrb[75].mxu0 }
 0xef7   : > { %v14063_v23 = vpack.c.bf16 %v11490_v54, %v7120_v22 }
 0xefd   : > { %v11512_v26 = vpop.f32.mrb[76].mxu0 }
 0xefe   : > { %v7270_v28 = vpop.f32.mrb[77].mxu0 }
 0xeff   : > { %v14065_v29 = vpack.c.bf16 %v11512_v26, %v7270_v28 }
 0xf95   : > { %v11519_v34 = vpop.f32.mrb[72].mxu1 }
 0xf96   : > { %v14067_v24 = vmul.f32 0.35355338, %v11519_v34  ;;  %v7357_v35 = vpop.f32.mrb[73].mxu1 }
 0xf97   : > { %v14069_v38 = vmul.f32 0.35355338, %v7357_v35 }
 0xf98   : > { %v7994_v25 = vsel %vm3562_vm4, %v14067_v24, -inf }
 0xf99   : > { %7995 = vmax.xlane.f32.xlu1 %v7994_v25  ;;  %v7991_v13 = vsel %vm3562_vm4, %v14069_v38, -inf }
 0xf9a   : > { %7992 = vmax.xlane.f32.xlu0 %v7991_v13 }
 0xf9d   : > { %v11533_v41 = vpop.f32.mrb[74].mxu1 }
 0xf9e   : > { %v14075_v42 = vmul.f32 0.35355338, %v11533_v41  ;;  %v7531_v51 = vpop.f32.mrb[75].mxu1 }
 0xf9f   : > { %v14077_v14 = vmul.f32 0.35355338, %v7531_v51 }
 0xfa0   : > { %v8006_v43 = vsel %vm3562_vm4, %v14075_v42, -inf }
 0xfa1   : > { %8007 = vmax.xlane.f32.xlu1 %v8006_v43  ;;  %v8003_v45 = vsel %vm3562_vm4, %v14077_v14, -inf }
 0xfa2   : > { %8004 = vmax.xlane.f32.xlu0 %v8003_v45 }
 0xfa5   : > { %v11526_v7 = vpop.f32.mrb[78].mxu0  ;;  %v11547_v20 = vpop.f32.mrb[76].mxu1 }
 0xfa6   : > { %v14083_v21 = vmul.f32 0.35355338, %v11526_v7  ;;  %v7444_v15 = vpop.f32.mrb[79].mxu0  ;;  %v7705_v47 = vpop.f32.mrb[77].mxu1  ;;  %v14087_v48 = vmul.f32 0.35355338, %v11547_v20 }
 0xfa7   : > { %v14085_v32 = vmul.f32 0.35355338, %v7444_v15  ;;  %v14091_v56 = vmul.f32 0.35355338, %v7705_v47 }
 0xfa8   : > { %v8000_v52 = vsel %vm3562_vm4, %v14083_v21, -inf  ;;  %v8018_v53 = vsel %vm3562_vm4, %v14087_v48, -inf }
 0xfa9   : > { %8001 = vmax.xlane.f32.xlu1 %v8000_v52  ;;  %v7997_v36 = vsel %vm3562_vm4, %v14085_v32, -inf  ;;  %v8015_v58 = vsel %vm3562_vm4, %v14091_v56, -inf }
 0xfaa   : > { %7998 = vmax.xlane.f32.xlu0 %v7997_v36 }
 0xfad   : > { %8019 = vmax.xlane.f32.xlu1 %v8018_v53  ;;  %v11540_v57 = vpop.f32.mrb[80].mxu0 }
 0xfae   : > { %v11561_v37 = vpop.f32.mrb[78].mxu1  ;;  %v14099_v39 = vmul.f32 0.35355338, %v11540_v57  ;;  %8016 = vmax.xlane.f32.xlu0 %v8015_v58  ;;  %v7618_v60 = vpop.f32.mrb[81].mxu0 }
 0xfaf   : > { %v7879_v1 = vpop.f32.mrb[79].mxu1  ;;  %v14101_v3 = vmul.f32 0.35355338, %v7618_v60  ;;  %v14103_v50 = vmul.f32 0.35355338, %v11561_v37 }
 0xfb0   : > { %v8012_v33 = vsel %vm3562_vm4, %v14099_v39, -inf  ;;  %v14107_v44 = vmul.f32 0.35355338, %v7879_v1 }
 0xfb1   : > { %8013 = vmax.xlane.f32.xlu1 %v8012_v33  ;;  %v8009_v31 = vsel %vm3562_vm4, %v14101_v3, -inf  ;;  %v8030_v49 = vsel %vm3562_vm4, %v14103_v50, -inf }
 0xfb2   : > { %8010 = vmax.xlane.f32.xlu0 %v8009_v31  ;;  %v8027_v8 = vsel %vm3562_vm4, %v14107_v44, -inf }
 0xfb5   : > { %8031 = vmax.xlane.f32.xlu1 %v8030_v49  ;;  %v11554_v6 = vpop.f32.mrb[82].mxu0 }
 0xfb6   : > { %v14115_v30 = vmul.f32 0.35355338, %v11554_v6  ;;  %8028 = vmax.xlane.f32.xlu0 %v8027_v8  ;;  %v7792_v10 = vpop.f32.mrb[83].mxu0 }
 0xfb7   : > { %v14117_v62 = vmul.f32 0.35355338, %v7792_v10 }
 0xfb8   : > { %v8024_v55 = vsel %vm3562_vm4, %v14115_v30, -inf }
 0xfb9   : > { %8025 = vmax.xlane.f32.xlu1 %v8024_v55  ;;  %v8021_v59 = vsel %vm3562_vm4, %v14117_v62, -inf }
 0xfba   : > { %8022 = vmax.xlane.f32.xlu0 %v8021_v59 }
 0xfbd   : > { %v11568_v4 = vpop.f32.mrb[84].mxu0 }
 0xfbe   : > { %v14123_v46 = vmul.f32 0.35355338, %v11568_v4  ;;  %v7966_v11 = vpop.f32.mrb[85].mxu0 }
 0xfbf   : > { %v14125_v63 = vmul.f32 0.35355338, %v7966_v11 }
 0xfc0   : > { %v8036_v2 = vsel %vm3562_vm4, %v14123_v46, -inf }
 0xfc1   : > { %8037 = vmax.xlane.f32.xlu1 %v8036_v2  ;;  %v8033_v0 = vsel %vm3562_vm4, %v14125_v63, -inf }
 0xfc2   : > { %8034 = vmax.xlane.f32.xlu0 %v8033_v0 }
0x1026   : > { %v7996_v19 = vpop.xlane.xlu1 %7995 }
0x1027   : > { %v8040_v17 = vsub.f32 %v14067_v24, %v7996_v19  ;;  %v7993_v18 = vpop.xlane.xlu0 %7992 }
0x1028   : > { %v8039_v12 = vsub.f32 %v14069_v38, %v7993_v18 }
0x1029   : > { %v8057_v54 = vmul.f32 1.442695, %v8040_v17 }
0x102a   : > { %v8055_v22 = vmul.f32 1.442695, %v8039_v12 }
0x102b   : > { %12432 = vpow2.f32 %v8057_v54 }
0x102c   : > { %12434 = vpow2.f32 %v8055_v22 }
0x102e   : > { %v8008_v26 = vpop.xlane.xlu1 %8007 }
0x102f   : > { %v8044_v28 = vsub.f32 %v14075_v42, %v8008_v26  ;;  %v8005_v34 = vpop.xlane.xlu0 %8004 }
0x1030   : > { %v8043_v35 = vsub.f32 %v14077_v14, %v8005_v34 }
0x1031   : > { %v8065_v25 = vmul.f32 1.442695, %v8044_v28 }
0x1032   : > { %v8063_v13 = vmul.f32 1.442695, %v8043_v35 }
0x1033   : > { %12436 = vpow2.f32 %v8065_v25 }
0x1034   : > { %12438 = vpow2.f32 %v8063_v13 }
0x1035   : > { %v14135_v41 = vpop.eup %12432 }
0x1036   : > { %v14137_v24 = vpop.eup %12434  ;;  %v8002_v51 = vpop.xlane.xlu1 %8001  ;;  %v8090_v38 = vsel %vm3562_vm4, %v14135_v41, 0.0 }
0x1037   : > { %v8042_v43 = vsub.f32 %v14083_v21, %v8002_v51  ;;  %v7999_v45 = vpop.xlane.xlu0 %7998  ;;  %8091 = vadd.xlane.f32.xlu1 %v8090_v38  ;;  %v8087_v42 = vsel %vm3562_vm4, %v14137_v24, 0.0 }
0x1038   : > { %v8041_v14 = vsub.f32 %v14085_v32, %v7999_v45  ;;  %8088 = vadd.xlane.f32.xlu0 %v8087_v42 }
0x1039   : > { %v8061_v7 = vmul.f32 1.442695, %v8042_v43 }
0x103a   : > { %v8059_v20 = vmul.f32 1.442695, %v8041_v14  ;;  %v8020_v15 = vpop.xlane.xlu1 %8019 }
0x103b   : > { %12440 = vpow2.f32 %v8061_v7  ;;  %v8048_v47 = vsub.f32 %v14087_v48, %v8020_v15  ;;  %v8017_v52 = vpop.xlane.xlu0 %8016 }
0x103c   : > { %12442 = vpow2.f32 %v8059_v20  ;;  %v8047_v36 = vsub.f32 %v14091_v56, %v8017_v52 }
0x103d   : > { %v14147_v53 = vpop.eup %12436  ;;  %v8073_v21 = vmul.f32 1.442695, %v8048_v47 }
0x103e   : > { %v14149_v57 = vpop.eup %12438  ;;  %v8071_v58 = vmul.f32 1.442695, %v8047_v36  ;;  %v8014_v37 = vpop.xlane.xlu1 %8013  ;;  %v8102_v32 = vsel %vm3562_vm4, %v14147_v53, 0.0 }
0x103f   : > { %12444 = vpow2.f32 %v8073_v21  ;;  %v8046_v60 = vsub.f32 %v14099_v39, %v8014_v37  ;;  %v8011_v1 = vpop.xlane.xlu0 %8010  ;;  %8103 = vadd.xlane.f32.xlu1 %v8102_v32  ;;  %v8099_v48 = vsel %vm3562_vm4, %v14149_v57, 0.0 }
0x1040   : > { %12446 = vpow2.f32 %v8071_v58  ;;  %v8045_v56 = vsub.f32 %v14101_v3, %v8011_v1  ;;  %8100 = vadd.xlane.f32.xlu0 %v8099_v48 }
0x1041   : > { %v8069_v33 = vmul.f32 1.442695, %v8046_v60 }
0x1042   : > { %v8067_v31 = vmul.f32 1.442695, %v8045_v56  ;;  %v8032_v49 = vpop.xlane.xlu1 %8031 }
0x1043   : > { %12448 = vpow2.f32 %v8069_v33  ;;  %v8052_v6 = vsub.f32 %v14103_v50, %v8032_v49  ;;  %v8029_v8 = vpop.xlane.xlu0 %8028 }
0x1044   : > { %12450 = vpow2.f32 %v8067_v31  ;;  %v8051_v10 = vsub.f32 %v14107_v44, %v8029_v8 }
0x1045   : > { %v14159_v39 = vpop.eup %12440  ;;  %v8081_v55 = vmul.f32 1.442695, %v8052_v6 }
0x1046   : > { %v14161_v59 = vpop.eup %12442  ;;  %v8079_v4 = vmul.f32 1.442695, %v8051_v10  ;;  %v8026_v11 = vpop.xlane.xlu1 %8025  ;;  %v8096_v3 = vsel %vm3562_vm4, %v14159_v39, 0.0 }
0x1047   : > { %12452 = vpow2.f32 %v8081_v55  ;;  %v8050_v2 = vsub.f32 %v14115_v30, %v8026_v11  ;;  %v8023_v0 = vpop.xlane.xlu0 %8022  ;;  %8097 = vadd.xlane.f32.xlu1 %v8096_v3  ;;  %v8093_v50 = vsel %vm3562_vm4, %v14161_v59, 0.0 }
0x1048   : > { %12454 = vpow2.f32 %v8079_v4  ;;  %v8049_v44 = vsub.f32 %v14117_v62, %v8023_v0  ;;  %8094 = vadd.xlane.f32.xlu0 %v8093_v50 }
0x1049   : > { %v14169_v19 = vpop.eup %12444  ;;  %v8077_v17 = vmul.f32 1.442695, %v8050_v2 }
0x104a   : > { %v14171_v18 = vpop.eup %12446  ;;  %v8075_v12 = vmul.f32 1.442695, %v8049_v44  ;;  %v8114_v54 = vsel %vm3562_vm4, %v14169_v19, 0.0 }
0x104b   : > { %12456 = vpow2.f32 %v8077_v17  ;;  %8115 = vadd.xlane.f32.xlu1 %v8114_v54  ;;  %v8111_v30 = vsel %vm3562_vm4, %v14171_v18, 0.0 }
0x104c   : > { %12458 = vpow2.f32 %v8075_v12  ;;  %8112 = vadd.xlane.f32.xlu0 %v8111_v30 }
0x104d   : > { %v14177_v22 = vpop.eup %12448 }
0x104e   : > { %v14179_v62 = vpop.eup %12450  ;;  %v8038_v26 = vpop.xlane.xlu1 %8037  ;;  %v8108_v28 = vsel %vm3562_vm4, %v14177_v22, 0.0 }
0x104f   : > { %v8054_v34 = vsub.f32 %v14123_v46, %v8038_v26  ;;  %8109 = vadd.xlane.f32.xlu1 %v8108_v28  ;;  %v8035_v35 = vpop.xlane.xlu0 %8034  ;;  %v8105_v25 = vsel %vm3562_vm4, %v14179_v62, 0.0 }
0x1050   : > { %v8053_v13 = vsub.f32 %v14125_v63, %v8035_v35  ;;  %8106 = vadd.xlane.f32.xlu0 %v8105_v25 }
0x1051   : > { %v14187_v51 = vpop.eup %12452  ;;  %v8085_v38 = vmul.f32 1.442695, %v8054_v34 }
0x1052   : > { %v14189_v43 = vpop.eup %12454  ;;  %v8083_v45 = vmul.f32 1.442695, %v8053_v13  ;;  %v8126_v42 = vsel %vm3562_vm4, %v14187_v51, 0.0 }
0x1053   : > { %12460 = vpow2.f32 %v8085_v38  ;;  %8127 = vadd.xlane.f32.xlu1 %v8126_v42  ;;  %v8123_v46 = vsel %vm3562_vm4, %v14189_v43, 0.0  ;;  %v10219_v38 = vld [vmem:[%s14455_s13 + $0x40] sm:$0xff] }
0x1054   : > { %12462 = vpow2.f32 %v8083_v45  ;;  %8124 = vadd.xlane.f32.xlu0 %v8123_v46  ;;  %v10222_v45 = vld [vmem:[%s14455_s13 + $0x58] sm:$0xff] }
0x1055   : > { %v14195_v14 = vpop.eup %12456 }
0x1056   : > { %v14197_v63 = vpop.eup %12458  ;;  %v8120_v7 = vsel %vm3562_vm4, %v14195_v14, 0.0 }
0x1057   : > { %8121 = vadd.xlane.f32.xlu1 %v8120_v7  ;;  %v8117_v20 = vsel %vm3562_vm4, %v14197_v63, 0.0 }
0x1058   : > { %8118 = vadd.xlane.f32.xlu0 %v8117_v20  ;;  %v10225_v20 = vld [vmem:[%s14455_s13 + $0x70] sm:$0xff] }
0x105d   : > { %v14203_v15 = vpop.eup %12460 }
0x105e   : > { %v14205_v47 = vpop.eup %12462  ;;  %v8132_v52 = vsel %vm3562_vm4, %v14203_v15, 0.0 }
0x105f   : > { %8133 = vadd.xlane.f32.xlu1 %v8132_v52  ;;  %v8129_v36 = vsel %vm3562_vm4, %v14205_v47, 0.0  ;;  %v10224_v52 = vld [vmem:[%s14455_s13 + $0x68] sm:$0xff] }
0x1060   : > { %8130 = vadd.xlane.f32.xlu0 %v8129_v36 }
0x10c4   : > { %v8092_v21 = vpop.xlane.xlu1 %8091 }
0x10c5   : > { %12464 = vrcp.f32 %v8092_v21  ;;  %v8089_v58 = vpop.xlane.xlu0 %8088 }
0x10c6   : > { %12466 = vrcp.f32 %v8089_v58 }
0x10cc   : > { %v8104_v37 = vpop.xlane.xlu1 %8103 }
0x10cd   : > { %12468 = vrcp.f32 %v8104_v37  ;;  %v8101_v32 = vpop.xlane.xlu0 %8100 }
0x10ce   : > { %12470 = vrcp.f32 %v8101_v32  ;;  %v10226_v32 = vld [vmem:[%s14455_s13 + $0x78] sm:$0xff] }
0x10cf   : > { %v12465_v60 = vpop.eup %12464 }
0x10d0   : > { %v12467_v1 = vpop.eup %12466  ;;  %v8152_v56 = vmul.f32 %v12465_v60, %v14135_v41 }
0x10d1   : > { %v8151_v48 = vmul.f32 %v12467_v1, %v14137_v24 }
0x10d3   : > { %11573 = vmatprep.mubr.msk.f32.mxu1 %vm3562_vm4, %v8151_v48 }
0x10d4   : > { %v8098_v33 = vpop.xlane.xlu1 %8097  ;;  %11574 = vmatmul.mubr.msk.f32.vlgmr.msra.gmra.mrb[80].mxu1 %vm3562_vm4, %v8152_v56 }
0x10d5   : > { %12472 = vrcp.f32 %v8098_v33  ;;  %12254 = vmatpush3.bf16.msra.mxu1 %v14051_v61  ;;  %v8095_v31 = vpop.xlane.xlu0 %8094 }
0x10d6   : > { %12260 = vmatprep.subr.bf16.mxu1 %v14059_v5  ;;  %12474 = vrcp.f32 %v8095_v31 }
0x10d7   : > { %v12469_v49 = vpop.eup %12468 }
0x10d8   : > { %v12471_v6 = vpop.eup %12470  ;;  %v8116_v8 = vpop.xlane.xlu1 %8115  ;;  %v8156_v41 = vmul.f32 %v12469_v49, %v14147_v53 }
0x10d9   : > { %12476 = vrcp.f32 %v8116_v8  ;;  %v8113_v10 = vpop.xlane.xlu0 %8112  ;;  %v8155_v24 = vmul.f32 %v12471_v6, %v14149_v57 }
0x10da   : > { %12478 = vrcp.f32 %v8113_v10 }
0x10db   : > { %11587 = vmatprep.mubr.msk.f32.mxu0 %vm3562_vm4, %v8155_v24 }
0x10dc   : > { %v8110_v55 = vpop.xlane.xlu1 %8109  ;;  %11588 = vmatmul.mubr.msk.f32.vlgmr.msra.gmra.mrb[86].mxu0 %vm3562_vm4, %v8156_v41 }
0x10dd   : > { %12480 = vrcp.f32 %v8110_v55  ;;  %12266 = vmatpush3.bf16.msra.mxu0 %v14053_v9  ;;  %v8107_v61 = vpop.xlane.xlu0 %8106 }
0x10de   : > { %12272 = vmatprep.subr.bf16.mxu0 %v14061_v16  ;;  %12482 = vrcp.f32 %v8107_v61 }
0x10df   : > { %v12473_v4 = vpop.eup %12472 }
0x10e0   : > { %v12475_v11 = vpop.eup %12474  ;;  %v8128_v3 = vpop.xlane.xlu1 %8127  ;;  %v8154_v2 = vmul.f32 %v12473_v4, %v14159_v39 }
0x10e1   : > { %12484 = vrcp.f32 %v8128_v3  ;;  %v8125_v57 = vpop.xlane.xlu0 %8124  ;;  %v8153_v53 = vmul.f32 %v12475_v11, %v14161_v59 }
0x10e2   : > { %12486 = vrcp.f32 %v8125_v57 }
0x10e3   : > { %v12477_v0 = vpop.eup %12476  ;;  %11580 = vmatprep.mubr.msk.f32.mxu1 %vm3562_vm4, %v8153_v53 }
0x10e4   : > { %v12479_v50 = vpop.eup %12478  ;;  %v8122_v44 = vpop.xlane.xlu1 %8121  ;;  %11581 = vmatmul.mubr.msk.f32.vlgmr.msra.gmra.mrb[82].mxu1 %vm3562_vm4, %v8154_v2  ;;  %v8160_v12 = vmul.f32 %v12477_v0, %v14169_v19 }
0x10e5   : > { %12488 = vrcp.f32 %v8122_v44  ;;  %12262 = vmatpush3.bf16.msra.mxu1 %v14059_v5  ;;  %v8119_v9 = vpop.xlane.xlu0 %8118  ;;  %v8159_v17 = vmul.f32 %v12479_v50, %v14171_v18 }
0x10e6   : > { %12268 = vmatprep.subr.bf16.mxu1 %v14063_v23  ;;  %12490 = vrcp.f32 %v8119_v9 }
0x10e7   : > { %v12481_v39 = vpop.eup %12480  ;;  %11601 = vmatprep.mubr.msk.f32.mxu0 %vm3562_vm4, %v8159_v17 }
0x10e8   : > { %v12483_v59 = vpop.eup %12482  ;;  %11602 = vmatmul.mubr.msk.f32.vlgmr.msra.gmra.mrb[88].mxu0 %vm3562_vm4, %v8160_v12  ;;  %v8158_v5 = vmul.f32 %v12481_v39, %v14177_v22 }
0x10e9   : > { %12274 = vmatpush3.bf16.msra.mxu0 %v14061_v16  ;;  %v8157_v54 = vmul.f32 %v12483_v59, %v14179_v62 }
0x10ea   : > { %11625 = vmatprep.subr.mxu0 %v10219_v38 }
0x10eb   : > { %v12485_v30 = vpop.eup %12484  ;;  %11594 = vmatprep.mubr.msk.f32.mxu1 %vm3562_vm4, %v8157_v54 }
0x10ec   : > { %v12487_v18 = vpop.eup %12486  ;;  %v8134_v19 = vpop.xlane.xlu1 %8133  ;;  %11595 = vmatmul.mubr.msk.f32.vlgmr.msra.gmra.mrb[84].mxu1 %vm3562_vm4, %v8158_v5  ;;  %v8164_v34 = vmul.f32 %v12485_v30, %v14187_v51 }
0x10ed   : > { %12492 = vrcp.f32 %v8134_v19  ;;  %12270 = vmatpush3.bf16.msra.mxu1 %v14063_v23  ;;  %v8131_v26 = vpop.xlane.xlu0 %8130  ;;  %v8163_v28 = vmul.f32 %v12487_v18, %v14189_v43  ;;  %v10220_v43 = vld [vmem:[%s14455_s13 + $0x48] sm:$0xff] }
0x10ee   : > { %12276 = vmatprep.subr.bf16.mxu1 %v14065_v29  ;;  %12494 = vrcp.f32 %v8131_v26 }
0x10ef   : > { %v12489_v16 = vpop.eup %12488  ;;  %11615 = vmatprep.mubr.msk.f32.mxu0 %vm3562_vm4, %v8163_v28 }
0x10f0   : > { %v12491_v22 = vpop.eup %12490  ;;  %11616 = vmatmul.mubr.msk.f32.vlgmr.msra.gmra.mrb[90].mxu0 %vm3562_vm4, %v8164_v34  ;;  %v8162_v35 = vmul.f32 %v12489_v16, %v14195_v14  ;;  %v10223_v14 = vld [vmem:[%s14455_s13 + $0x60] sm:$0xff] }
0x10f1   : > { %v8161_v62 = vmul.f32 %v12491_v22, %v14197_v63  ;;  %11626 = vmatpush3.msra.mxu0 %v10219_v38 }
0x10f3   : > { %11608 = vmatprep.mubr.msk.f32.mxu1 %vm3562_vm4, %v8161_v62 }
0x10f4   : > { %11609 = vmatmul.mubr.msk.f32.vlgmr.msra.gmra.mrb[86].mxu1 %vm3562_vm4, %v8162_v35 }
0x10f5   : > { %12278 = vmatpush3.bf16.msra.mxu1 %v14065_v29  ;;  %v10221_v29 = vld [vmem:[%s14455_s13 + $0x50] sm:$0xff] }
0x10f6   : > { %11635 = vmatprep.subr.mxu0 %v10221_v29  ;;  %11630 = vmatprep.subr.mxu1 %v10220_v43 }
0x10f7   : > { %v12493_v23 = vpop.eup %12492 }
0x10f8   : > { %v12495_v25 = vpop.eup %12494  ;;  %v8166_v51 = vmul.f32 %v12493_v23, %v14203_v15 }
0x10f9   : > { %v8165_v13 = vmul.f32 %v12495_v25, %v14205_v47 }
0x10fb   : > { %11622 = vmatprep.mubr.msk.f32.mxu1 %vm3562_vm4, %v8165_v13 }
0x10fc   : > { %11623 = vmatmul.mubr.msk.f32.vlgmr.msra.gmra.mrb[88].mxu1 %vm3562_vm4, %v8166_v51 }
0x10fd   : > { %11631 = vmatpush3.msra.mxu1 %v10220_v43 }
0x10fe   : > { %11640 = vmatprep.subr.mxu1 %v10222_v45 }
0x11a7   : > { %v11575_v42 = vpop.f32.mrb[80].mxu1 }
0x11a8   : > { %v8239_v46 = vpop.f32.mrb[81].mxu1 }
0x11a9   : > { %11627 = vmatprep.mubr.msk.f32.mxu0 %vm2849_vm2, %v8239_v46 }
0x11aa   : > { %11628 = vmatmul.mubr.msk.f32.vlgmr.msra.gmra.mrb[92].mxu0 %vm2849_vm2, %v11575_v42  ;;  %v10244_v42 = vld [vmem:[%s14456_s14 + $0x1] ss:$0 sm:$0xff] }
0x11ab   : > { %11636 = vmatpush3.msra.mxu0 %v10221_v29 }
0x11ac   : > { %11645 = vmatprep.subr.mxu0 %v10223_v14 }
0x11af   : > { %v11589_v63 = vpop.f32.mrb[86].mxu0 }
0x11b0   : > { %v8401_v7 = vpop.f32.mrb[87].mxu0 }
0x11b1   : > { %11637 = vmatprep.mubr.msk.f32.mxu0 %vm2849_vm2, %v8401_v7 }
0x11b2   : > { %11638 = vmatmul.mubr.msk.f32.vlgmr.msra.gmra.mrb[94].mxu0 %vm2849_vm2, %v11589_v63 }
0x11b3   : > { %11646 = vmatpush3.msra.mxu0 %v10223_v14 }
0x11b4   : > { %11655 = vmatprep.subr.mxu0 %v10225_v20 }
0x11b7   : > { %v11582_v15 = vpop.f32.mrb[82].mxu1 }
0x11b8   : > { %v8320_v47 = vpop.f32.mrb[83].mxu1 }
0x11b9   : > { %11632 = vmatprep.mubr.msk.f32.mxu1 %vm2849_vm2, %v8320_v47 }
0x11ba   : > { %11633 = vmatmul.mubr.msk.f32.vlgmr.msra.gmra.mrb[90].mxu1 %vm2849_vm2, %v11582_v15 }
0x11bb   : > { %v11603_v36 = vpop.f32.mrb[88].mxu0  ;;  %11641 = vmatpush3.msra.mxu1 %v10222_v45 }
0x11bc   : > { %v8563_v21 = vpop.f32.mrb[89].mxu0  ;;  %11650 = vmatprep.subr.mxu1 %v10224_v52 }
0x11bd   : > { %11647 = vmatprep.mubr.msk.f32.mxu0 %vm2849_vm2, %v8563_v21 }
0x11be   : > { %11648 = vmatmul.mubr.msk.f32.vlgmr.msra.gmra.mrb[96].mxu0 %vm2849_vm2, %v11603_v36 }
0x11bf   : > { %v11596_v58 = vpop.f32.mrb[84].mxu1  ;;  %11656 = vmatpush3.msra.mxu0 %v10225_v20 }
0x11c0   : > { %v8482_v37 = vpop.f32.mrb[85].mxu1 }
0x11c1   : > { %11642 = vmatprep.mubr.msk.f32.mxu1 %vm2849_vm2, %v8482_v37 }
0x11c2   : > { %11643 = vmatmul.mubr.msk.f32.vlgmr.msra.gmra.mrb[92].mxu1 %vm2849_vm2, %v11596_v58 }
0x11c3   : > { %v11617_v60 = vpop.f32.mrb[90].mxu0  ;;  %11651 = vmatpush3.msra.mxu1 %v10224_v52 }
0x11c4   : > { %v8725_v1 = vpop.f32.mrb[91].mxu0  ;;  %11660 = vmatprep.subr.mxu1 %v10226_v32 }
0x11c5   : > { %11657 = vmatprep.mubr.msk.f32.mxu0 %vm2849_vm2, %v8725_v1 }
0x11c6   : > { %11658 = vmatmul.mubr.msk.f32.vlgmr.msra.gmra.mrb[98].mxu0 %vm2849_vm2, %v11617_v60 }
0x11c7   : > { %v11610_v48 = vpop.f32.mrb[86].mxu1 }
0x11c8   : > { %v8644_v56 = vpop.f32.mrb[87].mxu1 }
0x11c9   : > { %11652 = vmatprep.mubr.msk.f32.mxu1 %vm2849_vm2, %v8644_v56 }
0x11ca   : > { %11653 = vmatmul.mubr.msk.f32.vlgmr.msra.gmra.mrb[94].mxu1 %vm2849_vm2, %v11610_v48 }
0x11cb   : > { %11661 = vmatpush3.msra.mxu1 %v10226_v32 }
0x11cf   : > { %v11624_v33 = vpop.f32.mrb[88].mxu1 }
0x11d0   : > { %v8806_v31 = vpop.f32.mrb[89].mxu1 }
0x11d1   : > { %11662 = vmatprep.mubr.msk.f32.mxu1 %vm2849_vm2, %v8806_v31  ;;  %v10249_v31 = vld [vmem:[%s14459_s17 + $0x20] sm:$0xff] }
0x11d2   : > { %11663 = vmatmul.mubr.msk.f32.vlgmr.msra.gmra.mrb[96].mxu1 %vm2849_vm2, %v11624_v33 }
0x127d   : > { %v11629_v49 = vpop.f32.mrb[92].mxu0 }
0x127e   : > { %v8896_v6 = vpop.f32.mrb[93].mxu0  ;;  %v9487_v41 = vsel %vm855_vm1, %v11629_v49, 0.0  ;;  %v10250_v49 = vld [vmem:[%s14459_s17 + $0x28] sm:$0xff] }
0x127f   : > { %v9472_v4 = vsel %vm855_vm1, %v8896_v6, 0.0  ;;  %v12279_v6 = vpack.c.bf16 %v10250_v49, %v10249_v31 }
0x1281   : > { %12280 = vmatprep.subr.bf16.mxu0 %v12279_v6 }
0x1282   : > { %12282 = vmatpush3.bf16.msra.mxu0 %v12279_v6 }
0x1285   : > { %v11639_v8 = vpop.f32.mrb[94].mxu0 }
0x1286   : > { %v9058_v10 = vpop.f32.mrb[95].mxu0  ;;  %v9490_v57 = vsel %vm855_vm1, %v11639_v8, 0.0  ;;  %v10251_v8 = vld [vmem:[%s14459_s17 + $0x30] sm:$0xff] }
0x1287   : > { %v9475_v2 = vsel %vm855_vm1, %v9058_v10, 0.0  ;;  %v10252_v10 = vld [vmem:[%s14459_s17 + $0x38] sm:$0xff] }
0x128d   : > { %v11634_v24 = vpop.f32.mrb[90].mxu1 }
0x128e   : > { %v9488_v55 = vsel %vm855_vm1, %v11634_v24, 0.0  ;;  %v8977_v61 = vpop.f32.mrb[91].mxu1  ;;  %v12283_v24 = vpack.c.bf16 %v10252_v10, %v10251_v8 }
0x128f   : > { %v9489_v11 = vadd.f32 %v9488_v55, %v9487_v41  ;;  %v9473_v3 = vsel %vm855_vm1, %v8977_v61, 0.0 }
0x1290   : > { %v9474_v53 = vadd.f32 %v9473_v3, %v9472_v4  ;;  %12284 = vmatprep.subr.bf16.mxu0 %v12283_v24 }
0x1291   : > { %v11649_v0 = vpop.f32.mrb[96].mxu0  ;;  %v9491_v50 = vadd.f32 %v9490_v57, %v9489_v11  ;;  %12286 = vmatpush3.bf16.msra.mxu0 %v12283_v24 }
0x1292   : > { %v9220_v44 = vpop.f32.mrb[97].mxu0  ;;  %v9476_v9 = vadd.f32 %v9475_v2, %v9474_v53  ;;  %v9494_v5 = vsel %vm855_vm1, %v11649_v0, 0.0  ;;  %v10247_v53 = vld [vmem:[%s14457_s15 + $0x1] ss:$0 sm:$0xff] }
0x1293   : > { %v9479_v18 = vsel %vm855_vm1, %v9220_v44, 0.0  ;;  %v10248_v44 = vld [vmem:[%s14458_s16 + $0x1] ss:$0 sm:$0xff] }
0x1295   : > { %v11644_v17 = vpop.f32.mrb[92].mxu1 }
0x1296   : > { %v9492_v12 = vsel %vm855_vm1, %v11644_v17, 0.0  ;;  %v9139_v39 = vpop.f32.mrb[93].mxu1 }
0x1297   : > { %v9493_v59 = vadd.f32 %v9492_v12, %v9491_v50  ;;  %v9477_v54 = vsel %vm855_vm1, %v9139_v39, 0.0 }
0x1298   : > { %v9478_v30 = vadd.f32 %v9477_v54, %v9476_v9  ;;  %v10258_v54 = vld [vmem:[%s14461_s19 + $0x48] sm:$0xff] }
0x1299   : > { %v11659_v19 = vpop.f32.mrb[98].mxu0  ;;  %v9495_v26 = vadd.f32 %v9494_v5, %v9493_v59  ;;  %v10257_v59 = vld [vmem:[%s14461_s19 + $0x40] sm:$0xff] }
0x129a   : > { %v9382_v28 = vpop.f32.mrb[99].mxu0  ;;  %v9480_v34 = vadd.f32 %v9479_v18, %v9478_v30  ;;  %v9498_v25 = vsel %vm855_vm1, %v11659_v19, 0.0  ;;  %v12287_v5 = vpack.c.bf16 %v10258_v54, %v10257_v59  ;;  %v10259_v30 = vld [vmem:[%s14461_s19 + $0x50] sm:$0xff]  ;;  %v10260_v18 = vld [vmem:[%s14461_s19 + $0x58] sm:$0xff] }
0x129b   : > { %v9483_v51 = vsel %vm855_vm1, %v9382_v28, 0.0  ;;  %v12291_v19 = vpack.c.bf16 %v10260_v18, %v10259_v30  ;;  %v10262_v28 = vld [vmem:[%s14461_s19 + $0x68] sm:$0xff] }
0x129c   : > { %12288 = vmatprep.subr.bf16.mxu1 %v12287_v5 }
0x129d   : > { %v11654_v16 = vpop.f32.mrb[94].mxu1  ;;  %12290 = vmatpush3.bf16.msra.mxu1 %v12287_v5 }
0x129e   : > { %v9496_v22 = vsel %vm855_vm1, %v11654_v16, 0.0  ;;  %v9301_v62 = vpop.f32.mrb[95].mxu1  ;;  %12292 = vmatprep.subr.bf16.mxu1 %v12291_v19  ;;  %v10263_v16 = vld [vmem:[%s14461_s19 + $0x70] sm:$0xff] }
0x129f   : > { %v9497_v35 = vadd.f32 %v9496_v22, %v9495_v26  ;;  %v9481_v23 = vsel %vm855_vm1, %v9301_v62, 0.0  ;;  %v10261_v26 = vld [vmem:[%s14461_s19 + $0x60] sm:$0xff]  ;;  %v10264_v22 = vld [vmem:[%s14461_s19 + $0x78] sm:$0xff] }
0x12a0   : > { %v9482_v13 = vadd.f32 %v9481_v23, %v9480_v34  ;;  %v12295_v34 = vpack.c.bf16 %v10262_v28, %v10261_v26  ;;  %v12299_v62 = vpack.c.bf16 %v10264_v22, %v10263_v16 }
0x12a1   : > { %v9499_v38 = vadd.f32 %v9498_v25, %v9497_v35  ;;  %12294 = vmatpush3.bf16.msra.mxu1 %v12291_v19  ;;  %v10254_v35 = vld [vmem:[%s14460_s18 + $0x1] ss:$0 sm:$0xff] }
0x12a2   : > { %v9484_v29 = vadd.f32 %v9483_v51, %v9482_v13  ;;  %12296 = vmatprep.subr.bf16.mxu1 %v12295_v34 }
0x12a5   : > { %v11664_v43 = vpop.f32.mrb[96].mxu1  ;;  %12298 = vmatpush3.bf16.msra.mxu1 %v12295_v34 }
0x12a6   : > { %v9500_v45 = vsel %vm855_vm1, %v11664_v43, 0.0  ;;  %v9463_v46 = vpop.f32.mrb[97].mxu1  ;;  %12300 = vmatprep.subr.bf16.mxu1 %v12299_v62 }
0x12a7   : > { %v9501_v14 = vadd.f32 %v9500_v45, %v9499_v38  ;;  %v9485_v63 = vsel %vm855_vm1, %v9463_v46, 0.0 }
0x12a8   : > { %v9486_v7 = vadd.f32 %v9485_v63, %v9484_v29 }
0x12a9   : > { %v9511_v20 = vadd.f32 %v10244_v42, %v9501_v14  ;;  %12302 = vmatpush3.bf16.msra.mxu1 %v12299_v62 }
0x12aa   : > { %v9510_v15 = vadd.f32 %v10244_v42, %v9486_v7 }
0x12ab   : > { %v14313_v47 = vadd.f32 %v9511_v20, %v13595_v27 }
0x12ac   : > { %v14316_v52 = vadd.f32 %v9510_v15, %v13598_v40  ;;  %v10266_v15 = vld [vmem:[%s14462_s20 + $0x1] ss:$0 sm:$0xff] }
0x12ad   : > { %v9521_v36 = vsel %vm855_vm1, %v14313_v47, 0.0 }
0x12ae   : > { %9522 = vadd.xlane.f32.xlu1 %v9521_v36  ;;  %v9518_v21 = vsel %vm855_vm1, %v14316_v52, 0.0 }
0x12af   : > { %9519 = vadd.xlane.f32.xlu0 %v9518_v21 }
0x133b   : > { %v9523_v58 = vpop.xlane.xlu1 %9522 }
0x133c   : > { %v9525_v37 = vmul.f32 0.03125, %v9523_v58  ;;  %v9520_v32 = vpop.xlane.xlu0 %9519 }
0x133d   : > { %v9524_v60 = vmul.f32 0.03125, %v9520_v32 }
0x133e   : > { %v9527_v1 = vsub.f32 %v14313_v47, %v9525_v37 }
0x133f   : > { %v9526_v27 = vsub.f32 %v14316_v52, %v9524_v60 }
0x1340   : > { %v9529_v48 = vmul.f32 %v9527_v1, %v9527_v1 }
0x1341   : > { %v9528_v56 = vmul.f32 %v9526_v27, %v9526_v27 }
0x1342   : > { %v9533_v40 = vsel %vm855_vm1, %v9529_v48, 0.0 }
0x1343   : > { %9534 = vadd.xlane.f32.xlu1 %v9533_v40  ;;  %v9530_v33 = vsel %vm855_vm1, %v9528_v56, 0.0 }
0x1344   : > { %9531 = vadd.xlane.f32.xlu0 %v9530_v33 }
0x13d0   : > { %v9535_v41 = vpop.xlane.xlu1 %9534 }
0x13d1   : > { %v9537_v55 = vmul.f32 0.03125, %v9535_v41  ;;  %v9532_v61 = vpop.xlane.xlu0 %9531 }
0x13d2   : > { %v9536_v4 = vmul.f32 0.03125, %v9532_v61 }
0x13d3   : > { %v9539_v11 = vadd.f32 1e-05, %v9537_v55 }
0x13d4   : > { %v9538_v3 = vadd.f32 1e-05, %v9536_v4 }
0x13d5   : > { %12496 = vrsqrt.f32 %v9539_v11 }
0x13d6   : > { %12498 = vrsqrt.f32 %v9538_v3  ;;  %v10269_v3 = vld [vmem:[%s14463_s21] ss:$0 sm:$0xff] }
0x13df   : > { %v12497_v57 = vpop.eup %12496 }
0x13e0   : > { %v12499_v2 = vpop.eup %12498  ;;  %v9543_v0 = vmul.f32 %v12497_v57, %v9527_v1 }
0x13e1   : > { %v9542_v50 = vmul.f32 %v12499_v2, %v9526_v27  ;;  %v10270_v2 = vld [vmem:[%s14464_s22] ss:$0 sm:$0xff] }
0x13e2   : > { %v9551_v9 = vmul.f32 %v10247_v53, %v9543_v0 }
0x13e3   : > { %v9550_v17 = vmul.f32 %v10247_v53, %v9542_v50 }
0x13e4   : > { %v9559_v39 = vadd.f32 %v10248_v44, %v9551_v9 }
0x13e5   : > { %v9558_v12 = vadd.f32 %v10248_v44, %v9550_v17 }
0x13e7   : > { %11673 = vmatprep.mubr.msk.f32.mxu0 %vm855_vm1, %v9558_v12 }
0x13e8   : > { %11674 = vmatmul.mubr.msk.f32.vlgmr.msra.gmra.mrb[100].mxu0 %vm855_vm1, %v9559_v39 }
0x14bb   : > { %v11675_v23 = vpop.f32.mrb[100].mxu0 }
0x14bc   : > { %v9651_v25 = vadd.f32 %v11675_v23, %v10254_v35  ;;  %v9645_v13 = vpop.f32.mrb[101].mxu0 }
0x14bd   : > { %v9646_v51 = vadd.f32 %v10254_v35, %v9645_v13 }
0x14be   : > { %v9657_v38 = vmul.f32 0.70710677, %v9651_v25  ;;  %v9655_v63 = vmul.f32 0.5, %v9651_v25 }
0x14bf   : > { %v9656_v29 = vmul.f32 0.70710677, %v9646_v51  ;;  %v9654_v46 = vmul.f32 0.5, %v9646_v51 }
0x14c0   : > { %12500 = verf.f32 %v9657_v38 }
0x14c1   : > { %12502 = verf.f32 %v9656_v29 }
0x14ca   : > { %v12501_v43 = vpop.eup %12500 }
0x14cb   : > { %v12503_v45 = vpop.eup %12502  ;;  %v9661_v42 = vadd.f32 1.0, %v12501_v43 }
0x14cc   : > { %v9660_v14 = vadd.f32 1.0, %v12503_v45 }
0x14cd   : > { %v9663_v20 = vmul.f32 %v9661_v42, %v9655_v63 }
0x14ce   : > { %v9662_v7 = vmul.f32 %v9660_v14, %v9654_v46 }
0x14d0   : > { %11692 = vmatprep.mubr.msk.f32.mxu1 %vm713_vm0, %v9662_v7 }
0x14d1   : > { %11693 = vmatmul.mubr.msk.f32.vlgmr.msra.gmra.mrb[98].mxu1 %vm713_vm0, %v9663_v20 }
0x15a4   : > { %v11694_v36 = vpop.f32.mrb[98].mxu1 }
0x15a5   : > { %v9759_v21 = vadd.f32 %v11694_v36, %v10266_v15  ;;  %v9753_v58 = vpop.f32.mrb[99].mxu1 }
0x15a6   : > { %v9754_v37 = vadd.f32 %v10266_v15, %v9753_v58 }
0x15a7   : > { %v9763_v32 = vadd.f32 %v9759_v21, %v14313_v47 }
0x15a8   : > { %v9762_v60 = vadd.f32 %v9754_v37, %v14316_v52 }
0x15a9   : > { %v9769_v1 = vsel %vm855_vm1, %v9763_v32, 0.0 }
0x15aa   : > { %9770 = vadd.xlane.f32.xlu1 %v9769_v1  ;;  %v9766_v27 = vsel %vm855_vm1, %v9762_v60, 0.0 }
0x15ab   : > { %9767 = vadd.xlane.f32.xlu0 %v9766_v27 }
0x1637   : > { %v9771_v48 = vpop.xlane.xlu1 %9770 }
0x1638   : > { %v9773_v56 = vmul.f32 0.03125, %v9771_v48  ;;  %v9768_v40 = vpop.xlane.xlu0 %9767 }
0x1639   : > { %v9772_v33 = vmul.f32 0.03125, %v9768_v40 }
0x163a   : > { %v9775_v31 = vsub.f32 %v9763_v32, %v9773_v56 }
0x163b   : > { %v9774_v49 = vsub.f32 %v9762_v60, %v9772_v33 }
0x163c   : > { %v9777_v6 = vmul.f32 %v9775_v31, %v9775_v31 }
0x163d   : > { %v9776_v8 = vmul.f32 %v9774_v49, %v9774_v49 }
0x163e   : > { %v9781_v10 = vsel %vm855_vm1, %v9777_v6, 0.0 }
0x163f   : > { %9782 = vadd.xlane.f32.xlu1 %v9781_v10  ;;  %v9778_v47 = vsel %vm855_vm1, %v9776_v8, 0.0 }
0x1640   : > { %9779 = vadd.xlane.f32.xlu0 %v9778_v47 }
0x16cc   : > { %v9783_v52 = vpop.xlane.xlu1 %9782 }
0x16cd   : > { %v9785_v24 = vmul.f32 0.03125, %v9783_v52  ;;  %v9780_v41 = vpop.xlane.xlu0 %9779 }
0x16ce   : > { %v9784_v55 = vmul.f32 0.03125, %v9780_v41 }
0x16cf   : > { %v9787_v61 = vadd.f32 1e-05, %v9785_v24 }
0x16d0   : > { %v9786_v4 = vadd.f32 1e-05, %v9784_v55 }
0x16d1   : > { %12504 = vrsqrt.f32 %v9787_v61 }
0x16d2   : > { %12506 = vrsqrt.f32 %v9786_v4 }
0x16db   : > { %v12505_v11 = vpop.eup %12504 }
0x16dc   : > { %v12507_v57 = vpop.eup %12506  ;;  %v9791_v53 = vmul.f32 %v12505_v11, %v9775_v31 }
0x16dd   : > { %v9790_v0 = vmul.f32 %v12507_v57, %v9774_v49 }
0x16de   : > { %v9799_v50 = vmul.f32 %v10269_v3, %v9791_v53 }
0x16df   : > { %v9798_v44 = vmul.f32 %v10269_v3, %v9790_v0 }
0x16e0   : > { %v9807_v9 = vadd.f32 %v10270_v2, %v9799_v50 }
0x16e1   : > { %v9806_v17 = vadd.f32 %v10270_v2, %v9798_v44 }
0x16e2   : > { %9809 = vst.msk [vmem:[%s703_s2 + $0x8] sm:$0xff] %vm855_vm1, %v9807_v9 }
0x16e3   : > { %9808 = vst.msk [vmem:[%s703_s2] sm:$0xff] %vm855_vm1, %v9806_v17 }
0x16e4   : > { %12521 = shalt.err (!%p12518_p3)
}
0x16e5   : > { %s12522_s4 = scalar_lea.hbm %s14395_s9, 256  ;;  %s12526_s1 = scalar_lea.hbm %s14465_s23, 512 }
0x16e6   : > { %p12523_p4 = scmp.ne.s32.totalorder %s14395_s9, %s12522_s4  ;;  %p12527_p9 = scmp.lt.u32.totalorder %s14395_s9, %s14465_s23 }
0x16e7   : > { %p12528_p10 = scmp.lt.u32.totalorder %s12526_s1, %s12522_s4  ;;  %p12530_p12 = scmp.lt.u32.totalorder %s12522_s4, %s14395_s9 }
0x16e8   : > { %p12524_p7 = pnand %p12523_p4, %p12733_p5 }
0x16e9   : > { %p12529_p11 = por %p12528_p10, %p12527_p9 }
0x16ea   : > { %p12525_p8 = pneg %p12524_p7 }
0x16eb   : > { %p12531_p13 = por %p12530_p12, %p12529_p11 }
0x16ed   : > { %p12532_p0 = pnand %p12531_p13, %p12525_p8 }
0x16ef   : > { %12535 = shalt.err (!%p12532_p0)
}
0x16f0   : > { %s12573_s26 = smov 128   ;;  %s12574_s8 = smov 8  }
0x16f1   : > { %12303 = dma.vmem_to_hbm [thread:$0]  (%p12733_p5), %s14397_s0, 256, %s14395_s9, %s14401_s5, %s12573_s26, %s12573_s26, %s12574_s8  }
0x16f2 PF: > { %s14503_s28 = sld [smem:[#allocation5_spill]]  ;;  %p12309_p1 = scmp.ge.s32.totalorder %s12570_s25, 2 }
0x16f4   : > { %p12306_p2 = pnand %p12309_p1, %p12737_p6 }
0x16f8   : > { %s9839_s29 = sand.u32 1, %s14503_s28  }
0x16f9   : > { %s9840_s4 = scalar_lea.sflag [#allocation3], %s9839_s29 }
0x16fa   : > { %12553 = dma.done.wait (!%p12306_p2), %s9840_s4, 256  }
0x16fb   : > { %12555 = vsyncadd (!%p12306_p2), %s9840_s4, 4294967040  ;;  %s14505_s25 = sld [smem:[#allocation7_spill]]  ;;  %s14506_s3 = sld [smem:[#allocation6_spill]] }
0x16fc   : > { %s14507_s24 = sld [smem:[#allocation8_spill]]  ;;  %s14508_s4 = smov %s12562_s30 }
0x1701   : > { %p33_p3 = scmp.ge.s32.totalorder %s14505_s25, 4   ;;  %s14509_s30 = smov %s14506_s3 }
0x1703   :  { %35 = sbr.rel (!%p33_p3) target bundleno = 14 (0xe), region = 160 }
0x170a   :  { %9845 = vsyncpa [#allocation3], 1 }
0x170b   :  { %9847 = vsyncpa [#allocation3 + $0x1], 1 }

</bundles_post_ra>
